<compile_context>
chip_gen: v7x
topology: tpu7x:2x2x1
jax: 0.10.0
libtpu: 0.0.40
codegen_flags: <defaults>
</compile_context>

<pallas_src>
import functools
import math

import jax
import jax.numpy as jnp
import numpy as np
from jax import lax
from jax.experimental import pallas as pl
from jax.experimental.pallas import tpu as pltpu


def _permute_gate_cols(w, H):
    """Reorder the 4H gate columns from PyTorch's [i,f,g,o] to [i,f,o,g]."""
    return jnp.concatenate(
        [w[..., :2 * H], w[..., 3 * H:4 * H], w[..., 2 * H:3 * H]], axis=-1)


def _lstm_layer_kernel(gx_ref, bias_ref, h0_ref, c0_ref, whh_ref,
                       out_ref, hn_ref, cn_ref,
                       h_sc, c_sc,
                       *, hidden_size, batch, t_chunk, seq_len, needs_mask):
    """One LSTM layer; grid axis 0 iterates sequentially over time *chunks*.

    gx_ref : (t_chunk*B, 4H) stream dtype  precomputed x_t @ W_ih^T (no bias)
    bias_ref: (1, 4H) f32                  b_ih + b_hh (gate cols = [i,f,o,g])
    whh_ref: (H, 4H) f32                   recurrent weights, resident
    out_ref: (t_chunk*B, H) stream dtype   hidden-state sequence for this chunk
    """
    chunk = pl.program_id(0)
    H = hidden_size
    B = batch

    # Load initial hidden/cell state into persistent VMEM scratch at chunk 0.
    @pl.when(chunk == 0)
    def _():
        h_sc[...] = h0_ref[...]
        c_sc[...] = c0_ref[...]

    bias = bias_ref[...]               # (1, 4H) f32, broadcasts over batch
    h = h_sc[...]                      # (B, H) f32
    c = c_sc[...]                      # (B, H) f32

    # Fully unrolled time loop over the chunk (static indices -> unmasked,
    # lane-dense stores; full LLO scheduling visibility across the chunk).
    for t in range(t_chunk):
        gx_t = gx_ref[pl.ds(t * B, B), :].astype(jnp.float32)
        # W_hh consumed straight from VMEM each step (not held in vregs).
        gates = gx_t + bias + jnp.dot(h, whh_ref[...],
                                      preferred_element_type=jnp.float32)

        # Gate order is [i, f, o, g]: one contiguous sigmoid, one tanh.
        sig = jax.nn.sigmoid(gates[:, :3 * H])
        g_g = jnp.tanh(gates[:, 3 * H:])
        i_g = sig[:, 0 * H:1 * H]
        f_g = sig[:, 1 * H:2 * H]
        o_g = sig[:, 2 * H:3 * H]

        c_new = f_g * c + i_g * g_g
        h_new = o_g * jnp.tanh(c_new)

        if needs_mask:
            # Time padding at the end of the sequence: keep state unchanged.
            valid = (chunk * t_chunk + t) < seq_len
            h_new = jnp.where(valid, h_new, h)
            c_new = jnp.where(valid, c_new, c)

        out_ref[pl.ds(t * B, B), :] = h_new.astype(out_ref.dtype)
        h, c = h_new, c_new

    h_sc[...] = h
    c_sc[...] = c

    @pl.when(chunk == pl.num_programs(0) - 1)
    def _():
        hn_ref[...] = h
        cn_ref[...] = c


def _pick_t_chunk(T, B, G, stream_itemsize, t_chunk_max, budget_bytes, row_align):
    """Choose a time-chunk size.

    Preference order:
      1. A divisor of T (no padding, no wasted steps) whose flattened row count
         (t_chunk*B) is a multiple of row_align (unmasked, tile-aligned blocks).
      2. A single chunk covering all of T (block == full array, always legal).
      3. Padding + in-kernel masking (last resort; costs one extra pass over gx).
    Returns (t_chunk, needs_pad).
    """
    cap = max(1, min(T, t_chunk_max,
                     budget_bytes // max(1, B * G * stream_itemsize)))
    for tc in range(cap, 0, -1):
        if T % tc == 0 and ((tc * B) % row_align == 0 or tc == T):
            return tc, False
    if T * B * G * stream_itemsize <= 4 * budget_bytes:
        return T, False
    step = row_align // math.gcd(B, row_align)
    tc = max(step, (cap // step) * step)
    return tc, True


def _run_lstm_layer(gx_flat, bias, h0, c0, whh_t, *, batch, seq_len, out_dtype,
                    t_chunk_max=16, gx_block_budget=2 * 1024 * 1024):
    """gx_flat: (T*B, 4H) time-major flattened pre-computed input projections.

    Returns (out_flat (T*B, H) out_dtype, h_n (B, H) f32, c_n (B, H) f32).
    """
    B, T = batch, seq_len
    TB, G = gx_flat.shape
    H = h0.shape[-1]
    assert G == 4 * H and TB == T * B

    stream_itemsize = jnp.dtype(gx_flat.dtype).itemsize
    out_itemsize = jnp.dtype(out_dtype).itemsize
    # Sub-32-bit dtypes pack 16 rows per sublane-tile; f32 packs 8.
    row_align = 16 if min(stream_itemsize, out_itemsize) < 4 else 8

    t_chunk, needs_pad = _pick_t_chunk(T, B, G, stream_itemsize, t_chunk_max,
                                       gx_block_budget, row_align)
    num_chunks = -(-T // t_chunk)
    T_pad = num_chunks * t_chunk
    needs_mask = (T_pad != T)
    if needs_mask:
        gx_flat = jnp.pad(gx_flat, ((0, (T_pad - T) * B), (0, 0)))

    kernel = functools.partial(_lstm_layer_kernel, hidden_size=H, batch=B,
                               t_chunk=t_chunk, seq_len=T, needs_mask=needs_mask)

    rows = t_chunk * B
    # Rough VMEM estimate (streamed blocks double-buffered + resident tensors).
    est = (2 * rows * G * stream_itemsize      # gx chunk (double buffered)
           + 2 * rows * H * out_itemsize       # out chunk (double buffered)
           + 2 * H * G * 4                     # resident W_hh^T (+margin)
           + 12 * B * H * 4 + 2 * G * 4)       # h/c state, h0/c0, hn/cn, bias
    vmem_limit = int(min(48 * 1024 * 1024, max(8 * 1024 * 1024, 2 * est)))

    out_flat, h_n, c_n = pl.pallas_call(
        kernel,
        out_shape=(
            jax.ShapeDtypeStruct((T_pad * B, H), out_dtype),
            jax.ShapeDtypeStruct((B, H), jnp.float32),
            jax.ShapeDtypeStruct((B, H), jnp.float32),
        ),
        grid_spec=pltpu.PrefetchScalarGridSpec(
            num_scalar_prefetch=0,
            grid=(num_chunks,),
            in_specs=[
                pl.BlockSpec((rows, G), lambda c: (c, 0)),   # gx chunk (streamed)
                pl.BlockSpec((1, G), lambda c: (0, 0)),      # bias (resident)
                pl.BlockSpec((B, H), lambda c: (0, 0)),      # h0 (resident)
                pl.BlockSpec((B, H), lambda c: (0, 0)),      # c0 (resident)
                pl.BlockSpec((H, G), lambda c: (0, 0)),      # W_hh^T (resident)
            ],
            out_specs=[
                pl.BlockSpec((rows, H), lambda c: (c, 0)),   # hidden sequence
                pl.BlockSpec((B, H), lambda c: (0, 0)),      # h_n
                pl.BlockSpec((B, H), lambda c: (0, 0)),      # c_n
            ],
            scratch_shapes=[
                pltpu.VMEM((B, H), jnp.float32),              # h state
                pltpu.VMEM((B, H), jnp.float32),              # c state
            ],
        ),
        compiler_params=pltpu.CompilerParams(
            dimension_semantics=("arbitrary",),               # time is sequential
            vmem_limit_bytes=vmem_limit),
    )(gx_flat, bias, h0.astype(jnp.float32), c0.astype(jnp.float32),
      whh_t.astype(jnp.float32))

    if needs_mask:
        out_flat = out_flat[:T * B]
    return out_flat, h_n, c_n


class EncoderLSTMPallas:
    """Mirrors EncoderLSTM.forward: output, (h_n, c_n) = lstm(inputs, hidden)."""

    def __init__(self, input_size, hidden_size, n_layers=1, drop_prob=0.0,
                 stream_dtype=jnp.float32, t_chunk_max=16,
                 key=jax.random.PRNGKey(0)):
        self.input_size = input_size
        self.hidden_size = hidden_size
        self.n_layers = n_layers
        self.drop_prob = drop_prob
        # stream_dtype controls only the storage dtype of the big streamed
        # tensors (gx, inter-layer sequence); all matmuls use f32 operands.
        self.stream_dtype = stream_dtype
        self.t_chunk_max = t_chunk_max

        # Deterministic init matching PyTorch's U(-1/sqrt(H), 1/sqrt(H)).
        bound = 1.0 / float(np.sqrt(hidden_size))
        self.params = []
        for layer in range(n_layers):
            in_sz = input_size if layer == 0 else hidden_size
            key, k1, k2, k3, k4 = jax.random.split(key, 5)
            w_ih = jax.random.uniform(k1, (4 * hidden_size, in_sz),
                                      jnp.float32, -bound, bound)
            w_hh = jax.random.uniform(k2, (4 * hidden_size, hidden_size),
                                      jnp.float32, -bound, bound)
            b_ih = jax.random.uniform(k3, (4 * hidden_size,),
                                      jnp.float32, -bound, bound)
            b_hh = jax.random.uniform(k4, (4 * hidden_size,),
                                      jnp.float32, -bound, bound)
            self.params.append((w_ih, w_hh, b_ih, b_hh))

    def init_hidden(self, batch_size):
        shape = (self.n_layers, batch_size, self.hidden_size)
        return (jnp.zeros(shape, jnp.float32), jnp.zeros(shape, jnp.float32))

    def forward(self, inputs, hidden):
        # inputs: (B, T, input_size) batch_first, like the PyTorch module.
        h0, c0 = hidden
        B, T, _ = inputs.shape
        H = self.hidden_size
        sdt = self.stream_dtype

        h_n_list, c_n_list = [], []
        seq_flat = None                       # (T*B, H) time-major, stream dtype

        for layer, (w_ih, w_hh, b_ih, b_hh) in enumerate(self.params):
            # Gate columns permuted [i,f,g,o] -> [i,f,o,g]; all weights f32.
            wih_t = _permute_gate_cols(jnp.transpose(w_ih), H)      # (in, 4H)
            whh_t = _permute_gate_cols(jnp.transpose(w_hh), H)      # (H, 4H)
            bias = _permute_gate_cols((b_ih + b_hh)[None, :], H)    # (1, 4H)

            # Hoisted, time-independent input projection: one big f32 matmul.
            # Bias is added inside the kernel, so gx can stream in bf16 with no
            # extra XLA pass over it.
            if layer == 0:
                gx = jnp.einsum('btd,dg->tbg', inputs.astype(jnp.float32),
                                wih_t, preferred_element_type=jnp.float32)
                gx_flat = gx.reshape(T * B, 4 * H)
            else:
                gx_flat = jnp.dot(seq_flat.astype(jnp.float32), wih_t,
                                  preferred_element_type=jnp.float32)
            gx_flat = gx_flat.astype(sdt)

            out_flat, h_n, c_n = _run_lstm_layer(
                gx_flat, bias, h0[layer], c0[layer], whh_t,
                batch=B, seq_len=T, out_dtype=sdt,
                t_chunk_max=self.t_chunk_max)
            h_n_list.append(h_n)
            c_n_list.append(c_n)
            seq_flat = out_flat

        output = seq_flat.reshape(T, B, H).transpose(1, 0, 2).astype(jnp.float32)
        return output, (jnp.stack(h_n_list, axis=0), jnp.stack(c_n_list, axis=0))


def _lstm_reference(x, h0, c0, params):
    """Pure-JAX f32 reference (lax.scan) for correctness checking."""
    layer_in = jnp.transpose(x, (1, 0, 2))  # (T, B, D)
    hs, cs = [], []
    for layer, (w_ih, w_hh, b_ih, b_hh) in enumerate(params):
        H = h0.shape[-1]

        def step(carry, x_t, w_ih=w_ih, w_hh=w_hh, b_ih=b_ih, b_hh=b_hh, H=H):
            h, c = carry
            gates = x_t @ w_ih.T + b_ih + h @ w_hh.T + b_hh
            i = jax.nn.sigmoid(gates[:, :H])
            f = jax.nn.sigmoid(gates[:, H:2 * H])
            g = jnp.tanh(gates[:, 2 * H:3 * H])
            o = jax.nn.sigmoid(gates[:, 3 * H:])
            c_new = f * c + i * g
            h_new = o * jnp.tanh(c_new)
            return (h_new, c_new), h_new

        (h_f, c_f), out = lax.scan(step, (h0[layer], c0[layer]), layer_in)
        hs.append(h_f)
        cs.append(c_f)
        layer_in = out
    return jnp.transpose(layer_in, (1, 0, 2)), (jnp.stack(hs), jnp.stack(cs))


if __name__ == "__main__":
    # ---- Case 1: lane-aligned shapes (H mult of 128), 2 layers, multi-chunk T ----
    B, T, D, H, L = 4, 24, 16, 128, 2
    x = jax.random.normal(jax.random.PRNGKey(0), (B, T, D), dtype=jnp.float32)

    enc_f32 = EncoderLSTMPallas(D, H, n_layers=L, stream_dtype=jnp.float32,
                                key=jax.random.PRNGKey(0))
    hidden = enc_f32.init_hidden(B)
    out, (h_n, c_n) = enc_f32.forward(x, hidden)
    jax.block_until_ready((out, h_n, c_n))

    ref_out, (ref_h, ref_c) = _lstm_reference(x, hidden[0], hidden[1], enc_f32.params)
    np.testing.assert_allclose(np.asarray(out), np.asarray(ref_out), rtol=1e-4, atol=1e-4)
    np.testing.assert_allclose(np.asarray(h_n), np.asarray(ref_h), rtol=1e-4, atol=1e-4)
    np.testing.assert_allclose(np.asarray(c_n), np.asarray(ref_c), rtol=1e-4, atol=1e-4)
    assert out.shape == (B, T, H) and h_n.shape == (L, B, H) and c_n.shape == (L, B, H)

    # Same weights, bf16 *streaming* of gx / inter-layer sequence (f32 matmuls,
    # f32 h/c state) — the bandwidth-optimized configuration.
    enc_bf16 = EncoderLSTMPallas(D, H, n_layers=L, stream_dtype=jnp.bfloat16,
                                 key=jax.random.PRNGKey(0))
    out_b, (h_b, c_b) = enc_bf16.forward(x, hidden)
    jax.block_until_ready((out_b, h_b, c_b))
    np.testing.assert_allclose(np.asarray(out_b), np.asarray(ref_out), rtol=0.0, atol=1e-1)
    np.testing.assert_allclose(np.asarray(h_b), np.asarray(ref_h), rtol=0.0, atol=1e-1)
    np.testing.assert_allclose(np.asarray(c_b), np.asarray(ref_c), rtol=0.0, atol=2e-1)

    # ---- Case 2: small, lane-unaligned shapes still run and match exactly ----
    B2, T2, D2, H2 = 2, 8, 4, 32
    enc_small = EncoderLSTMPallas(D2, H2, n_layers=1, stream_dtype=jnp.float32,
                                  key=jax.random.PRNGKey(1))
    x2 = jax.random.normal(jax.random.PRNGKey(2), (B2, T2, D2), dtype=jnp.float32)
    hid2 = enc_small.init_hidden(B2)
    out2, (h2, c2) = enc_small.forward(x2, hid2)
    jax.block_until_ready((out2, h2, c2))
    ref2, (rh2, rc2) = _lstm_reference(x2, hid2[0], hid2[1], enc_small.params)
    np.testing.assert_allclose(np.asarray(out2), np.asarray(ref2), rtol=1e-4, atol=1e-4)
    np.testing.assert_allclose(np.asarray(h2), np.asarray(rh2), rtol=1e-4, atol=1e-4)
    np.testing.assert_allclose(np.asarray(c2), np.asarray(rc2), rtol=1e-4, atol=1e-4)

    print("KERNEL_OK")
</pallas_src>

<mosaic_0001>
module attributes {stable_mosaic.version = 11 : i64} {
  func.func @_lstm_layer_kernel(%arg0: i32, %arg1: memref<48x512xf32, #tpu.memory_space<vmem>>, %arg2: memref<1x512xf32, #tpu.memory_space<vmem>>, %arg3: memref<4x128xf32, #tpu.memory_space<vmem>>, %arg4: memref<4x128xf32, #tpu.memory_space<vmem>>, %arg5: memref<128x512xf32, #tpu.memory_space<vmem>>, %arg6: memref<48x128xf32, #tpu.memory_space<vmem>>, %arg7: memref<4x128xf32, #tpu.memory_space<vmem>>, %arg8: memref<4x128xf32, #tpu.memory_space<vmem>>, %arg9: memref<4x128xf32, #tpu.memory_space<vmem>>, %arg10: memref<4x128xf32, #tpu.memory_space<vmem>>) attributes {dimension_semantics = [#tpu.dimension_semantics<arbitrary>], iteration_bounds = array<i64: 2>, scalar_prefetch = 0 : i64, scratch_operands = 2 : i64, tpu.core_type = #tpu.core_type<tc>, window_params = [{transform_indices = @transform_0, window_bounds = array<i64: 48, 512>}, {pipeline_mode = #tpu.pipeline_mode<synchronous>, transform_indices = @transform_1, window_bounds = array<i64: 1, 512>}, {pipeline_mode = #tpu.pipeline_mode<synchronous>, transform_indices = @transform_2, window_bounds = array<i64: 4, 128>}, {pipeline_mode = #tpu.pipeline_mode<synchronous>, transform_indices = @transform_3, window_bounds = array<i64: 4, 128>}, {pipeline_mode = #tpu.pipeline_mode<synchronous>, transform_indices = @transform_4, window_bounds = array<i64: 128, 512>}, {transform_indices = @transform_5, window_bounds = array<i64: 48, 128>}, {pipeline_mode = #tpu.pipeline_mode<synchronous>, transform_indices = @transform_6, window_bounds = array<i64: 4, 128>}, {pipeline_mode = #tpu.pipeline_mode<synchronous>, transform_indices = @transform_7, window_bounds = array<i64: 4, 128>}]} {
    %c0_i32 = arith.constant 0 : i32
    %0 = arith.cmpi eq, %arg0, %c0_i32 : i32
    %1 = arith.extui %0 : i1 to i32
    %c0_i32_0 = arith.constant 0 : i32
    %2 = arith.cmpi ne, %1, %c0_i32_0 : i32
    scf.if %2 {
      %c0_95 = arith.constant 0 : index
      %c0_96 = arith.constant 0 : index
      %287 = vector.load %arg3[%c0_95, %c0_96] : memref<4x128xf32, #tpu.memory_space<vmem>>, vector<4x128xf32>
      %c0_97 = arith.constant 0 : index
      %c0_98 = arith.constant 0 : index
      %288 = vector.load %arg9[%c0_97, %c0_98] : memref<4x128xf32, #tpu.memory_space<vmem>>, vector<4x128xf32>
      tpu.vector_store %arg9[%c0_97, %c0_98], %287 {strides = array<i32>} : memref<4x128xf32, #tpu.memory_space<vmem>>, vector<4x128xf32>,
      %c0_99 = arith.constant 0 : index
      %c0_100 = arith.constant 0 : index
      %289 = vector.load %arg4[%c0_99, %c0_100] : memref<4x128xf32, #tpu.memory_space<vmem>>, vector<4x128xf32>
      %c0_101 = arith.constant 0 : index
      %c0_102 = arith.constant 0 : index
      %290 = vector.load %arg10[%c0_101, %c0_102] : memref<4x128xf32, #tpu.memory_space<vmem>>, vector<4x128xf32>
      tpu.vector_store %arg10[%c0_101, %c0_102], %289 {strides = array<i32>} : memref<4x128xf32, #tpu.memory_space<vmem>>, vector<4x128xf32>,
    } else {
    }
    %c0 = arith.constant 0 : index
    %c0_1 = arith.constant 0 : index
    %3 = vector.load %arg2[%c0, %c0_1] : memref<1x512xf32, #tpu.memory_space<vmem>>, vector<1x512xf32>
    %c0_2 = arith.constant 0 : index
    %c0_3 = arith.constant 0 : index
    %4 = vector.load %arg9[%c0_2, %c0_3] : memref<4x128xf32, #tpu.memory_space<vmem>>, vector<4x128xf32>
    %c0_4 = arith.constant 0 : index
    %c0_5 = arith.constant 0 : index
    %5 = vector.load %arg10[%c0_4, %c0_5] : memref<4x128xf32, #tpu.memory_space<vmem>>, vector<4x128xf32>
    %c0_6 = arith.constant 0 : index
    %c0_7 = arith.constant 0 : index
    %6 = vector.load %arg1[%c0_6, %c0_7] : memref<48x512xf32, #tpu.memory_space<vmem>>, vector<4x512xf32>
    %7 = vector.broadcast %3 : vector<1x512xf32> to vector<4x512xf32>
    %8 = arith.addf %6, %7 : vector<4x512xf32>
    %c0_8 = arith.constant 0 : index
    %c0_9 = arith.constant 0 : index
    %9 = vector.load %arg5[%c0_8, %c0_9] : memref<128x512xf32, #tpu.memory_space<vmem>>, vector<128x512xf32>
    %cst = arith.constant dense<0.000000e+00> : vector<4x512xf32>
    %10 = tpu.matmul %4, %9, %cst {dimension_numbers = #tpu.dot_dimension_numbers<[1], [0], [0], [1], [0, 0, 1, 1], [], []>} : vector<4x128xf32>, vector<128x512xf32>, vector<4x512xf32> -> vector<4x512xf32>
    %11 = arith.addf %8, %10 : vector<4x512xf32>
    %12 = vector.extract_strided_slice %11 {offsets = [0, 0], sizes = [4, 384], strides = [1, 1]} : vector<4x512xf32> to vector<4x384xf32>
    %13 = arith.negf %12 : vector<4x384xf32>
    %14 = math.exp %13 : vector<4x384xf32>
    %cst_10 = arith.constant 1.000000e+00 : f32
    %15 = vector.broadcast %cst_10 : f32 to vector<4x384xf32>
    %16 = arith.addf %15, %14 : vector<4x384xf32>
    %17 = arith.divf %15, %16 : vector<4x384xf32>
    %18 = vector.extract_strided_slice %11 {offsets = [0, 384], sizes = [4, 128], strides = [1, 1]} : vector<4x512xf32> to vector<4x128xf32>
    %19 = math.tanh %18 : vector<4x128xf32>
    %20 = vector.extract_strided_slice %17 {offsets = [0, 0], sizes = [4, 128], strides = [1, 1]} : vector<4x384xf32> to vector<4x128xf32>
    %21 = vector.extract_strided_slice %17 {offsets = [0, 128], sizes = [4, 128], strides = [1, 1]} : vector<4x384xf32> to vector<4x128xf32>
    %22 = vector.extract_strided_slice %17 {offsets = [0, 256], sizes = [4, 128], strides = [1, 1]} : vector<4x384xf32> to vector<4x128xf32>
    %23 = arith.mulf %21, %5 : vector<4x128xf32>
    %24 = arith.mulf %20, %19 : vector<4x128xf32>
    %25 = arith.addf %23, %24 : vector<4x128xf32>
    %26 = math.tanh %25 : vector<4x128xf32>
    %27 = arith.mulf %22, %26 : vector<4x128xf32>
    %c0_11 = arith.constant 0 : index
    %c0_12 = arith.constant 0 : index
    %28 = vector.load %arg6[%c0_11, %c0_12] : memref<48x128xf32, #tpu.memory_space<vmem>>, vector<4x128xf32>
    tpu.vector_store %arg6[%c0_11, %c0_12], %27 {strides = array<i32>} : memref<48x128xf32, #tpu.memory_space<vmem>>, vector<4x128xf32>,
    %c4 = arith.constant 4 : index
    %c0_13 = arith.constant 0 : index
    %29 = vector.load %arg1[%c4, %c0_13] : memref<48x512xf32, #tpu.memory_space<vmem>>, vector<4x512xf32>
    %30 = vector.broadcast %3 : vector<1x512xf32> to vector<4x512xf32>
    %31 = arith.addf %29, %30 : vector<4x512xf32>
    %c0_14 = arith.constant 0 : index
    %c0_15 = arith.constant 0 : index
    %32 = vector.load %arg5[%c0_14, %c0_15] : memref<128x512xf32, #tpu.memory_space<vmem>>, vector<128x512xf32>
    %cst_16 = arith.constant dense<0.000000e+00> : vector<4x512xf32>
    %33 = tpu.matmul %27, %32, %cst_16 {dimension_numbers = #tpu.dot_dimension_numbers<[1], [0], [0], [1], [0, 0, 1, 1], [], []>} : vector<4x128xf32>, vector<128x512xf32>, vector<4x512xf32> -> vector<4x512xf32>
    %34 = arith.addf %31, %33 : vector<4x512xf32>
    %35 = vector.extract_strided_slice %34 {offsets = [0, 0], sizes = [4, 384], strides = [1, 1]} : vector<4x512xf32> to vector<4x384xf32>
    %36 = arith.negf %35 : vector<4x384xf32>
    %37 = math.exp %36 : vector<4x384xf32>
    %cst_17 = arith.constant 1.000000e+00 : f32
    %38 = vector.broadcast %cst_17 : f32 to vector<4x384xf32>
    %39 = arith.addf %38, %37 : vector<4x384xf32>
    %40 = arith.divf %38, %39 : vector<4x384xf32>
    %41 = vector.extract_strided_slice %34 {offsets = [0, 384], sizes = [4, 128], strides = [1, 1]} : vector<4x512xf32> to vector<4x128xf32>
    %42 = math.tanh %41 : vector<4x128xf32>
    %43 = vector.extract_strided_slice %40 {offsets = [0, 0], sizes = [4, 128], strides = [1, 1]} : vector<4x384xf32> to vector<4x128xf32>
    %44 = vector.extract_strided_slice %40 {offsets = [0, 128], sizes = [4, 128], strides = [1, 1]} : vector<4x384xf32> to vector<4x128xf32>
    %45 = vector.extract_strided_slice %40 {offsets = [0, 256], sizes = [4, 128], strides = [1, 1]} : vector<4x384xf32> to vector<4x128xf32>
    %46 = arith.mulf %44, %25 : vector<4x128xf32>
    %47 = arith.mulf %43, %42 : vector<4x128xf32>
    %48 = arith.addf %46, %47 : vector<4x128xf32>
    %49 = math.tanh %48 : vector<4x128xf32>
    %50 = arith.mulf %45, %49 : vector<4x128xf32>
    %c4_18 = arith.constant 4 : index
    %c0_19 = arith.constant 0 : index
    %51 = vector.load %arg6[%c4_18, %c0_19] : memref<48x128xf32, #tpu.memory_space<vmem>>, vector<4x128xf32>
    tpu.vector_store %arg6[%c4_18, %c0_19], %50 {strides = array<i32>} : memref<48x128xf32, #tpu.memory_space<vmem>>, vector<4x128xf32>,
    %c8 = arith.constant 8 : index
    %c0_20 = arith.constant 0 : index
    %52 = vector.load %arg1[%c8, %c0_20] : memref<48x512xf32, #tpu.memory_space<vmem>>, vector<4x512xf32>
    %53 = vector.broadcast %3 : vector<1x512xf32> to vector<4x512xf32>
    %54 = arith.addf %52, %53 : vector<4x512xf32>
    %c0_21 = arith.constant 0 : index
    %c0_22 = arith.constant 0 : index
    %55 = vector.load %arg5[%c0_21, %c0_22] : memref<128x512xf32, #tpu.memory_space<vmem>>, vector<128x512xf32>
    %cst_23 = arith.constant dense<0.000000e+00> : vector<4x512xf32>
    %56 = tpu.matmul %50, %55, %cst_23 {dimension_numbers = #tpu.dot_dimension_numbers<[1], [0], [0], [1], [0, 0, 1, 1], [], []>} : vector<4x128xf32>, vector<128x512xf32>, vector<4x512xf32> -> vector<4x512xf32>
    %57 = arith.addf %54, %56 : vector<4x512xf32>
    %58 = vector.extract_strided_slice %57 {offsets = [0, 0], sizes = [4, 384], strides = [1, 1]} : vector<4x512xf32> to vector<4x384xf32>
    %59 = arith.negf %58 : vector<4x384xf32>
    %60 = math.exp %59 : vector<4x384xf32>
    %cst_24 = arith.constant 1.000000e+00 : f32
    %61 = vector.broadcast %cst_24 : f32 to vector<4x384xf32>
    %62 = arith.addf %61, %60 : vector<4x384xf32>
    %63 = arith.divf %61, %62 : vector<4x384xf32>
    %64 = vector.extract_strided_slice %57 {offsets = [0, 384], sizes = [4, 128], strides = [1, 1]} : vector<4x512xf32> to vector<4x128xf32>
    %65 = math.tanh %64 : vector<4x128xf32>
    %66 = vector.extract_strided_slice %63 {offsets = [0, 0], sizes = [4, 128], strides = [1, 1]} : vector<4x384xf32> to vector<4x128xf32>
    %67 = vector.extract_strided_slice %63 {offsets = [0, 128], sizes = [4, 128], strides = [1, 1]} : vector<4x384xf32> to vector<4x128xf32>
    %68 = vector.extract_strided_slice %63 {offsets = [0, 256], sizes = [4, 128], strides = [1, 1]} : vector<4x384xf32> to vector<4x128xf32>
    %69 = arith.mulf %67, %48 : vector<4x128xf32>
    %70 = arith.mulf %66, %65 : vector<4x128xf32>
    %71 = arith.addf %69, %70 : vector<4x128xf32>
    %72 = math.tanh %71 : vector<4x128xf32>
    %73 = arith.mulf %68, %72 : vector<4x128xf32>
    %c8_25 = arith.constant 8 : index
    %c0_26 = arith.constant 0 : index
    %74 = vector.load %arg6[%c8_25, %c0_26] : memref<48x128xf32, #tpu.memory_space<vmem>>, vector<4x128xf32>
    tpu.vector_store %arg6[%c8_25, %c0_26], %73 {strides = array<i32>} : memref<48x128xf32, #tpu.memory_space<vmem>>, vector<4x128xf32>,
    %c12 = arith.constant 12 : index
    %c0_27 = arith.constant 0 : index
    %75 = vector.load %arg1[%c12, %c0_27] : memref<48x512xf32, #tpu.memory_space<vmem>>, vector<4x512xf32>
    %76 = vector.broadcast %3 : vector<1x512xf32> to vector<4x512xf32>
    %77 = arith.addf %75, %76 : vector<4x512xf32>
    %c0_28 = arith.constant 0 : index
    %c0_29 = arith.constant 0 : index
    %78 = vector.load %arg5[%c0_28, %c0_29] : memref<128x512xf32, #tpu.memory_space<vmem>>, vector<128x512xf32>
    %cst_30 = arith.constant dense<0.000000e+00> : vector<4x512xf32>
    %79 = tpu.matmul %73, %78, %cst_30 {dimension_numbers = #tpu.dot_dimension_numbers<[1], [0], [0], [1], [0, 0, 1, 1], [], []>} : vector<4x128xf32>, vector<128x512xf32>, vector<4x512xf32> -> vector<4x512xf32>
    %80 = arith.addf %77, %79 : vector<4x512xf32>
    %81 = vector.extract_strided_slice %80 {offsets = [0, 0], sizes = [4, 384], strides = [1, 1]} : vector<4x512xf32> to vector<4x384xf32>
    %82 = arith.negf %81 : vector<4x384xf32>
    %83 = math.exp %82 : vector<4x384xf32>
    %cst_31 = arith.constant 1.000000e+00 : f32
    %84 = vector.broadcast %cst_31 : f32 to vector<4x384xf32>
    %85 = arith.addf %84, %83 : vector<4x384xf32>
    %86 = arith.divf %84, %85 : vector<4x384xf32>
    %87 = vector.extract_strided_slice %80 {offsets = [0, 384], sizes = [4, 128], strides = [1, 1]} : vector<4x512xf32> to vector<4x128xf32>
    %88 = math.tanh %87 : vector<4x128xf32>
    %89 = vector.extract_strided_slice %86 {offsets = [0, 0], sizes = [4, 128], strides = [1, 1]} : vector<4x384xf32> to vector<4x128xf32>
    %90 = vector.extract_strided_slice %86 {offsets = [0, 128], sizes = [4, 128], strides = [1, 1]} : vector<4x384xf32> to vector<4x128xf32>
    %91 = vector.extract_strided_slice %86 {offsets = [0, 256], sizes = [4, 128], strides = [1, 1]} : vector<4x384xf32> to vector<4x128xf32>
    %92 = arith.mulf %90, %71 : vector<4x128xf32>
    %93 = arith.mulf %89, %88 : vector<4x128xf32>
    %94 = arith.addf %92, %93 : vector<4x128xf32>
    %95 = math.tanh %94 : vector<4x128xf32>
    %96 = arith.mulf %91, %95 : vector<4x128xf32>
    %c12_32 = arith.constant 12 : index
    %c0_33 = arith.constant 0 : index
    %97 = vector.load %arg6[%c12_32, %c0_33] : memref<48x128xf32, #tpu.memory_space<vmem>>, vector<4x128xf32>
    tpu.vector_store %arg6[%c12_32, %c0_33], %96 {strides = array<i32>} : memref<48x128xf32, #tpu.memory_space<vmem>>, vector<4x128xf32>,
    %c16 = arith.constant 16 : index
    %c0_34 = arith.constant 0 : index
    %98 = vector.load %arg1[%c16, %c0_34] : memref<48x512xf32, #tpu.memory_space<vmem>>, vector<4x512xf32>
    %99 = vector.broadcast %3 : vector<1x512xf32> to vector<4x512xf32>
    %100 = arith.addf %98, %99 : vector<4x512xf32>
    %c0_35 = arith.constant 0 : index
    %c0_36 = arith.constant 0 : index
    %101 = vector.load %arg5[%c0_35, %c0_36] : memref<128x512xf32, #tpu.memory_space<vmem>>, vector<128x512xf32>
    %cst_37 = arith.constant dense<0.000000e+00> : vector<4x512xf32>
    %102 = tpu.matmul %96, %101, %cst_37 {dimension_numbers = #tpu.dot_dimension_numbers<[1], [0], [0], [1], [0, 0, 1, 1], [], []>} : vector<4x128xf32>, vector<128x512xf32>, vector<4x512xf32> -> vector<4x512xf32>
    %103 = arith.addf %100, %102 : vector<4x512xf32>
    %104 = vector.extract_strided_slice %103 {offsets = [0, 0], sizes = [4, 384], strides = [1, 1]} : vector<4x512xf32> to vector<4x384xf32>
    %105 = arith.negf %104 : vector<4x384xf32>
    %106 = math.exp %105 : vector<4x384xf32>
    %cst_38 = arith.constant 1.000000e+00 : f32
    %107 = vector.broadcast %cst_38 : f32 to vector<4x384xf32>
    %108 = arith.addf %107, %106 : vector<4x384xf32>
    %109 = arith.divf %107, %108 : vector<4x384xf32>
    %110 = vector.extract_strided_slice %103 {offsets = [0, 384], sizes = [4, 128], strides = [1, 1]} : vector<4x512xf32> to vector<4x128xf32>
    %111 = math.tanh %110 : vector<4x128xf32>
    %112 = vector.extract_strided_slice %109 {offsets = [0, 0], sizes = [4, 128], strides = [1, 1]} : vector<4x384xf32> to vector<4x128xf32>
    %113 = vector.extract_strided_slice %109 {offsets = [0, 128], sizes = [4, 128], strides = [1, 1]} : vector<4x384xf32> to vector<4x128xf32>
    %114 = vector.extract_strided_slice %109 {offsets = [0, 256], sizes = [4, 128], strides = [1, 1]} : vector<4x384xf32> to vector<4x128xf32>
    %115 = arith.mulf %113, %94 : vector<4x128xf32>
    %116 = arith.mulf %112, %111 : vector<4x128xf32>
    %117 = arith.addf %115, %116 : vector<4x128xf32>
    %118 = math.tanh %117 : vector<4x128xf32>
    %119 = arith.mulf %114, %118 : vector<4x128xf32>
    %c16_39 = arith.constant 16 : index
    %c0_40 = arith.constant 0 : index
    %120 = vector.load %arg6[%c16_39, %c0_40] : memref<48x128xf32, #tpu.memory_space<vmem>>, vector<4x128xf32>
    tpu.vector_store %arg6[%c16_39, %c0_40], %119 {strides = array<i32>} : memref<48x128xf32, #tpu.memory_space<vmem>>, vector<4x128xf32>,
    %c20 = arith.constant 20 : index
    %c0_41 = arith.constant 0 : index
    %121 = vector.load %arg1[%c20, %c0_41] : memref<48x512xf32, #tpu.memory_space<vmem>>, vector<4x512xf32>
    %122 = vector.broadcast %3 : vector<1x512xf32> to vector<4x512xf32>
    %123 = arith.addf %121, %122 : vector<4x512xf32>
    %c0_42 = arith.constant 0 : index
    %c0_43 = arith.constant 0 : index
    %124 = vector.load %arg5[%c0_42, %c0_43] : memref<128x512xf32, #tpu.memory_space<vmem>>, vector<128x512xf32>
    %cst_44 = arith.constant dense<0.000000e+00> : vector<4x512xf32>
    %125 = tpu.matmul %119, %124, %cst_44 {dimension_numbers = #tpu.dot_dimension_numbers<[1], [0], [0], [1], [0, 0, 1, 1], [], []>} : vector<4x128xf32>, vector<128x512xf32>, vector<4x512xf32> -> vector<4x512xf32>
    %126 = arith.addf %123, %125 : vector<4x512xf32>
    %127 = vector.extract_strided_slice %126 {offsets = [0, 0], sizes = [4, 384], strides = [1, 1]} : vector<4x512xf32> to vector<4x384xf32>
    %128 = arith.negf %127 : vector<4x384xf32>
    %129 = math.exp %128 : vector<4x384xf32>
    %cst_45 = arith.constant 1.000000e+00 : f32
    %130 = vector.broadcast %cst_45 : f32 to vector<4x384xf32>
    %131 = arith.addf %130, %129 : vector<4x384xf32>
    %132 = arith.divf %130, %131 : vector<4x384xf32>
    %133 = vector.extract_strided_slice %126 {offsets = [0, 384], sizes = [4, 128], strides = [1, 1]} : vector<4x512xf32> to vector<4x128xf32>
    %134 = math.tanh %133 : vector<4x128xf32>
    %135 = vector.extract_strided_slice %132 {offsets = [0, 0], sizes = [4, 128], strides = [1, 1]} : vector<4x384xf32> to vector<4x128xf32>
    %136 = vector.extract_strided_slice %132 {offsets = [0, 128], sizes = [4, 128], strides = [1, 1]} : vector<4x384xf32> to vector<4x128xf32>
    %137 = vector.extract_strided_slice %132 {offsets = [0, 256], sizes = [4, 128], strides = [1, 1]} : vector<4x384xf32> to vector<4x128xf32>
    %138 = arith.mulf %136, %117 : vector<4x128xf32>
    %139 = arith.mulf %135, %134 : vector<4x128xf32>
    %140 = arith.addf %138, %139 : vector<4x128xf32>
    %141 = math.tanh %140 : vector<4x128xf32>
    %142 = arith.mulf %137, %141 : vector<4x128xf32>
    %c20_46 = arith.constant 20 : index
    %c0_47 = arith.constant 0 : index
    %143 = vector.load %arg6[%c20_46, %c0_47] : memref<48x128xf32, #tpu.memory_space<vmem>>, vector<4x128xf32>
    tpu.vector_store %arg6[%c20_46, %c0_47], %142 {strides = array<i32>} : memref<48x128xf32, #tpu.memory_space<vmem>>, vector<4x128xf32>,
    %c24 = arith.constant 24 : index
    %c0_48 = arith.constant 0 : index
    %144 = vector.load %arg1[%c24, %c0_48] : memref<48x512xf32, #tpu.memory_space<vmem>>, vector<4x512xf32>
    %145 = vector.broadcast %3 : vector<1x512xf32> to vector<4x512xf32>
    %146 = arith.addf %144, %145 : vector<4x512xf32>
    %c0_49 = arith.constant 0 : index
    %c0_50 = arith.constant 0 : index
    %147 = vector.load %arg5[%c0_49, %c0_50] : memref<128x512xf32, #tpu.memory_space<vmem>>, vector<128x512xf32>
    %cst_51 = arith.constant dense<0.000000e+00> : vector<4x512xf32>
    %148 = tpu.matmul %142, %147, %cst_51 {dimension_numbers = #tpu.dot_dimension_numbers<[1], [0], [0], [1], [0, 0, 1, 1], [], []>} : vector<4x128xf32>, vector<128x512xf32>, vector<4x512xf32> -> vector<4x512xf32>
    %149 = arith.addf %146, %148 : vector<4x512xf32>
    %150 = vector.extract_strided_slice %149 {offsets = [0, 0], sizes = [4, 384], strides = [1, 1]} : vector<4x512xf32> to vector<4x384xf32>
    %151 = arith.negf %150 : vector<4x384xf32>
    %152 = math.exp %151 : vector<4x384xf32>
    %cst_52 = arith.constant 1.000000e+00 : f32
    %153 = vector.broadcast %cst_52 : f32 to vector<4x384xf32>
    %154 = arith.addf %153, %152 : vector<4x384xf32>
    %155 = arith.divf %153, %154 : vector<4x384xf32>
    %156 = vector.extract_strided_slice %149 {offsets = [0, 384], sizes = [4, 128], strides = [1, 1]} : vector<4x512xf32> to vector<4x128xf32>
    %157 = math.tanh %156 : vector<4x128xf32>
    %158 = vector.extract_strided_slice %155 {offsets = [0, 0], sizes = [4, 128], strides = [1, 1]} : vector<4x384xf32> to vector<4x128xf32>
    %159 = vector.extract_strided_slice %155 {offsets = [0, 128], sizes = [4, 128], strides = [1, 1]} : vector<4x384xf32> to vector<4x128xf32>
    %160 = vector.extract_strided_slice %155 {offsets = [0, 256], sizes = [4, 128], strides = [1, 1]} : vector<4x384xf32> to vector<4x128xf32>
    %161 = arith.mulf %159, %140 : vector<4x128xf32>
    %162 = arith.mulf %158, %157 : vector<4x128xf32>
    %163 = arith.addf %161, %162 : vector<4x128xf32>
    %164 = math.tanh %163 : vector<4x128xf32>
    %165 = arith.mulf %160, %164 : vector<4x128xf32>
    %c24_53 = arith.constant 24 : index
    %c0_54 = arith.constant 0 : index
    %166 = vector.load %arg6[%c24_53, %c0_54] : memref<48x128xf32, #tpu.memory_space<vmem>>, vector<4x128xf32>
    tpu.vector_store %arg6[%c24_53, %c0_54], %165 {strides = array<i32>} : memref<48x128xf32, #tpu.memory_space<vmem>>, vector<4x128xf32>,
    %c28 = arith.constant 28 : index
    %c0_55 = arith.constant 0 : index
    %167 = vector.load %arg1[%c28, %c0_55] : memref<48x512xf32, #tpu.memory_space<vmem>>, vector<4x512xf32>
    %168 = vector.broadcast %3 : vector<1x512xf32> to vector<4x512xf32>
    %169 = arith.addf %167, %168 : vector<4x512xf32>
    %c0_56 = arith.constant 0 : index
    %c0_57 = arith.constant 0 : index
    %170 = vector.load %arg5[%c0_56, %c0_57] : memref<128x512xf32, #tpu.memory_space<vmem>>, vector<128x512xf32>
    %cst_58 = arith.constant dense<0.000000e+00> : vector<4x512xf32>
    %171 = tpu.matmul %165, %170, %cst_58 {dimension_numbers = #tpu.dot_dimension_numbers<[1], [0], [0], [1], [0, 0, 1, 1], [], []>} : vector<4x128xf32>, vector<128x512xf32>, vector<4x512xf32> -> vector<4x512xf32>
    %172 = arith.addf %169, %171 : vector<4x512xf32>
    %173 = vector.extract_strided_slice %172 {offsets = [0, 0], sizes = [4, 384], strides = [1, 1]} : vector<4x512xf32> to vector<4x384xf32>
    %174 = arith.negf %173 : vector<4x384xf32>
    %175 = math.exp %174 : vector<4x384xf32>
    %cst_59 = arith.constant 1.000000e+00 : f32
    %176 = vector.broadcast %cst_59 : f32 to vector<4x384xf32>
    %177 = arith.addf %176, %175 : vector<4x384xf32>
    %178 = arith.divf %176, %177 : vector<4x384xf32>
    %179 = vector.extract_strided_slice %172 {offsets = [0, 384], sizes = [4, 128], strides = [1, 1]} : vector<4x512xf32> to vector<4x128xf32>
    %180 = math.tanh %179 : vector<4x128xf32>
    %181 = vector.extract_strided_slice %178 {offsets = [0, 0], sizes = [4, 128], strides = [1, 1]} : vector<4x384xf32> to vector<4x128xf32>
    %182 = vector.extract_strided_slice %178 {offsets = [0, 128], sizes = [4, 128], strides = [1, 1]} : vector<4x384xf32> to vector<4x128xf32>
    %183 = vector.extract_strided_slice %178 {offsets = [0, 256], sizes = [4, 128], strides = [1, 1]} : vector<4x384xf32> to vector<4x128xf32>
    %184 = arith.mulf %182, %163 : vector<4x128xf32>
    %185 = arith.mulf %181, %180 : vector<4x128xf32>
    %186 = arith.addf %184, %185 : vector<4x128xf32>
    %187 = math.tanh %186 : vector<4x128xf32>
    %188 = arith.mulf %183, %187 : vector<4x128xf32>
    %c28_60 = arith.constant 28 : index
    %c0_61 = arith.constant 0 : index
    %189 = vector.load %arg6[%c28_60, %c0_61] : memref<48x128xf32, #tpu.memory_space<vmem>>, vector<4x128xf32>
    tpu.vector_store %arg6[%c28_60, %c0_61], %188 {strides = array<i32>} : memref<48x128xf32, #tpu.memory_space<vmem>>, vector<4x128xf32>,
    %c32 = arith.constant 32 : index
    %c0_62 = arith.constant 0 : index
    %190 = vector.load %arg1[%c32, %c0_62] : memref<48x512xf32, #tpu.memory_space<vmem>>, vector<4x512xf32>
    %191 = vector.broadcast %3 : vector<1x512xf32> to vector<4x512xf32>
    %192 = arith.addf %190, %191 : vector<4x512xf32>
    %c0_63 = arith.constant 0 : index
    %c0_64 = arith.constant 0 : index
    %193 = vector.load %arg5[%c0_63, %c0_64] : memref<128x512xf32, #tpu.memory_space<vmem>>, vector<128x512xf32>
    %cst_65 = arith.constant dense<0.000000e+00> : vector<4x512xf32>
    %194 = tpu.matmul %188, %193, %cst_65 {dimension_numbers = #tpu.dot_dimension_numbers<[1], [0], [0], [1], [0, 0, 1, 1], [], []>} : vector<4x128xf32>, vector<128x512xf32>, vector<4x512xf32> -> vector<4x512xf32>
    %195 = arith.addf %192, %194 : vector<4x512xf32>
    %196 = vector.extract_strided_slice %195 {offsets = [0, 0], sizes = [4, 384], strides = [1, 1]} : vector<4x512xf32> to vector<4x384xf32>
    %197 = arith.negf %196 : vector<4x384xf32>
    %198 = math.exp %197 : vector<4x384xf32>
    %cst_66 = arith.constant 1.000000e+00 : f32
    %199 = vector.broadcast %cst_66 : f32 to vector<4x384xf32>
    %200 = arith.addf %199, %198 : vector<4x384xf32>
    %201 = arith.divf %199, %200 : vector<4x384xf32>
    %202 = vector.extract_strided_slice %195 {offsets = [0, 384], sizes = [4, 128], strides = [1, 1]} : vector<4x512xf32> to vector<4x128xf32>
    %203 = math.tanh %202 : vector<4x128xf32>
    %204 = vector.extract_strided_slice %201 {offsets = [0, 0], sizes = [4, 128], strides = [1, 1]} : vector<4x384xf32> to vector<4x128xf32>
    %205 = vector.extract_strided_slice %201 {offsets = [0, 128], sizes = [4, 128], strides = [1, 1]} : vector<4x384xf32> to vector<4x128xf32>
    %206 = vector.extract_strided_slice %201 {offsets = [0, 256], sizes = [4, 128], strides = [1, 1]} : vector<4x384xf32> to vector<4x128xf32>
    %207 = arith.mulf %205, %186 : vector<4x128xf32>
    %208 = arith.mulf %204, %203 : vector<4x128xf32>
    %209 = arith.addf %207, %208 : vector<4x128xf32>
    %210 = math.tanh %209 : vector<4x128xf32>
    %211 = arith.mulf %206, %210 : vector<4x128xf32>
    %c32_67 = arith.constant 32 : index
    %c0_68 = arith.constant 0 : index
    %212 = vector.load %arg6[%c32_67, %c0_68] : memref<48x128xf32, #tpu.memory_space<vmem>>, vector<4x128xf32>
    tpu.vector_store %arg6[%c32_67, %c0_68], %211 {strides = array<i32>} : memref<48x128xf32, #tpu.memory_space<vmem>>, vector<4x128xf32>,
    %c36 = arith.constant 36 : index
    %c0_69 = arith.constant 0 : index
    %213 = vector.load %arg1[%c36, %c0_69] : memref<48x512xf32, #tpu.memory_space<vmem>>, vector<4x512xf32>
    %214 = vector.broadcast %3 : vector<1x512xf32> to vector<4x512xf32>
    %215 = arith.addf %213, %214 : vector<4x512xf32>
    %c0_70 = arith.constant 0 : index
    %c0_71 = arith.constant 0 : index
    %216 = vector.load %arg5[%c0_70, %c0_71] : memref<128x512xf32, #tpu.memory_space<vmem>>, vector<128x512xf32>
    %cst_72 = arith.constant dense<0.000000e+00> : vector<4x512xf32>
    %217 = tpu.matmul %211, %216, %cst_72 {dimension_numbers = #tpu.dot_dimension_numbers<[1], [0], [0], [1], [0, 0, 1, 1], [], []>} : vector<4x128xf32>, vector<128x512xf32>, vector<4x512xf32> -> vector<4x512xf32>
    %218 = arith.addf %215, %217 : vector<4x512xf32>
    %219 = vector.extract_strided_slice %218 {offsets = [0, 0], sizes = [4, 384], strides = [1, 1]} : vector<4x512xf32> to vector<4x384xf32>
    %220 = arith.negf %219 : vector<4x384xf32>
    %221 = math.exp %220 : vector<4x384xf32>
    %cst_73 = arith.constant 1.000000e+00 : f32
    %222 = vector.broadcast %cst_73 : f32 to vector<4x384xf32>
    %223 = arith.addf %222, %221 : vector<4x384xf32>
    %224 = arith.divf %222, %223 : vector<4x384xf32>
    %225 = vector.extract_strided_slice %218 {offsets = [0, 384], sizes = [4, 128], strides = [1, 1]} : vector<4x512xf32> to vector<4x128xf32>
    %226 = math.tanh %225 : vector<4x128xf32>
    %227 = vector.extract_strided_slice %224 {offsets = [0, 0], sizes = [4, 128], strides = [1, 1]} : vector<4x384xf32> to vector<4x128xf32>
    %228 = vector.extract_strided_slice %224 {offsets = [0, 128], sizes = [4, 128], strides = [1, 1]} : vector<4x384xf32> to vector<4x128xf32>
    %229 = vector.extract_strided_slice %224 {offsets = [0, 256], sizes = [4, 128], strides = [1, 1]} : vector<4x384xf32> to vector<4x128xf32>
    %230 = arith.mulf %228, %209 : vector<4x128xf32>
    %231 = arith.mulf %227, %226 : vector<4x128xf32>
    %232 = arith.addf %230, %231 : vector<4x128xf32>
    %233 = math.tanh %232 : vector<4x128xf32>
    %234 = arith.mulf %229, %233 : vector<4x128xf32>
    %c36_74 = arith.constant 36 : index
    %c0_75 = arith.constant 0 : index
    %235 = vector.load %arg6[%c36_74, %c0_75] : memref<48x128xf32, #tpu.memory_space<vmem>>, vector<4x128xf32>
    tpu.vector_store %arg6[%c36_74, %c0_75], %234 {strides = array<i32>} : memref<48x128xf32, #tpu.memory_space<vmem>>, vector<4x128xf32>,
    %c40 = arith.constant 40 : index
    %c0_76 = arith.constant 0 : index
    %236 = vector.load %arg1[%c40, %c0_76] : memref<48x512xf32, #tpu.memory_space<vmem>>, vector<4x512xf32>
    %237 = vector.broadcast %3 : vector<1x512xf32> to vector<4x512xf32>
    %238 = arith.addf %236, %237 : vector<4x512xf32>
    %c0_77 = arith.constant 0 : index
    %c0_78 = arith.constant 0 : index
    %239 = vector.load %arg5[%c0_77, %c0_78] : memref<128x512xf32, #tpu.memory_space<vmem>>, vector<128x512xf32>
    %cst_79 = arith.constant dense<0.000000e+00> : vector<4x512xf32>
    %240 = tpu.matmul %234, %239, %cst_79 {dimension_numbers = #tpu.dot_dimension_numbers<[1], [0], [0], [1], [0, 0, 1, 1], [], []>} : vector<4x128xf32>, vector<128x512xf32>, vector<4x512xf32> -> vector<4x512xf32>
    %241 = arith.addf %238, %240 : vector<4x512xf32>
    %242 = vector.extract_strided_slice %241 {offsets = [0, 0], sizes = [4, 384], strides = [1, 1]} : vector<4x512xf32> to vector<4x384xf32>
    %243 = arith.negf %242 : vector<4x384xf32>
    %244 = math.exp %243 : vector<4x384xf32>
    %cst_80 = arith.constant 1.000000e+00 : f32
    %245 = vector.broadcast %cst_80 : f32 to vector<4x384xf32>
    %246 = arith.addf %245, %244 : vector<4x384xf32>
    %247 = arith.divf %245, %246 : vector<4x384xf32>
    %248 = vector.extract_strided_slice %241 {offsets = [0, 384], sizes = [4, 128], strides = [1, 1]} : vector<4x512xf32> to vector<4x128xf32>
    %249 = math.tanh %248 : vector<4x128xf32>
    %250 = vector.extract_strided_slice %247 {offsets = [0, 0], sizes = [4, 128], strides = [1, 1]} : vector<4x384xf32> to vector<4x128xf32>
    %251 = vector.extract_strided_slice %247 {offsets = [0, 128], sizes = [4, 128], strides = [1, 1]} : vector<4x384xf32> to vector<4x128xf32>
    %252 = vector.extract_strided_slice %247 {offsets = [0, 256], sizes = [4, 128], strides = [1, 1]} : vector<4x384xf32> to vector<4x128xf32>
    %253 = arith.mulf %251, %232 : vector<4x128xf32>
    %254 = arith.mulf %250, %249 : vector<4x128xf32>
    %255 = arith.addf %253, %254 : vector<4x128xf32>
    %256 = math.tanh %255 : vector<4x128xf32>
    %257 = arith.mulf %252, %256 : vector<4x128xf32>
    %c40_81 = arith.constant 40 : index
    %c0_82 = arith.constant 0 : index
    %258 = vector.load %arg6[%c40_81, %c0_82] : memref<48x128xf32, #tpu.memory_space<vmem>>, vector<4x128xf32>
    tpu.vector_store %arg6[%c40_81, %c0_82], %257 {strides = array<i32>} : memref<48x128xf32, #tpu.memory_space<vmem>>, vector<4x128xf32>,
    %c44 = arith.constant 44 : index
    %c0_83 = arith.constant 0 : index
    %259 = vector.load %arg1[%c44, %c0_83] : memref<48x512xf32, #tpu.memory_space<vmem>>, vector<4x512xf32>
    %260 = vector.broadcast %3 : vector<1x512xf32> to vector<4x512xf32>
    %261 = arith.addf %259, %260 : vector<4x512xf32>
    %c0_84 = arith.constant 0 : index
    %c0_85 = arith.constant 0 : index
    %262 = vector.load %arg5[%c0_84, %c0_85] : memref<128x512xf32, #tpu.memory_space<vmem>>, vector<128x512xf32>
    %cst_86 = arith.constant dense<0.000000e+00> : vector<4x512xf32>
    %263 = tpu.matmul %257, %262, %cst_86 {dimension_numbers = #tpu.dot_dimension_numbers<[1], [0], [0], [1], [0, 0, 1, 1], [], []>} : vector<4x128xf32>, vector<128x512xf32>, vector<4x512xf32> -> vector<4x512xf32>
    %264 = arith.addf %261, %263 : vector<4x512xf32>
    %265 = vector.extract_strided_slice %264 {offsets = [0, 0], sizes = [4, 384], strides = [1, 1]} : vector<4x512xf32> to vector<4x384xf32>
    %266 = arith.negf %265 : vector<4x384xf32>
    %267 = math.exp %266 : vector<4x384xf32>
    %cst_87 = arith.constant 1.000000e+00 : f32
    %268 = vector.broadcast %cst_87 : f32 to vector<4x384xf32>
    %269 = arith.addf %268, %267 : vector<4x384xf32>
    %270 = arith.divf %268, %269 : vector<4x384xf32>
    %271 = vector.extract_strided_slice %264 {offsets = [0, 384], sizes = [4, 128], strides = [1, 1]} : vector<4x512xf32> to vector<4x128xf32>
    %272 = math.tanh %271 : vector<4x128xf32>
    %273 = vector.extract_strided_slice %270 {offsets = [0, 0], sizes = [4, 128], strides = [1, 1]} : vector<4x384xf32> to vector<4x128xf32>
    %274 = vector.extract_strided_slice %270 {offsets = [0, 128], sizes = [4, 128], strides = [1, 1]} : vector<4x384xf32> to vector<4x128xf32>
    %275 = vector.extract_strided_slice %270 {offsets = [0, 256], sizes = [4, 128], strides = [1, 1]} : vector<4x384xf32> to vector<4x128xf32>
    %276 = arith.mulf %274, %255 : vector<4x128xf32>
    %277 = arith.mulf %273, %272 : vector<4x128xf32>
    %278 = arith.addf %276, %277 : vector<4x128xf32>
    %279 = math.tanh %278 : vector<4x128xf32>
    %280 = arith.mulf %275, %279 : vector<4x128xf32>
    %c44_88 = arith.constant 44 : index
    %c0_89 = arith.constant 0 : index
    %281 = vector.load %arg6[%c44_88, %c0_89] : memref<48x128xf32, #tpu.memory_space<vmem>>, vector<4x128xf32>
    tpu.vector_store %arg6[%c44_88, %c0_89], %280 {strides = array<i32>} : memref<48x128xf32, #tpu.memory_space<vmem>>, vector<4x128xf32>,
    %c0_90 = arith.constant 0 : index
    %c0_91 = arith.constant 0 : index
    %282 = vector.load %arg9[%c0_90, %c0_91] : memref<4x128xf32, #tpu.memory_space<vmem>>, vector<4x128xf32>
    tpu.vector_store %arg9[%c0_90, %c0_91], %280 {strides = array<i32>} : memref<4x128xf32, #tpu.memory_space<vmem>>, vector<4x128xf32>,
    %c0_92 = arith.constant 0 : index
    %c0_93 = arith.constant 0 : index
    %283 = vector.load %arg10[%c0_92, %c0_93] : memref<4x128xf32, #tpu.memory_space<vmem>>, vector<4x128xf32>
    tpu.vector_store %arg10[%c0_92, %c0_93], %278 {strides = array<i32>} : memref<4x128xf32, #tpu.memory_space<vmem>>, vector<4x128xf32>,
    %c1_i32 = arith.constant 1 : i32
    %284 = arith.cmpi eq, %arg0, %c1_i32 : i32
    %285 = arith.extui %284 : i1 to i32
    %c0_i32_94 = arith.constant 0 : i32
    %286 = arith.cmpi ne, %285, %c0_i32_94 : i32
    scf.if %286 {
      %c0_95 = arith.constant 0 : index
      %c0_96 = arith.constant 0 : index
      %287 = vector.load %arg7[%c0_95, %c0_96] : memref<4x128xf32, #tpu.memory_space<vmem>>, vector<4x128xf32>
      tpu.vector_store %arg7[%c0_95, %c0_96], %280 {strides = array<i32>} : memref<4x128xf32, #tpu.memory_space<vmem>>, vector<4x128xf32>,
      %c0_97 = arith.constant 0 : index
      %c0_98 = arith.constant 0 : index
      %288 = vector.load %arg8[%c0_97, %c0_98] : memref<4x128xf32, #tpu.memory_space<vmem>>, vector<4x128xf32>
      tpu.vector_store %arg8[%c0_97, %c0_98], %278 {strides = array<i32>} : memref<4x128xf32, #tpu.memory_space<vmem>>, vector<4x128xf32>,
    } else {
    }
    return
  }
  func.func @transform_0(%arg0: i32) -> (i32, i32) {
    %c0_i32 = arith.constant 0 : i32
    %c0_i32_0 = arith.constant 0 : i32
    return %arg0, %c0_i32 : i32, i32
  }
  func.func @transform_1(%arg0: i32) -> (i32, i32) {
    %c0_i32 = arith.constant 0 : i32
    %c0_i32_0 = arith.constant 0 : i32
    %c0_i32_1 = arith.constant 0 : i32
    return %c0_i32, %c0_i32_0 : i32, i32
  }
  func.func @transform_2(%arg0: i32) -> (i32, i32) {
    %c0_i32 = arith.constant 0 : i32
    %c0_i32_0 = arith.constant 0 : i32
    %c0_i32_1 = arith.constant 0 : i32
    return %c0_i32, %c0_i32_0 : i32, i32
  }
  func.func @transform_3(%arg0: i32) -> (i32, i32) {
    %c0_i32 = arith.constant 0 : i32
    %c0_i32_0 = arith.constant 0 : i32
    %c0_i32_1 = arith.constant 0 : i32
    return %c0_i32, %c0_i32_0 : i32, i32
  }
  func.func @transform_4(%arg0: i32) -> (i32, i32) {
    %c0_i32 = arith.constant 0 : i32
    %c0_i32_0 = arith.constant 0 : i32
    %c0_i32_1 = arith.constant 0 : i32
    return %c0_i32, %c0_i32_0 : i32, i32
  }
  func.func @transform_5(%arg0: i32) -> (i32, i32) {
    %c0_i32 = arith.constant 0 : i32
    %c0_i32_0 = arith.constant 0 : i32
    return %arg0, %c0_i32 : i32, i32
  }
  func.func @transform_6(%arg0: i32) -> (i32, i32) {
    %c0_i32 = arith.constant 0 : i32
    %c0_i32_0 = arith.constant 0 : i32
    %c0_i32_1 = arith.constant 0 : i32
    return %c0_i32, %c0_i32_0 : i32, i32
  }
  func.func @transform_7(%arg0: i32) -> (i32, i32) {
    %c0_i32 = arith.constant 0 : i32
    %c0_i32_0 = arith.constant 0 : i32
    %c0_i32_1 = arith.constant 0 : i32
    return %c0_i32, %c0_i32_0 : i32, i32
  }
}

</mosaic_0001>

<bundles_post_ra>
// kernel: tpu_custom_call.1
= control target key start
LH: loop header
LB: loop body
LE: loop exit
PB: predicated region body
PF: predicated region fallthrough
CT: control target
= control target key end

     0   :  { %s5954_s0 = inlined_call_operand.hbm [shape: f32[96,512], index: 0, kind: input, shape index: {}]   ;;  %s5955_s1 = inlined_call_operand.hbm [shape: f32[1,512], index: 1, kind: input, shape index: {}]   ;;  %s5956_s2 = inlined_call_operand.vmem [shape: f32[4,128], index: 2, kind: input, shape index: {}]   ;;  %s5957_s3 = inlined_call_operand.vmem [shape: f32[4,128], index: 3, kind: input, shape index: {}]   ;;  %s5958_s4 = inlined_call_operand.hbm [shape: f32[128,512], index: 4, kind: input, shape index: {}]   ;;  %s5959_s5 = inlined_call_operand.hbm [shape: f32[96,128], index: 5, kind: output, shape index: {0}]   ;;  %s5960_s6 = inlined_call_operand.hbm [shape: f32[4,128], index: 6, kind: output, shape index: {1}]   ;;  %s5961_s7 = inlined_call_operand.hbm [shape: f32[4,128], index: 7, kind: output, shape index: {2}]  }
   0x1   :  { %5971 = sst [smem:[#allocation21_spill]] %s5955_s1 }
   0x2   :  { %13 = vsyncpa [#allocation5], 0 }
   0x3   :  { %15 = vsyncpa [#allocation5 + $0x1], 0 }
   0x4   :  { %16 = vsyncpa [#allocation8], 0 }
   0x5   :  { %17 = vsyncpa [#allocation6], 0 }
   0x6   :  { %19 = vsyncpa [#allocation6 + $0x1], 0 }
   0x7   :  { %20 = vsyncpa [#allocation12], 0  ;;  %s4921_s24 = smov 0   ;;  %s4923_s25 = smov 0  }
   0x8   :  { %s4925_s26 = smov 0   ;;  %s4927_s27 = smov 0  }
   0x9 LB: > { %5972 = sst [smem:[#allocation18_spill]] %s4864_s26  ;;  %s4942_s28 = sadd.s32 4294967295, %s4868_s27   ;;  %s4868_s27 = sphi %s4927_s27, %s6001_s27   ;;  %s4864_s26 = sphi %s4925_s26, %s6003_s26   ;;  %s4860_s25 = sphi %s4923_s25, %s6005_s25   ;;  %s4856_s24 = sphi %s4921_s24, %s6004_s24  }
   0xa   : > { %s3548_s29 = sadd.s32 4294967294, %s4868_s27   ;;  %s4946_s30 = sadd.s32 1, %s4868_s27  }
   0xb   : > { %5973 = sst [smem:[#allocation19_spill]] %s4946_s30  ;;  %s33_s8 = sadd.s32 1, %s4864_s26 }
   0xc   : > { %s30_s9 = ssub.s32 %s4868_s27, %s4946_s30  ;;  %p40_p0 = scmp.ne.s32.totalorder %s4864_s26, %s4860_s25 }
   0xd   : > { %p31_p1 = scmp.eq.s32.totalorder %s30_s9, 0  ;;  %p41_p2 = scmp.eq.s32.totalorder %s4868_s27, 0 }
   0xe   : > { %p46_p3 = scmp.ne.s32.totalorder %s4860_s25, %s4856_s24  ;;  %p5962_p4 = scmp.eq.s32.totalorder %s4942_s28, 0 }
   0xf   : > { %s4958_s10 = scalar_select %p31_p1, %s4864_s26, %s33_s8  }
  0x10   : > { %p4960_p5 = por %p41_p2, %p40_p0  ;;  %p4966_p6 = por %p5962_p4, %p46_p3 }
  0x11   : > { %5974 = sst [smem:[#allocation20_spill]] %s4958_s10  ;;  %p5963_p7 = scmp.eq.s32.totalorder %s4942_s28, 1 }
  0x12   : > { %s5976_s12 = scalar_select %p4966_p6, 1, 0 }
  0x13   : > { %p160_p8 = scmp.eq.s32.totalorder %s3548_s29, 1  ;;  %p3549_p9 = scmp.ge.s32.totalorder %s4868_s27, 1 }
  0x14   : > { %p209_p10 = scmp.lt.s32.totalorder %s4868_s27, 3  ;;  %p4975_p11 = por %p5963_p7, %p40_p0 }
  0x15   : > { %p4979_p12 = por %p160_p8, %p46_p3  ;;  %s4870_s16 = smov [#allocation7]  }
  0x16   : > { %s5977_s13 = scalar_select %p4975_p11, 1, 0 }
  0x17   : > { %s5978_s14 = scalar_select %p4979_p12, 1, 0 }
  0x18   : > { %p4983_p13 = pnand %p3549_p9, %p209_p10  ;;  %s222_s17 = sshll.u32 %s4870_s16, 4  ;;  %s223_s17 = int_to_ptr.vmem [resolvable:$true] %s222_s17 }
  0x19   : > { %p4415_p0 = scmp.lt.s32.totalorder %s4868_s27, 2  ;;  %p5980_p7 = scmp.eq.s32.totalorder %s4942_s28, 0 }
  0x1a   : > { %s5979_s15 = scalar_select %p4983_p13, 1, 0 }
  0x1b   : > { %p4398_p4 = pneg %p4983_p13  ;;  %p5000_p3 = pnand %p4415_p0, %p4960_p5 }
  0x1c   : > { %s4871_s20 = smov [#allocation9]   ;;  %s5983_s1 = sld [smem:[#allocation21_spill]] }
  0x1d   : > { %p4994_p6 = pnand %p4398_p4, %p5980_p7  ;;  %s238_s21 = sshll.u32 %s4871_s20, 4  ;;  %s5004_s21 = int_to_ptr.vmem [resolvable:$true] %s238_s21 }
  0x1e   : > { %s5982_s19 = scalar_select %p5000_p3, 1, 0 }
  0x1f   : > { %p4658_p7 = pneg %p4994_p6 }
  0x22   : > { %s4656_s29 = scalar_lea.hbm %s5983_s1, 64 }
  0x23   : > { %p4657_p4 = scmp.ne.s32.totalorder %s5983_s1, %s4656_s29  ;;  %p4663_p9 = scmp.lt.u32.totalorder %s4656_s29, %s5983_s1 }
  0x25   : > { %p4659_p5 = pnand %p4658_p7, %p4657_p4 }
  0x27   : > { %p4660_p8 = pneg %p4659_p5 }
  0x29   : > { %p4665_p10 = pnand %p4663_p9, %p4660_p8 }
  0x2b   : > { %4668 = shalt.err (!%p4665_p10)
}
  0x2c   : > { %s4669_s20 = scalar_lea.vmem %s223_s17, 64  ;;  %p4677_p12 = scmp.lt.s32.totalorder %s223_s17, %s223_s17 }
  0x2d   : > { %p4670_p0 = scmp.ne.s32.totalorder %s223_s17, %s4669_s20  ;;  %p4678_p11 = scmp.lt.s32.totalorder %s4669_s20, %s4669_s20 }
  0x2f   : > { %p4672_p2 = pnand %p4670_p0, %p4658_p7  ;;  %p4679_p13 = por %p4678_p11, %p4677_p12 }
  0x31   : > { %p4673_p1 = pneg %p4672_p2 }
  0x33   : > { %p4680_p3 = pnand %p4679_p13, %p4673_p1 }
  0x35   : > { %4683 = shalt.err (!%p4680_p3)
}
  0x36   : > { %4401 = dma.hbm_to_vmem [thread:$0]  (!%p4994_p6), %s5983_s1, 64, %s223_s17, [#allocation8]  }
  0x37   : > { %s252_s29 = sand.u32 1, %s4864_s26   ;;  %s4684_s11 = scalar_lea.hbm %s5958_s4, 8192 }
  0x38   : > { %p4685_p2 = scmp.ne.s32.totalorder %s5958_s4, %s4684_s11  ;;  %p4691_p13 = scmp.lt.u32.totalorder %s4684_s11, %s5958_s4 }
  0x3a   : > { %p4687_p11 = pnand %p4685_p2, %p4658_p7 }
  0x3c   : > { %p4688_p12 = pneg %p4687_p11 }
  0x3e   : > { %p4693_p1 = pnand %p4691_p13, %p4688_p12 }
  0x40   : > { %4696 = shalt.err (!%p4693_p1)
}
  0x41   : > { %s4697_s17 = scalar_lea.vmem %s5004_s21, 8192  ;;  %p4705_p8 = scmp.lt.s32.totalorder %s5004_s21, %s5004_s21 }
  0x42   : > { %p4698_p3 = scmp.ne.s32.totalorder %s5004_s21, %s4697_s17  ;;  %p4706_p9 = scmp.lt.s32.totalorder %s4697_s17, %s4697_s17 }
  0x44   : > { %p4700_p4 = pnand %p4698_p3, %p4658_p7  ;;  %p4707_p10 = por %p4706_p9, %p4705_p8 }
  0x46   : > { %p4701_p5 = pneg %p4700_p4 }
  0x48   : > { %p4708_p0 = pnand %p4707_p10, %p4701_p5 }
  0x4a   : > { %4711 = shalt.err (!%p4708_p0)
}
  0x4b   : > { %s4872_s30 = smov 512   ;;  %s4873_s10 = smov 32  }
  0x4c   : > { %4404 = dma.hbm_to_vmem [thread:$0]  (!%p4994_p6), %s5958_s4, 8192, %s5004_s21, [#allocation8], %s4872_s30, %s4872_s30, %s4873_s10  }
  0x4d   : > { %s4375_s8 = smul.u32 192, %s252_s29  ;;  %s5065_s1 = scalar_lea.sflag [#allocation5], %s252_s29 }
  0x4e   : > { %s3606_s9 = smul.u32 3072, %s4868_s27  ;;  %p5984_p6 = scmp.ne.s32.totalorder %s5982_s19, 0 }
  0x4f   : > { %s256_s17 = scalar_lea.vmem [#allocation4], %s4375_s8  ;;  %s4717_s23 = scalar_lea.hbm %s5954_s0, 6144 }
  0x50   : > { %s5061_s20 = scalar_lea.hbm %s5954_s0, %s3606_s9  ;;  %s264_s18 = sshll.u32 %s256_s17, 4  ;;  %s5063_s18 = int_to_ptr.vmem [resolvable:$true] %s264_s18 }
  0x51   : > { %s4712_s26 = scalar_lea.hbm %s5061_s20, 3072  ;;  %p4714_p2 = pneg %p5984_p6 }
  0x52   : > { %p4713_p7 = scmp.ne.s32.totalorder %s5061_s20, %s4712_s26  ;;  %p4718_p13 = scmp.lt.u32.totalorder %s5061_s20, %s5954_s0 }
  0x53   : > { %p4719_p1 = scmp.lt.u32.totalorder %s4717_s23, %s4712_s26  ;;  %p4721_p4 = scmp.lt.u32.totalorder %s4712_s26, %s5061_s20 }
  0x54   : > { %p4715_p11 = pnand %p4714_p2, %p4713_p7 }
  0x55   : > { %p4720_p3 = por %p4719_p1, %p4718_p13 }
  0x56   : > { %p4716_p12 = pneg %p4715_p11 }
  0x57   : > { %p4722_p5 = por %p4721_p4, %p4720_p3 }
  0x59   : > { %p4723_p8 = pnand %p4722_p5, %p4716_p12 }
  0x5b   : > { %4726 = shalt.err (!%p4723_p8)
}
  0x5c   : > { %s4727_s29 = scalar_lea.vmem %s5063_s18, 3072  ;;  %s4874_s8 = smov [#allocation4]  }
  0x5d   : > { %p4728_p9 = scmp.ne.s32.totalorder %s5063_s18, %s4727_s29  ;;  %s4732_s16 = sshll.u32 %s4874_s8, 4  ;;  %s4733_s16 = int_to_ptr.vmem [resolvable:$false] %s4732_s16 }
  0x5e   : > { %s4734_s17 = scalar_lea.vmem %s4733_s16, 6144  ;;  %p4735_p7 = scmp.lt.s32.totalorder %s5063_s18, %s4733_s16 }
  0x5f   : > { %p4730_p10 = pnand %p4728_p9, %p4714_p2  ;;  %p4736_p11 = scmp.lt.s32.totalorder %s4734_s17, %s4727_s29 }
  0x61   : > { %p4731_p0 = pneg %p4730_p10  ;;  %p4737_p13 = por %p4736_p11, %p4735_p7 }
  0x63   : > { %p4738_p1 = pnand %p4737_p13, %p4731_p0 }
  0x65   : > { %4741 = shalt.err (!%p4738_p1)
}
  0x66   : > { %4408 = dma.hbm_to_vmem [thread:$0]  (!%p5984_p6), %s5061_s20, 3072, %s5063_s18, %s5065_s1, %s4872_s30, %s4872_s30, %s4873_s10  }
  0x67   : > { %p5985_p2 = scmp.ne.s32.totalorder %s5979_s15, 0 }
  0x68   : > { %s5099_s26 = sand.u32 (!%p5985_p2), 1, %s4860_s25   ;;  %p5986_p12 = scmp.ne.s32.totalorder (!%p5985_p2), %s5976_s12, 0 }
  0x69   : > { %276 = sbr.rel (%p5985_p2) target bundleno = 3358 (0xd1e), region = 40  ;;  %s279_s22 = scalar_lea.sflag (!%p5985_p2), [#allocation5], %s5099_s26 }
  0x6a   : > { %s4376_s21 = smul.u32 (!%p5985_p2), 192, %s5099_s26 }
  0x6c   : > { %s5103_s23 = scalar_lea.vmem (!%p5985_p2), [#allocation4], %s4376_s21 }
  0x70   : > { %4839 = dma.done.wait (%p5986_p12), %s279_s22, 3072  }
  0x71   : > { %4841 = vsyncadd (%p5986_p12), %s279_s22, 4294964224  ;;  %p5987_p6 = scmp.eq.s32.totalorder %s4942_s28, 0 }
  0x73   : > { %4843 = dma.done.wait (%p5987_p6), [#allocation8], 8256   ;;  %p5988_p3 = pmov %p5987_p6 }
  0x74   : > { %s4377_s1 = smul.u32 48, %s5099_s26  ;;  %p5989_p4 = scmp.ne.s32.totalorder %s4942_s28, 0 }
  0x75   : > { %4845 = vsyncadd (%p5988_p3), [#allocation8], 4294959040  ;;  %v327_v0 = vld [vmem:[%s5956_s2] sm:$0xf] (!%p5989_p4) }
  0x76   : > { %s5114_s15 = scalar_lea.vmem [#allocation10], %s4377_s1  ;;  %326 = sbr.rel (%p5989_p4) target bundleno = 125 (0x7d), region = 56  ;;  %v329_v1 = vld [vmem:[%s5957_s3] sm:$0xf] (!%p5989_p4)  ;;  %328 = vst [vmem:[#allocation2] sm:$0xf] (!%p5989_p4), %v327_v0 }
  0x77   : > { %330 = vst [vmem:[#allocation3] sm:$0xf] (!%p5989_p4), %v329_v1 }
  0x7d PF: > { %v364_v2 = vld [vmem:[#allocation9 + $0x8] sm:$0xff]  ;;  %v363_v4 = vld [vmem:[#allocation9] sm:$0xff]  ;;  %v4875_v9 = vmov 0.0   ;;  %v366_v21 = vld [vmem:[#allocation9 + $0x18] sm:$0xff]  ;;  %p3595_p5 = scmp.ne.s32.totalorder %s4942_s28, 1 }
  0x7e   : > { %v368_v3 = vld [vmem:[#allocation9 + $0x28] sm:$0xff]  ;;  %v367_v6 = vld [vmem:[#allocation9 + $0x20] sm:$0xff]  ;;  %491 = vmatprep.mubr.f32.mxu0 %v4875_v9  ;;  %562 = vmatprep.mubr.f32.mxu1 %v4875_v9  ;;  %v370_v22 = vld [vmem:[#allocation9 + $0x38] sm:$0xff] }
  0x7f   : > { %v5124_v5 = vpack.c.bf16 %v368_v3, %v364_v2  ;;  %v372_v7 = vld [vmem:[#allocation9 + $0x48] sm:$0xff]  ;;  %v5128_v10 = vpack.c.bf16 %v367_v6, %v363_v4  ;;  %v371_v12 = vld [vmem:[#allocation9 + $0x40] sm:$0xff]  ;;  %v5139_v24 = vpack.c.bf16 %v370_v22, %v366_v21  ;;  %v365_v25 = vld [vmem:[#allocation9 + $0x10] sm:$0xff] }
  0x80   : > { %v376_v8 = vld [vmem:[#allocation9 + $0x68] sm:$0xff]  ;;  %v375_v13 = vld [vmem:[#allocation9 + $0x60] sm:$0xff]  ;;  %v369_v26 = vld [vmem:[#allocation9 + $0x30] sm:$0xff] }
  0x81   : > { %v5130_v11 = vpack.c.bf16 %v376_v8, %v372_v7  ;;  %v380_v14 = vld [vmem:[#allocation9 + $0x88] sm:$0xff]  ;;  %3608 = vmatprep.subr.bf16.mxu0 %v5124_v5  ;;  %v5134_v16 = vpack.c.bf16 %v375_v13, %v371_v12  ;;  %v379_v17 = vld [vmem:[#allocation9 + $0x80] sm:$0xff]  ;;  %v5141_v27 = vpack.c.bf16 %v369_v26, %v365_v25  ;;  %3640 = vmatprep.subr.bf16.mxu1 %v5139_v24  ;;  %v374_v29 = vld [vmem:[#allocation9 + $0x58] sm:$0xff] }
  0x82   : > { %v384_v15 = vld [vmem:[#allocation9 + $0xa8] sm:$0xff]  ;;  %3610 = vmatpush1.bf16.msra.mxu0 %v5128_v10  ;;  %v383_v18 = vld [vmem:[#allocation9 + $0xa0] sm:$0xff]  ;;  %v378_v30 = vld [vmem:[#allocation9 + $0x78] sm:$0xff] }
  0x83   : > { %3612 = vmatprep.subr.bf16.mxu0 %v5130_v11  ;;  %v5137_v19 = vpack.c.bf16 %v384_v15, %v380_v14  ;;  %v388_v20 = vld [vmem:[#allocation9 + $0xc8] sm:$0xff]  ;;  %v5144_v28 = vpack.c.bf16 %v383_v18, %v379_v17  ;;  %v373_v31 = vld [vmem:[#allocation9 + $0x50] sm:$0xff]  ;;  %v387_v33 = vld [vmem:[#allocation9 + $0xc0] sm:$0xff]  ;;  %3642 = vmatpush1.bf16.msra.mxu1 %v5141_v27  ;;  %v5151_v35 = vpack.c.bf16 %v378_v30, %v374_v29 }
  0x84   : > { %v392_v23 = vld [vmem:[#allocation9 + $0xe8] sm:$0xff]  ;;  %v391_v34 = vld [vmem:[#allocation9 + $0xe0] sm:$0xff]  ;;  %v377_v36 = vld [vmem:[#allocation9 + $0x70] sm:$0xff] }
  0x85   : > { %v5148_v32 = vpack.c.bf16 %v392_v23, %v388_v20  ;;  %v396_v37 = vld [vmem:[#allocation9 + $0x108] sm:$0xff]  ;;  %v5153_v39 = vpack.c.bf16 %v377_v36, %v373_v31  ;;  %v382_v40 = vld [vmem:[#allocation9 + $0x98] sm:$0xff]  ;;  %3644 = vmatprep.subr.bf16.mxu1 %v5151_v35  ;;  %v381_v42 = vld [vmem:[#allocation9 + $0x90] sm:$0xff]  ;;  %v5157_v44 = vpack.c.bf16 %v391_v34, %v387_v33 }
  0x86   : > { %3614 = vmatpush1.bf16.msra.mxu0 %v5134_v16  ;;  %v400_v38 = vld [vmem:[#allocation9 + $0x128] sm:$0xff]  ;;  %v386_v41 = vld [vmem:[#allocation9 + $0xb8] sm:$0xff]  ;;  %v385_v43 = vld [vmem:[#allocation9 + $0xb0] sm:$0xff] }
  0x87   : > { %3616 = vmatprep.subr.bf16.mxu0 %v5137_v19  ;;  %v395_v45 = vld [vmem:[#allocation9 + $0x100] sm:$0xff]  ;;  %v5159_v47 = vpack.c.bf16 %v386_v41, %v382_v40  ;;  %v5162_v48 = vpack.c.bf16 %v400_v38, %v396_v37  ;;  %3646 = vmatpush1.bf16.msra.mxu1 %v5153_v39  ;;  %v404_v49 = vld [vmem:[#allocation9 + $0x148] sm:$0xff]  ;;  %v5165_v50 = vpack.c.bf16 %v385_v43, %v381_v42  ;;  %v390_v51 = vld [vmem:[#allocation9 + $0xd8] sm:$0xff] }
  0x88   : > { %v399_v46 = vld [vmem:[#allocation9 + $0x120] sm:$0xff]  ;;  %v394_v52 = vld [vmem:[#allocation9 + $0xf8] sm:$0xff]  ;;  %v408_v53 = vld [vmem:[#allocation9 + $0x168] sm:$0xff] }
  0x89   : > { %3648 = vmatprep.subr.bf16.mxu1 %v5159_v47  ;;  %v5168_v54 = vpack.c.bf16 %v394_v52, %v390_v51  ;;  %v389_v55 = vld [vmem:[#allocation9 + $0xd0] sm:$0xff]  ;;  %v5171_v57 = vpack.c.bf16 %v399_v46, %v395_v45  ;;  %v398_v58 = vld [vmem:[#allocation9 + $0x118] sm:$0xff]  ;;  %v5174_v60 = vpack.c.bf16 %v408_v53, %v404_v49  ;;  %v403_v61 = vld [vmem:[#allocation9 + $0x140] sm:$0xff]  ;;  %v339_v52 = vlaneseq }
  0x8a   : > { %3618 = vmatpush1.bf16.msra.mxu0 %v5144_v28  ;;  %v393_v56 = vld [vmem:[#allocation9 + $0xf0] sm:$0xff]  ;;  %v402_v59 = vld [vmem:[#allocation9 + $0x138] sm:$0xff]  ;;  %v407_v62 = vld [vmem:[#allocation9 + $0x160] sm:$0xff] }
  0x8b   : > { %3620 = vmatprep.subr.bf16.mxu0 %v5148_v32  ;;  %3650 = vmatpush1.bf16.msra.mxu1 %v5165_v50  ;;  %v412_v63 = vld [vmem:[#allocation9 + $0x188] sm:$0xff]  ;;  %v5177_v0 = vpack.c.bf16 %v393_v56, %v389_v55  ;;  %v5180_v2 = vpack.c.bf16 %v402_v59, %v398_v58  ;;  %v397_v3 = vld [vmem:[#allocation9 + $0x110] sm:$0xff]  ;;  %v406_v6 = vld [vmem:[#allocation9 + $0x158] sm:$0xff]  ;;  %v5183_v8 = vpack.c.bf16 %v407_v62, %v403_v61  ;;  %v340_v53 = vshrl.u32 %v339_v52, 7 }
  0x8c   : > { %v416_v1 = vld [vmem:[#allocation9 + $0x1a8] sm:$0xff]  ;;  %3652 = vmatprep.subr.bf16.mxu1 %v5168_v54  ;;  %v401_v4 = vld [vmem:[#allocation9 + $0x130] sm:$0xff]  ;;  %v410_v7 = vld [vmem:[#allocation9 + $0x178] sm:$0xff] }
  0x8d   : > { %v5186_v12 = vpack.c.bf16 %v416_v1, %v412_v63  ;;  %v411_v13 = vld [vmem:[#allocation9 + $0x180] sm:$0xff]  ;;  %v420_v15 = vld [vmem:[#allocation9 + $0x1c8] sm:$0xff]  ;;  %v5189_v17 = vpack.c.bf16 %v401_v4, %v397_v3  ;;  %v5192_v20 = vpack.c.bf16 %v410_v7, %v406_v6  ;;  %v405_v21 = vld [vmem:[#allocation9 + $0x150] sm:$0xff]  ;;  %v341_v55 = vsub.s32 0, %v340_v53 }
  0x8e   : > { %3622 = vmatpush1.bf16.msra.mxu0 %v5157_v44  ;;  %v415_v14 = vld [vmem:[#allocation9 + $0x1a0] sm:$0xff]  ;;  %v424_v18 = vld [vmem:[#allocation9 + $0x1e8] sm:$0xff]  ;;  %v409_v22 = vld [vmem:[#allocation9 + $0x170] sm:$0xff]  ;;  %v345_v58 = vsub.s32 1, %v340_v53  ;;  %v349_v1 = vsub.s32 2, %v340_v53 }
  0x8f   : > { %3624 = vmatprep.subr.bf16.mxu0 %v5162_v48  ;;  %3654 = vmatpush1.bf16.msra.mxu1 %v5177_v0  ;;  %v414_v23 = vld [vmem:[#allocation9 + $0x198] sm:$0xff]  ;;  %v5195_v26 = vpack.c.bf16 %v415_v14, %v411_v13  ;;  %v5198_v29 = vpack.c.bf16 %v424_v18, %v420_v15  ;;  %v419_v30 = vld [vmem:[#allocation9 + $0x1c0] sm:$0xff]  ;;  %v5201_v33 = vpack.c.bf16 %v409_v22, %v405_v21  ;;  %v413_v36 = vld [vmem:[#allocation9 + $0x190] sm:$0xff]  ;;  %v353_v13 = vsub.s32 3, %v340_v53 }
  0x90   : > { %3656 = vmatprep.subr.bf16.mxu1 %v5180_v2  ;;  %v418_v25 = vld [vmem:[#allocation9 + $0x1b8] sm:$0xff]  ;;  %v423_v31 = vld [vmem:[#allocation9 + $0x1e0] sm:$0xff]  ;;  %v417_v37 = vld [vmem:[#allocation9 + $0x1b0] sm:$0xff] }
  0x91   : > { %v5204_v34 = vpack.c.bf16 %v418_v25, %v414_v23  ;;  %v422_v38 = vld [vmem:[#allocation9 + $0x1d8] sm:$0xff]  ;;  %v5207_v41 = vpack.c.bf16 %v423_v31, %v419_v30  ;;  %v5211_v42 = vpack.c.bf16 %v417_v37, %v413_v36  ;;  %v421_v45 = vld [vmem:[#allocation9 + $0x1d0] sm:$0xff]  ;;  %v335_v63 = vld [vmem:[%s5103_s23 + $0x8] sm:$0xf] }
  0x92   : > { %3626 = vmatpush1.bf16.msra.mxu0 %v5171_v57  ;;  %v426_v40 = vld [vmem:[#allocation9 + $0x1f8] sm:$0xff]  ;;  %v425_v46 = vld [vmem:[#allocation9 + $0x1f0] sm:$0xff]  ;;  %v336_v7 = vld [vmem:[%s5103_s23 + $0x10] sm:$0xf] }
  0x93   : > { %3628 = vmatprep.subr.bf16.mxu0 %v5174_v60  ;;  %3658 = vmatpush1.bf16.msra.mxu1 %v5189_v17  ;;  %v5214_v43 = vpack.c.bf16 %v426_v40, %v422_v38  ;;  %v332_v49 = vld [vmem:[#allocation2] sm:$0xf]  ;;  %v5218_v51 = vpack.c.bf16 %v425_v46, %v421_v45  ;;  %v331_v56 = vld [vmem:[#allocation7] sm:$0xf] }
  0x94   : > { %3660 = vmatprep.subr.bf16.mxu1 %v5192_v20  ;;  %v5258_v59 = vrot.slane %v331_v56, %v341_v55  ;;  %v334_v61 = vld [vmem:[%s5103_s23] sm:$0xf]  ;;  %v5261_v62 = vrot.slane %v331_v56, %v345_v58  ;;  %v5266_v4 = vrot.slane %v331_v56, %v349_v1  ;;  %v5270_v25 = vrot.slane %v331_v56, %v353_v13  ;;  %v337_v31 = vld [vmem:[%s5103_s23 + $0x18] sm:$0xf]  ;;  %v333_v58 = vld [vmem:[#allocation3] sm:$0xf] }
  0x96   : > { %3630 = vmatpush1.bf16.msra.mxu0 %v5183_v8  ;;  %v360_v3 = vadd.f32 %v5261_v62, %v335_v63  ;;  %v361_v22 = vadd.f32 %v5266_v4, %v336_v7  ;;  %v362_v38 = vadd.f32 %v5270_v25, %v337_v31 }
  0x97   : > { %3632 = vmatprep.subr.bf16.mxu0 %v5186_v12  ;;  %3662 = vmatpush1.bf16.msra.mxu1 %v5201_v33 }
  0x98   : > { %3664 = vmatprep.subr.bf16.mxu1 %v5204_v34 }
  0x9a   : > { %3634 = vmatpush1.bf16.msra.mxu0 %v5195_v26 }
  0x9b   : > { %3636 = vmatprep.subr.bf16.mxu0 %v5198_v29  ;;  %3666 = vmatpush1.bf16.msra.mxu1 %v5211_v42 }
  0x9c   : > { %3668 = vmatprep.subr.bf16.mxu1 %v5214_v43 }
  0x9e   : > { %3638 = vmatpush1.bf16.msra.mxu0 %v5207_v41 }
  0x9f   : > { %3672 = vmatprep.subr.bf16.mxu0 %v5124_v5  ;;  %3670 = vmatpush1.bf16.msra.mxu1 %v5218_v51 }
  0xa0   : > { %3704 = vmatprep.subr.bf16.mxu1 %v5139_v24 }
  0xa1   : > { %492 = vmatmul.mubr.f32.vlgmr.msra.gmra.mrb[0].mxu0 %v332_v49 }
  0xa2   : > { %3674 = vmatpush1.bf16.msra.mxu0 %v5128_v10  ;;  %734 = vmatprep.mubr.f32.mxu0 %v4875_v9 }
  0xa3   : > { %3676 = vmatprep.subr.bf16.mxu0 %v5130_v11  ;;  %563 = vmatmul.mubr.f32.vlgmr.msra.gmra.mrb[0].mxu1 %v332_v49 }
  0xa4   : > { %3706 = vmatpush1.bf16.msra.mxu1 %v5141_v27  ;;  %805 = vmatprep.mubr.f32.mxu1 %v4875_v9 }
  0xa5   : > { %3708 = vmatprep.subr.bf16.mxu1 %v5151_v35 }
  0xa6   : > { %3678 = vmatpush1.bf16.msra.mxu0 %v5134_v16 }
  0xa7   : > { %3680 = vmatprep.subr.bf16.mxu0 %v5137_v19 }
  0xa8   : > { %3710 = vmatpush1.bf16.msra.mxu1 %v5153_v39 }
  0xa9   : > { %3712 = vmatprep.subr.bf16.mxu1 %v5159_v47 }
  0xaa   : > { %3682 = vmatpush1.bf16.msra.mxu0 %v5144_v28 }
  0xab   : > { %3684 = vmatprep.subr.bf16.mxu0 %v5148_v32 }
  0xac   : > { %3714 = vmatpush1.bf16.msra.mxu1 %v5165_v50 }
  0xad   : > { %3716 = vmatprep.subr.bf16.mxu1 %v5168_v54 }
  0xae   : > { %3686 = vmatpush1.bf16.msra.mxu0 %v5157_v44 }
  0xaf   : > { %3688 = vmatprep.subr.bf16.mxu0 %v5162_v48 }
  0xb0   : > { %3718 = vmatpush1.bf16.msra.mxu1 %v5177_v0 }
  0xb1   : > { %3720 = vmatprep.subr.bf16.mxu1 %v5180_v2 }
  0xb2   : > { %3690 = vmatpush1.bf16.msra.mxu0 %v5171_v57 }
  0xb3   : > { %3692 = vmatprep.subr.bf16.mxu0 %v5174_v60 }
  0xb4   : > { %3722 = vmatpush1.bf16.msra.mxu1 %v5189_v17 }
  0xb5   : > { %3724 = vmatprep.subr.bf16.mxu1 %v5192_v20 }
  0xb6   : > { %3694 = vmatpush1.bf16.msra.mxu0 %v5183_v8 }
  0xb7   : > { %3696 = vmatprep.subr.bf16.mxu0 %v5186_v12 }
  0xb8   : > { %3726 = vmatpush1.bf16.msra.mxu1 %v5201_v33 }
  0xb9   : > { %3728 = vmatprep.subr.bf16.mxu1 %v5204_v34 }
  0xba   : > { %3698 = vmatpush1.bf16.msra.mxu0 %v5195_v26 }
  0xbb   : > { %3700 = vmatprep.subr.bf16.mxu0 %v5198_v29 }
  0xbc   : > { %3730 = vmatpush1.bf16.msra.mxu1 %v5211_v42 }
  0xbd   : > { %3732 = vmatprep.subr.bf16.mxu1 %v5214_v43 }
  0xbe   : > { %3702 = vmatpush1.bf16.msra.mxu0 %v5207_v41 }
  0xbf   : > { %3736 = vmatprep.subr.bf16.mxu0 %v5124_v5  ;;  %v359_v5 = vadd.f32 %v5258_v59, %v334_v61 }
  0xc0   : > { %3734 = vmatpush1.bf16.msra.mxu1 %v5218_v51 }
  0xc1   : > { %3768 = vmatprep.subr.bf16.mxu1 %v5139_v24 }
 0x174   : > { %v493_v6 = vpop.f32.mrb[0].mxu0 }
 0x175   : > { %v569_v14 = vadd.f32 %v493_v6, %v359_v5  ;;  %v495_v15 = vpop.f32.mrb[1].mxu0 }
 0x176   : > { %v570_v18 = vadd.f32 %v495_v15, %v360_v3  ;;  %v564_v30 = vpop.f32.mrb[0].mxu1 }
 0x177   : > { %v3559_v21 = vmul.f32 -1.442695, %v569_v14  ;;  %v566_v36 = vpop.f32.mrb[1].mxu1  ;;  %v571_v37 = vadd.f32 %v564_v30, %v361_v22 }
 0x178   : > { %v3560_v23 = vmul.f32 -1.442695, %v570_v18  ;;  %v572_v45 = vadd.f32 %v566_v36, %v362_v38 }
 0x179   : > { %4464 = vpow2.f32 %v3559_v21  ;;  %v3561_v40 = vmul.f32 -1.442695, %v571_v37 }
 0x17a   : > { %4466 = vpow2.f32 %v3560_v23 }
 0x17b   : > { %4468 = vpow2.f32 %v3561_v40 }
 0x17c   : > { %4470 = vtanh.f32 %v572_v45 }
 0x183   : > { %v4465_v46 = vpop.eup %4464 }
 0x184   : > { %v4467_v49 = vpop.eup %4466  ;;  %v582_v52 = vadd.f32 1.0, %v4465_v46 }
 0x185   : > { %v583_v53 = vadd.f32 1.0, %v4467_v49  ;;  %v4469_v55 = vpop.eup %4468 }
 0x186   : > { %4472 = vrcp.f32 %v582_v52  ;;  %v4471_v56 = vpop.eup %4470  ;;  %v584_v63 = vadd.f32 1.0, %v4469_v55 }
 0x187   : > { %4474 = vrcp.f32 %v583_v53 }
 0x188   : > { %4476 = vrcp.f32 %v584_v63 }
 0x190   : > { %v4473_v61 = vpop.eup %4472 }
 0x191   : > { %v4475_v1 = vpop.eup %4474  ;;  %v593_v5 = vmul.f32 %v4473_v61, %v4471_v56 }
 0x192   : > { %v592_v3 = vmul.f32 %v4475_v1, %v333_v58  ;;  %v4477_v7 = vpop.eup %4476 }
 0x194   : > { %v5274_v6 = vadd.f32 %v593_v5, %v592_v3  ;;  %v1134_v5 = vld [vmem:[#allocation9 + $0xa8] sm:$0xff] }
 0x196   : > { %4478 = vtanh.f32 %v5274_v6  ;;  %v848_v46 = vrot.slane %v5274_v6, 4  ;;  %v1129_v6 = vld [vmem:[#allocation9 + $0x80] sm:$0xff] }
 0x1a0   : > { %v4479_v13 = vpop.eup %4478 }
 0x1a1   : > { %v596_v14 = vmul.f32 %v4479_v13, %v4477_v7  ;;  %v1133_v7 = vld [vmem:[#allocation9 + $0xa0] sm:$0xff] }
 0x1a2   : > { %v5353_v13 = vpack.c.bf16 %v1133_v7, %v1129_v6  ;;  %v859_v6 = vld [vmem:[%s5103_s23 + $0x38] sm:$0xf] }
 0x1a3   : > { %597 = vst [vmem:[%s5114_s15] sm:$0xf] %v596_v14  ;;  %735 = vmatmul.mubr.f32.vlgmr.msra.gmra.mrb[2].mxu0 %v596_v14  ;;  %806 = vmatmul.mubr.f32.vlgmr.msra.gmra.mrb[2].mxu1 %v596_v14  ;;  %v1138_v14 = vld [vmem:[#allocation9 + $0xc8] sm:$0xff]  ;;  %v863_v7 = vadd.f32 %v859_v6, %v5270_v25 }
 0x1a4   : > { %3738 = vmatpush1.bf16.msra.mxu0 %v5128_v10  ;;  %3770 = vmatpush1.bf16.msra.mxu1 %v5141_v27  ;;  %v598_v10 = vld [vmem:[%s5103_s23] sm:$0xf0] }
 0x1a5   : > { %3740 = vmatprep.subr.bf16.mxu0 %v5130_v11  ;;  %3772 = vmatprep.subr.bf16.mxu1 %v5151_v35  ;;  %v599_v11 = vld [vmem:[%s5103_s23 + $0x8] sm:$0xf0] }
 0x1a6   : > { %995 = vmatprep.mubr.f32.mxu0 %v4875_v9  ;;  %1066 = vmatprep.mubr.f32.mxu1 %v4875_v9 }
 0x1a8   : > { %3742 = vmatpush1.bf16.msra.mxu0 %v5134_v16  ;;  %3774 = vmatpush1.bf16.msra.mxu1 %v5153_v39  ;;  %v602_v16 = vadd.f32 %v598_v10, %v5258_v59  ;;  %v1142_v10 = vld [vmem:[#allocation9 + $0xe8] sm:$0xff] }
 0x1a9   : > { %3744 = vmatprep.subr.bf16.mxu0 %v5137_v19  ;;  %3776 = vmatprep.subr.bf16.mxu1 %v5159_v47 }
 0x1ac   : > { %3746 = vmatpush1.bf16.msra.mxu0 %v5144_v28  ;;  %3778 = vmatpush1.bf16.msra.mxu1 %v5165_v50 }
 0x1ad   : > { %3748 = vmatprep.subr.bf16.mxu0 %v5148_v32  ;;  %3780 = vmatprep.subr.bf16.mxu1 %v5168_v54  ;;  %v603_v32 = vadd.f32 %v599_v11, %v5261_v62  ;;  %v5357_v11 = vpack.c.bf16 %v1142_v10, %v1138_v14 }
 0x1b0   : > { %3750 = vmatpush1.bf16.msra.mxu0 %v5157_v44  ;;  %3782 = vmatpush1.bf16.msra.mxu1 %v5177_v0 }
 0x1b1   : > { %3752 = vmatprep.subr.bf16.mxu0 %v5162_v48  ;;  %3784 = vmatprep.subr.bf16.mxu1 %v5180_v2 }
 0x1b4   : > { %3754 = vmatpush1.bf16.msra.mxu0 %v5171_v57  ;;  %3786 = vmatpush1.bf16.msra.mxu1 %v5189_v17 }
 0x1b5   : > { %3756 = vmatprep.subr.bf16.mxu0 %v5174_v60  ;;  %3788 = vmatprep.subr.bf16.mxu1 %v5192_v20 }
 0x1b8   : > { %3758 = vmatpush1.bf16.msra.mxu0 %v5183_v8  ;;  %3790 = vmatpush1.bf16.msra.mxu1 %v5201_v33 }
 0x1b9   : > { %3760 = vmatprep.subr.bf16.mxu0 %v5186_v12  ;;  %3792 = vmatprep.subr.bf16.mxu1 %v5204_v34  ;;  %v600_v12 = vld [vmem:[%s5103_s23 + $0x10] sm:$0xf0] }
 0x1bc   : > { %3762 = vmatpush1.bf16.msra.mxu0 %v5195_v26  ;;  %3794 = vmatpush1.bf16.msra.mxu1 %v5211_v42 }
 0x1bd   : > { %3764 = vmatprep.subr.bf16.mxu0 %v5198_v29  ;;  %3796 = vmatprep.subr.bf16.mxu1 %v5214_v43 }
 0x1c0   : > { %3766 = vmatpush1.bf16.msra.mxu0 %v5207_v41  ;;  %3798 = vmatpush1.bf16.msra.mxu1 %v5218_v51  ;;  %v601_v51 = vld [vmem:[%s5103_s23 + $0x18] sm:$0xf0] }
 0x1c1   : > { %3832 = vmatprep.subr.bf16.mxu1 %v5139_v24  ;;  %v604_v24 = vadd.f32 %v600_v12, %v5266_v4  ;;  %v605_v15 = vadd.f32 %v601_v51, %v5270_v25  ;;  %v1154_v12 = vld [vmem:[#allocation9 + $0x148] sm:$0xff] }
 0x1c2   : > { %v1162_v51 = vld [vmem:[#allocation9 + $0x188] sm:$0xff] }
 0x276   : > { %v736_v19 = vpop.f32.mrb[2].mxu0  ;;  %v807_v28 = vpop.f32.mrb[2].mxu1 }
 0x277   : > { %v816_v44 = vrot.slane %v736_v19, 4  ;;  %v738_v48 = vpop.f32.mrb[3].mxu0  ;;  %v809_v57 = vpop.f32.mrb[3].mxu1  ;;  %v818_v43 = vrot.slane %v807_v28, 4  ;;  %v1141_v19 = vld [vmem:[#allocation9 + $0xe0] sm:$0xff] }
 0x278   : > { %v817_v60 = vrot.slane %v738_v48, 4  ;;  %v819_v18 = vrot.slane %v809_v57, 4  ;;  %v1145_v57 = vld [vmem:[#allocation9 + $0x100] sm:$0xff] }
 0x279   : > { %v824_v8 = vadd.f32 %v816_v44, %v602_v16  ;;  %v826_v21 = vadd.f32 %v818_v43, %v604_v24  ;;  %v1137_v16 = vld [vmem:[#allocation9 + $0xc0] sm:$0xff]  ;;  %v1150_v44 = vld [vmem:[#allocation9 + $0x128] sm:$0xff] }
 0x27a   : > { %v825_v26 = vadd.f32 %v817_v60, %v603_v32  ;;  %v827_v22 = vadd.f32 %v819_v18, %v605_v15  ;;  %v5359_v28 = vpack.c.bf16 %v1141_v19, %v1137_v16  ;;  %v1146_v32 = vld [vmem:[#allocation9 + $0x108] sm:$0xff]  ;;  %v1149_v60 = vld [vmem:[#allocation9 + $0x120] sm:$0xff] }
 0x27b   : > { %v3562_v29 = vmul.f32 -1.442695, %v824_v8  ;;  %v3564_v23 = vmul.f32 -1.442695, %v826_v21  ;;  %v5363_v48 = vpack.c.bf16 %v1150_v44, %v1146_v32  ;;  %v5365_v8 = vpack.c.bf16 %v1149_v60, %v1145_v57  ;;  %v1157_v24 = vld [vmem:[#allocation9 + $0x160] sm:$0xff]  ;;  %v1166_v15 = vld [vmem:[#allocation9 + $0x1a8] sm:$0xff] }
 0x27c   : > { %v3563_v41 = vmul.f32 -1.442695, %v825_v26  ;;  %v1158_v26 = vld [vmem:[#allocation9 + $0x168] sm:$0xff]  ;;  %v1161_v18 = vld [vmem:[#allocation9 + $0x180] sm:$0xff]  ;;  %v5374_v21 = vpack.c.bf16 %v1166_v15, %v1162_v51 }
 0x27d   : > { %4480 = vpow2.f32 %v3562_v29  ;;  %v5369_v29 = vpack.c.bf16 %v1158_v26, %v1154_v12 }
 0x27e   : > { %4482 = vpow2.f32 %v3563_v41  ;;  %v1153_v41 = vld [vmem:[#allocation9 + $0x140] sm:$0xff] }
 0x27f   : > { %4484 = vtanh.f32 %v827_v22  ;;  %v5371_v43 = vpack.c.bf16 %v1157_v24, %v1153_v41  ;;  %v1165_v22 = vld [vmem:[#allocation9 + $0x1a0] sm:$0xff] }
 0x280   : > { %4486 = vpow2.f32 %v3564_v23  ;;  %v1170_v23 = vld [vmem:[#allocation9 + $0x1c8] sm:$0xff] }
 0x287   : > { %v4481_v30 = vpop.eup %4480 }
 0x288   : > { %v837_v31 = vadd.f32 1.0, %v4481_v30  ;;  %v4483_v36 = vpop.eup %4482  ;;  %v1174_v30 = vld [vmem:[#allocation9 + $0x1e8] sm:$0xff] }
 0x289   : > { %v838_v37 = vadd.f32 1.0, %v4483_v36  ;;  %v4485_v38 = vpop.eup %4484  ;;  %v1172_v36 = vld [vmem:[#allocation9 + $0x1d8] sm:$0xff] }
 0x28a   : > { %4488 = vrcp.f32 %v837_v31  ;;  %v4487_v40 = vpop.eup %4486  ;;  %v5377_v31 = vpack.c.bf16 %v1165_v22, %v1161_v18 }
 0x28b   : > { %4490 = vrcp.f32 %v838_v37  ;;  %v839_v53 = vadd.f32 1.0, %v4487_v40  ;;  %v1176_v37 = vld [vmem:[#allocation9 + $0x1f8] sm:$0xff]  ;;  %v5380_v40 = vpack.c.bf16 %v1174_v30, %v1170_v23 }
 0x28d   : > { %4492 = vrcp.f32 %v839_v53 }
 0x294   : > { %v4489_v45 = vpop.eup %4488 }
 0x295   : > { %v851_v49 = vmul.f32 %v4489_v45, %v4485_v38  ;;  %v4491_v52 = vpop.eup %4490  ;;  %v1169_v38 = vld [vmem:[#allocation9 + $0x1c0] sm:$0xff]  ;;  %v5382_v45 = vpack.c.bf16 %v1176_v37, %v1172_v36  ;;  %v1378_v37 = vld [vmem:[#allocation9 + $0x38] sm:$0xff] }
 0x296   : > { %v850_v55 = vmul.f32 %v4491_v52, %v848_v46  ;;  %v1173_v46 = vld [vmem:[#allocation9 + $0x1e0] sm:$0xff]  ;;  %v1175_v52 = vld [vmem:[#allocation9 + $0x1f0] sm:$0xff] }
 0x297   : > { %v4493_v58 = vpop.eup %4492 }
 0x298   : > { %v5320_v56 = vadd.f32 %v851_v49, %v850_v55  ;;  %v1171_v49 = vld [vmem:[#allocation9 + $0x1d0] sm:$0xff]  ;;  %v5388_v55 = vpack.c.bf16 %v1173_v46, %v1169_v38 }
 0x299   : > { %v5384_v53 = vpack.c.bf16 %v1175_v52, %v1171_v49  ;;  %v1373_v46 = vld [vmem:[#allocation9 + $0x10] sm:$0xff] }
 0x29a   : > { %4494 = vtanh.f32 %v5320_v56  ;;  %v1097_v41 = vrot.slane %v5320_v56, 4  ;;  %v1374_v56 = vld [vmem:[#allocation9 + $0x18] sm:$0xff]  ;;  %v1377_v49 = vld [vmem:[#allocation9 + $0x30] sm:$0xff] }
 0x29b   : > { %v5425_v38 = vpack.c.bf16 %v1378_v37, %v1374_v56  ;;  %v5427_v52 = vpack.c.bf16 %v1377_v49, %v1373_v46  ;;  %v1425_v56 = vld [vmem:[#allocation9 + $0x1b0] sm:$0xff]  ;;  %v1105_v46 = vld [vmem:[%s5103_s23 + $0x20] sm:$0xf0]  ;;  %v1106_v49 = vld [vmem:[%s5103_s23 + $0x28] sm:$0xf0] }
 0x2a4   : > { %v4495_v61 = vpop.eup %4494 }
 0x2a5   : > { %v854_v63 = vmul.f32 %v4495_v61, %v4493_v58  ;;  %v856_v58 = vld [vmem:[%s5103_s23 + $0x20] sm:$0xf]  ;;  %v857_v61 = vld [vmem:[%s5103_s23 + $0x28] sm:$0xf] }
 0x2a7   : > { %855 = vst [vmem:[%s5114_s15] sm:$0xf0] %v854_v63  ;;  %v929_v1 = vrot.slane %v854_v63, 4  ;;  %v860_v63 = vadd.f32 %v856_v58, %v5258_v59  ;;  %v1382_v58 = vld [vmem:[#allocation9 + $0x58] sm:$0xff] }
 0x2a9   : > { %996 = vmatmul.mubr.f32.vlgmr.msra.gmra.mrb[4].mxu0 %v929_v1  ;;  %1067 = vmatmul.mubr.f32.vlgmr.msra.gmra.mrb[4].mxu1 %v929_v1  ;;  %v861_v1 = vadd.f32 %v857_v61, %v5261_v62  ;;  %v1386_v61 = vld [vmem:[#allocation9 + $0x78] sm:$0xff] }
 0x2aa   : > { %3834 = vmatpush1.bf16.msra.mxu1 %v5141_v27  ;;  %1241 = vmatprep.mubr.f32.mxu0 %v4875_v9  ;;  %v1114_v27 = vld [vmem:[#allocation9 + $0x8] sm:$0xff] }
 0x2ab   : > { %3836 = vmatprep.subr.bf16.mxu1 %v5151_v35  ;;  %1312 = vmatprep.mubr.f32.mxu1 %v4875_v9  ;;  %v1118_v35 = vld [vmem:[#allocation9 + $0x28] sm:$0xff] }
 0x2ae   : > { %3838 = vmatpush1.bf16.msra.mxu1 %v5153_v39  ;;  %v5339_v39 = vpack.c.bf16 %v1118_v35, %v1114_v27 }
 0x2af   : > { %3840 = vmatprep.subr.bf16.mxu1 %v5159_v47  ;;  %v1113_v47 = vld [vmem:[#allocation9] sm:$0xff] }
 0x2b0   : > { %3800 = vmatprep.subr.bf16.mxu0 %v5339_v39 }
 0x2b2   : > { %3842 = vmatpush1.bf16.msra.mxu1 %v5165_v50  ;;  %v1117_v50 = vld [vmem:[#allocation9 + $0x20] sm:$0xff] }
 0x2b3   : > { %3844 = vmatprep.subr.bf16.mxu1 %v5168_v54  ;;  %v5341_v54 = vpack.c.bf16 %v1117_v50, %v1113_v47 }
 0x2b5   : > { %3802 = vmatpush1.bf16.msra.mxu0 %v5341_v54 }
 0x2b6   : > { %3846 = vmatpush1.bf16.msra.mxu1 %v5177_v0  ;;  %v1122_v0 = vld [vmem:[#allocation9 + $0x48] sm:$0xff] }
 0x2b7   : > { %3848 = vmatprep.subr.bf16.mxu1 %v5180_v2  ;;  %v1126_v2 = vld [vmem:[#allocation9 + $0x68] sm:$0xff] }
 0x2ba   : > { %3850 = vmatpush1.bf16.msra.mxu1 %v5189_v17  ;;  %v5345_v17 = vpack.c.bf16 %v1126_v2, %v1122_v0  ;;  %v858_v2 = vld [vmem:[%s5103_s23 + $0x30] sm:$0xf] }
 0x2bb   : > { %3852 = vmatprep.subr.bf16.mxu1 %v5192_v20  ;;  %v1121_v20 = vld [vmem:[#allocation9 + $0x40] sm:$0xff] }
 0x2bc   : > { %3804 = vmatprep.subr.bf16.mxu0 %v5345_v17 }
 0x2be   : > { %3854 = vmatpush1.bf16.msra.mxu1 %v5201_v33  ;;  %v1125_v33 = vld [vmem:[#allocation9 + $0x60] sm:$0xff] }
 0x2bf   : > { %3856 = vmatprep.subr.bf16.mxu1 %v5204_v34  ;;  %v5347_v34 = vpack.c.bf16 %v1125_v33, %v1121_v20 }
 0x2c1   : > { %3806 = vmatpush1.bf16.msra.mxu0 %v5347_v34 }
 0x2c2   : > { %3858 = vmatpush1.bf16.msra.mxu1 %v5211_v42  ;;  %v1130_v42 = vld [vmem:[#allocation9 + $0x88] sm:$0xff] }
 0x2c3   : > { %v5351_v3 = vpack.c.bf16 %v1134_v5, %v1130_v42  ;;  %3860 = vmatprep.subr.bf16.mxu1 %v5382_v45  ;;  %v862_v5 = vadd.f32 %v858_v2, %v5266_v4  ;;  %v1389_v2 = vld [vmem:[#allocation9 + $0x90] sm:$0xff] }
 0x2c5   : > { %3808 = vmatprep.subr.bf16.mxu0 %v5351_v3 }
 0x2c6   : > { %3810 = vmatpush1.bf16.msra.mxu0 %v5353_v13  ;;  %3862 = vmatpush1.bf16.msra.mxu1 %v5384_v53 }
 0x2c7   : > { %3812 = vmatprep.subr.bf16.mxu0 %v5357_v11  ;;  %3896 = vmatprep.subr.bf16.mxu1 %v5425_v38 }
 0x2ca   : > { %3814 = vmatpush1.bf16.msra.mxu0 %v5359_v28 }
 0x2cb   : > { %3816 = vmatprep.subr.bf16.mxu0 %v5363_v48 }
 0x2ce   : > { %3818 = vmatpush1.bf16.msra.mxu0 %v5365_v8 }
 0x2cf   : > { %3820 = vmatprep.subr.bf16.mxu0 %v5369_v29 }
 0x2d2   : > { %3822 = vmatpush1.bf16.msra.mxu0 %v5371_v43 }
 0x2d3   : > { %3824 = vmatprep.subr.bf16.mxu0 %v5374_v21 }
 0x2d6   : > { %3826 = vmatpush1.bf16.msra.mxu0 %v5377_v31 }
 0x2d7   : > { %3828 = vmatprep.subr.bf16.mxu0 %v5380_v40 }
 0x2da   : > { %3830 = vmatpush1.bf16.msra.mxu0 %v5388_v55 }
 0x2db   : > { %3864 = vmatprep.subr.bf16.mxu0 %v5339_v39 }
 0x37c   : > { %v997_v27 = vpop.f32.mrb[4].mxu0  ;;  %v1068_v35 = vpop.f32.mrb[4].mxu1 }
 0x37d   : > { %v1073_v47 = vadd.f32 %v997_v27, %v860_v63  ;;  %v999_v50 = vpop.f32.mrb[5].mxu0  ;;  %v1070_v0 = vpop.f32.mrb[5].mxu1  ;;  %v1075_v14 = vadd.f32 %v1068_v35, %v862_v5  ;;  %v5431_v63 = vpack.c.bf16 %v1386_v61, %v1382_v58  ;;  %v1385_v27 = vld [vmem:[#allocation9 + $0x70] sm:$0xff]  ;;  %v1402_v5 = vld [vmem:[#allocation9 + $0xf8] sm:$0xff]  ;;  %v1109_v58 = vadd.f32 %v1105_v46, %v5258_v59 }
 0x37e   : > { %v1074_v20 = vadd.f32 %v999_v50, %v861_v1  ;;  %v1076_v10 = vadd.f32 %v1070_v0, %v863_v7  ;;  %v1381_v1 = vld [vmem:[#allocation9 + $0x50] sm:$0xff]  ;;  %v1394_v50 = vld [vmem:[#allocation9 + $0xb8] sm:$0xff] }
 0x37f   : > { %v3565_v33 = vmul.f32 -1.442695, %v1073_v47  ;;  %v3567_v16 = vmul.f32 -1.442695, %v1075_v14  ;;  %v5433_v35 = vpack.c.bf16 %v1385_v27, %v1381_v1  ;;  %v1390_v47 = vld [vmem:[#allocation9 + $0x98] sm:$0xff]  ;;  %v1397_v7 = vld [vmem:[#allocation9 + $0xd0] sm:$0xff]  ;;  %v1110_v27 = vadd.f32 %v1106_v49, %v5261_v62 }
 0x380   : > { %v3566_v42 = vmul.f32 -1.442695, %v1074_v20  ;;  %v5437_v0 = vpack.c.bf16 %v1394_v50, %v1390_v47  ;;  %v1393_v20 = vld [vmem:[#allocation9 + $0xb0] sm:$0xff] }
 0x381   : > { %4496 = vpow2.f32 %v3565_v33  ;;  %v5439_v33 = vpack.c.bf16 %v1393_v20, %v1389_v2  ;;  %v1401_v14 = vld [vmem:[#allocation9 + $0xf0] sm:$0xff] }
 0x382   : > { %4498 = vpow2.f32 %v3566_v42  ;;  %v1398_v42 = vld [vmem:[#allocation9 + $0xd8] sm:$0xff] }
 0x383   : > { %4500 = vtanh.f32 %v1076_v10  ;;  %v5443_v6 = vpack.c.bf16 %v1402_v5, %v1398_v42  ;;  %v5445_v10 = vpack.c.bf16 %v1401_v14, %v1397_v7  ;;  %v1107_v5 = vld [vmem:[%s5103_s23 + $0x30] sm:$0xf0] }
 0x384   : > { %4502 = vpow2.f32 %v3567_v16  ;;  %v1406_v16 = vld [vmem:[#allocation9 + $0x118] sm:$0xff] }
 0x38b   : > { %v4497_v19 = vpop.eup %4496 }
 0x38c   : > { %v1086_v32 = vadd.f32 1.0, %v4497_v19  ;;  %v4499_v44 = vpop.eup %4498  ;;  %v1410_v19 = vld [vmem:[#allocation9 + $0x138] sm:$0xff] }
 0x38d   : > { %v1087_v57 = vadd.f32 1.0, %v4499_v44  ;;  %v4501_v60 = vpop.eup %4500  ;;  %v1405_v44 = vld [vmem:[#allocation9 + $0x110] sm:$0xff] }
 0x38e   : > { %4504 = vrcp.f32 %v1086_v32  ;;  %v4503_v12 = vpop.eup %4502  ;;  %v5449_v32 = vpack.c.bf16 %v1410_v19, %v1406_v16  ;;  %v1111_v19 = vadd.f32 %v1107_v5, %v5266_v4 }
 0x38f   : > { %4506 = vrcp.f32 %v1087_v57  ;;  %v1088_v15 = vadd.f32 1.0, %v4503_v12  ;;  %v1409_v57 = vld [vmem:[#allocation9 + $0x130] sm:$0xff]  ;;  %v1414_v12 = vld [vmem:[#allocation9 + $0x158] sm:$0xff] }
 0x391   : > { %4508 = vrcp.f32 %v1088_v15  ;;  %v1422_v15 = vld [vmem:[#allocation9 + $0x198] sm:$0xff] }
 0x398   : > { %v4505_v26 = vpop.eup %4504 }
 0x399   : > { %v1100_v24 = vmul.f32 %v4505_v26, %v4501_v60  ;;  %v4507_v51 = vpop.eup %4506  ;;  %v5451_v60 = vpack.c.bf16 %v1409_v57, %v1405_v44  ;;  %v1418_v26 = vld [vmem:[#allocation9 + $0x178] sm:$0xff] }
 0x39a   : > { %v1099_v18 = vmul.f32 %v4507_v51, %v1097_v41  ;;  %v1413_v41 = vld [vmem:[#allocation9 + $0x150] sm:$0xff]  ;;  %v1108_v57 = vld [vmem:[%s5103_s23 + $0x38] sm:$0xf0] }
 0x39b   : > { %v4509_v23 = vpop.eup %4508  ;;  %v1417_v51 = vld [vmem:[#allocation9 + $0x170] sm:$0xff] }
 0x39c   : > { %v5403_v22 = vadd.f32 %v1100_v24, %v1099_v18  ;;  %v5455_v24 = vpack.c.bf16 %v1418_v26, %v1414_v12  ;;  %v1426_v18 = vld [vmem:[#allocation9 + $0x1b8] sm:$0xff]  ;;  %v1112_v12 = vadd.f32 %v1108_v57, %v5270_v25 }
 0x39e   : > { %4510 = vtanh.f32 %v5403_v22 }
 0x3a8   : > { %v4511_v30 = vpop.eup %4510 }
 0x3a9   : > { %v1103_v36 = vmul.f32 %v4511_v30, %v4509_v23  ;;  %v5457_v23 = vpack.c.bf16 %v1417_v51, %v1413_v41  ;;  %v5459_v30 = vpack.c.bf16 %v1426_v18, %v1422_v15 }
 0x3ab   : > { %1104 = vst [vmem:[%s5114_s15 + $0x8] sm:$0xf] %v1103_v36  ;;  %1242 = vmatmul.mubr.f32.vlgmr.msra.gmra.mrb[6].mxu0 %v1103_v36  ;;  %1313 = vmatmul.mubr.f32.vlgmr.msra.gmra.mrb[6].mxu1 %v1103_v36  ;;  %v1421_v36 = vld [vmem:[#allocation9 + $0x190] sm:$0xff] }
 0x3ac   : > { %3866 = vmatpush1.bf16.msra.mxu0 %v5341_v54  ;;  %1502 = vmatprep.mubr.f32.mxu0 %v4875_v9  ;;  %v5463_v37 = vpack.c.bf16 %v1425_v56, %v1421_v36 }
 0x3ad   : > { %3868 = vmatprep.subr.bf16.mxu0 %v5345_v17  ;;  %1573 = vmatprep.mubr.f32.mxu1 %v4875_v9 }
 0x3ae   : > { %3898 = vmatpush1.bf16.msra.mxu1 %v5427_v52 }
 0x3af   : > { %3900 = vmatprep.subr.bf16.mxu1 %v5431_v63 }
 0x3b0   : > { %3870 = vmatpush1.bf16.msra.mxu0 %v5347_v34 }
 0x3b1   : > { %3872 = vmatprep.subr.bf16.mxu0 %v5351_v3 }
 0x3b2   : > { %3902 = vmatpush1.bf16.msra.mxu1 %v5433_v35 }
 0x3b3   : > { %3904 = vmatprep.subr.bf16.mxu1 %v5437_v0 }
 0x3b4   : > { %3874 = vmatpush1.bf16.msra.mxu0 %v5353_v13 }
 0x3b5   : > { %3876 = vmatprep.subr.bf16.mxu0 %v5357_v11 }
 0x3b6   : > { %3906 = vmatpush1.bf16.msra.mxu1 %v5439_v33 }
 0x3b7   : > { %3908 = vmatprep.subr.bf16.mxu1 %v5443_v6 }
 0x3b8   : > { %3878 = vmatpush1.bf16.msra.mxu0 %v5359_v28 }
 0x3b9   : > { %3880 = vmatprep.subr.bf16.mxu0 %v5363_v48 }
 0x3ba   : > { %3910 = vmatpush1.bf16.msra.mxu1 %v5445_v10 }
 0x3bb   : > { %3912 = vmatprep.subr.bf16.mxu1 %v5449_v32 }
 0x3bc   : > { %3882 = vmatpush1.bf16.msra.mxu0 %v5365_v8 }
 0x3bd   : > { %3884 = vmatprep.subr.bf16.mxu0 %v5369_v29 }
 0x3be   : > { %3914 = vmatpush1.bf16.msra.mxu1 %v5451_v60 }
 0x3bf   : > { %3916 = vmatprep.subr.bf16.mxu1 %v5455_v24 }
 0x3c0   : > { %3886 = vmatpush1.bf16.msra.mxu0 %v5371_v43 }
 0x3c1   : > { %3888 = vmatprep.subr.bf16.mxu0 %v5374_v21 }
 0x3c2   : > { %3918 = vmatpush1.bf16.msra.mxu1 %v5457_v23 }
 0x3c3   : > { %3920 = vmatprep.subr.bf16.mxu1 %v5459_v30 }
 0x3c4   : > { %3890 = vmatpush1.bf16.msra.mxu0 %v5377_v31 }
 0x3c5   : > { %3892 = vmatprep.subr.bf16.mxu0 %v5380_v40 }
 0x3c6   : > { %3922 = vmatpush1.bf16.msra.mxu1 %v5463_v37 }
 0x3c7   : > { %3924 = vmatprep.subr.bf16.mxu1 %v5382_v45 }
 0x3c8   : > { %3894 = vmatpush1.bf16.msra.mxu0 %v5388_v55 }
 0x3c9   : > { %3928 = vmatprep.subr.bf16.mxu0 %v5339_v39 }
 0x3ca   : > { %3926 = vmatpush1.bf16.msra.mxu1 %v5384_v53 }
 0x3cb   : > { %3960 = vmatprep.subr.bf16.mxu1 %v5425_v38 }
 0x47e   : > { %v1243_v61 = vpop.f32.mrb[6].mxu0  ;;  %v1314_v1 = vpop.f32.mrb[6].mxu1 }
 0x47f   : > { %v1323_v47 = vrot.slane %v1243_v61, 4  ;;  %v1245_v50 = vpop.f32.mrb[7].mxu0  ;;  %v1316_v2 = vpop.f32.mrb[7].mxu1  ;;  %v1325_v44 = vrot.slane %v1314_v1, 4  ;;  %v1355_v1 = vrot.slane %v5403_v22, 4 }
 0x480   : > { %v1324_v20 = vrot.slane %v1245_v50, 4  ;;  %v1326_v26 = vrot.slane %v1316_v2, 4  ;;  %v1363_v22 = vld [vmem:[%s5103_s23 + $0x40] sm:$0xf] }
 0x481   : > { %v1331_v42 = vadd.f32 %v1323_v47, %v1109_v58  ;;  %v1333_v41 = vadd.f32 %v1325_v44, %v1111_v19  ;;  %v1367_v19 = vadd.f32 %v1363_v22, %v5258_v59 }
 0x482   : > { %v1332_v7 = vadd.f32 %v1324_v20, %v1110_v27  ;;  %v1334_v51 = vadd.f32 %v1326_v26, %v1112_v12 }
 0x483   : > { %v3568_v14 = vmul.f32 -1.442695, %v1331_v42  ;;  %v3570_v15 = vmul.f32 -1.442695, %v1333_v41 }
 0x484   : > { %v3569_v16 = vmul.f32 -1.442695, %v1332_v7 }
 0x485   : > { %4512 = vpow2.f32 %v3568_v14 }
 0x486   : > { %4514 = vpow2.f32 %v3569_v16  ;;  %v1364_v16 = vld [vmem:[%s5103_s23 + $0x48] sm:$0xf] }
 0x487   : > { %4516 = vtanh.f32 %v1334_v51  ;;  %v1368_v44 = vadd.f32 %v1364_v16, %v5261_v62 }
 0x488   : > { %4518 = vpow2.f32 %v3570_v15  ;;  %v1365_v15 = vld [vmem:[%s5103_s23 + $0x50] sm:$0xf] }
 0x48f   : > { %v4513_v18 = vpop.eup %4512 }
 0x490   : > { %v1344_v36 = vadd.f32 1.0, %v4513_v18  ;;  %v4515_v56 = vpop.eup %4514 }
 0x491   : > { %v1345_v46 = vadd.f32 1.0, %v4515_v56  ;;  %v4517_v49 = vpop.eup %4516 }
 0x492   : > { %4520 = vrcp.f32 %v1344_v36  ;;  %v4519_v58 = vpop.eup %4518 }
 0x493   : > { %4522 = vrcp.f32 %v1345_v46  ;;  %v1346_v50 = vadd.f32 1.0, %v4519_v58  ;;  %v1366_v46 = vld [vmem:[%s5103_s23 + $0x58] sm:$0xf] }
 0x495   : > { %4524 = vrcp.f32 %v1346_v50 }
 0x49c   : > { %v4521_v61 = vpop.eup %4520 }
 0x49d   : > { %v1358_v27 = vmul.f32 %v4521_v61, %v4517_v49  ;;  %v4523_v47 = vpop.eup %4522  ;;  %v1370_v49 = vadd.f32 %v1366_v46, %v5270_v25 }
 0x49e   : > { %v1357_v2 = vmul.f32 %v4523_v47, %v1355_v1 }
 0x49f   : > { %v4525_v42 = vpop.eup %4524 }
 0x4a0   : > { %v5479_v20 = vadd.f32 %v1358_v27, %v1357_v2 }
 0x4a2   : > { %4526 = vtanh.f32 %v5479_v20 }
 0x4ac   : > { %v4527_v5 = vpop.eup %4526 }
 0x4ad   : > { %v1361_v7 = vmul.f32 %v4527_v5, %v4525_v42 }
 0x4af   : > { %1362 = vst [vmem:[%s5114_s15 + $0x8] sm:$0xf0] %v1361_v7  ;;  %v1436_v14 = vrot.slane %v1361_v7, 4 }
 0x4b1   : > { %1503 = vmatmul.mubr.f32.vlgmr.msra.gmra.mrb[8].mxu0 %v1436_v14  ;;  %1574 = vmatmul.mubr.f32.vlgmr.msra.gmra.mrb[8].mxu1 %v1436_v14  ;;  %v1604_v14 = vrot.slane %v5479_v20, 4 }
 0x4b2   : > { %3930 = vmatpush1.bf16.msra.mxu0 %v5341_v54  ;;  %3962 = vmatpush1.bf16.msra.mxu1 %v5427_v52 }
 0x4b3   : > { %3932 = vmatprep.subr.bf16.mxu0 %v5345_v17  ;;  %3964 = vmatprep.subr.bf16.mxu1 %v5431_v63 }
 0x4b4   : > { %1748 = vmatprep.mubr.f32.mxu0 %v4875_v9  ;;  %1819 = vmatprep.mubr.f32.mxu1 %v4875_v9 }
 0x4b6   : > { %3934 = vmatpush1.bf16.msra.mxu0 %v5347_v34  ;;  %3966 = vmatpush1.bf16.msra.mxu1 %v5433_v35 }
 0x4b7   : > { %3936 = vmatprep.subr.bf16.mxu0 %v5351_v3  ;;  %3968 = vmatprep.subr.bf16.mxu1 %v5437_v0 }
 0x4ba   : > { %3938 = vmatpush1.bf16.msra.mxu0 %v5353_v13  ;;  %3970 = vmatpush1.bf16.msra.mxu1 %v5439_v33 }
 0x4bb   : > { %3940 = vmatprep.subr.bf16.mxu0 %v5357_v11  ;;  %3972 = vmatprep.subr.bf16.mxu1 %v5443_v6 }
 0x4be   : > { %3942 = vmatpush1.bf16.msra.mxu0 %v5359_v28  ;;  %3974 = vmatpush1.bf16.msra.mxu1 %v5445_v10 }
 0x4bf   : > { %3944 = vmatprep.subr.bf16.mxu0 %v5363_v48  ;;  %3976 = vmatprep.subr.bf16.mxu1 %v5449_v32 }
 0x4c2   : > { %3946 = vmatpush1.bf16.msra.mxu0 %v5365_v8  ;;  %3978 = vmatpush1.bf16.msra.mxu1 %v5451_v60 }
 0x4c3   : > { %3948 = vmatprep.subr.bf16.mxu0 %v5369_v29  ;;  %3980 = vmatprep.subr.bf16.mxu1 %v5455_v24 }
 0x4c6   : > { %3950 = vmatpush1.bf16.msra.mxu0 %v5371_v43  ;;  %3982 = vmatpush1.bf16.msra.mxu1 %v5457_v23 }
 0x4c7   : > { %3952 = vmatprep.subr.bf16.mxu0 %v5374_v21  ;;  %3984 = vmatprep.subr.bf16.mxu1 %v5459_v30 }
 0x4ca   : > { %3954 = vmatpush1.bf16.msra.mxu0 %v5377_v31  ;;  %3986 = vmatpush1.bf16.msra.mxu1 %v5463_v37 }
 0x4cb   : > { %3956 = vmatprep.subr.bf16.mxu0 %v5380_v40  ;;  %3988 = vmatprep.subr.bf16.mxu1 %v5382_v45 }
 0x4ce   : > { %3958 = vmatpush1.bf16.msra.mxu0 %v5388_v55  ;;  %3990 = vmatpush1.bf16.msra.mxu1 %v5384_v53 }
 0x4cf   : > { %3992 = vmatprep.subr.bf16.mxu0 %v5339_v39  ;;  %4024 = vmatprep.subr.bf16.mxu1 %v5425_v38  ;;  %v1369_v39 = vadd.f32 %v1365_v15, %v5266_v4 }
 0x584   : > { %v1504_v57 = vpop.f32.mrb[8].mxu0  ;;  %v1575_v12 = vpop.f32.mrb[8].mxu1 }
 0x585   : > { %v1580_v26 = vadd.f32 %v1504_v57, %v1367_v19  ;;  %v1506_v41 = vpop.f32.mrb[9].mxu0  ;;  %v1577_v51 = vpop.f32.mrb[9].mxu1  ;;  %v1582_v58 = vadd.f32 %v1575_v12, %v1369_v39 }
 0x586   : > { %v1581_v18 = vadd.f32 %v1506_v41, %v1368_v44  ;;  %v1583_v61 = vadd.f32 %v1577_v51, %v1370_v49 }
 0x587   : > { %v3571_v36 = vmul.f32 -1.442695, %v1580_v26  ;;  %v3573_v1 = vmul.f32 -1.442695, %v1582_v58 }
 0x588   : > { %v3572_v56 = vmul.f32 -1.442695, %v1581_v18 }
 0x589   : > { %4528 = vpow2.f32 %v3571_v36 }
 0x58a   : > { %4530 = vpow2.f32 %v3572_v56 }
 0x58b   : > { %4532 = vtanh.f32 %v1583_v61 }
 0x58c   : > { %4534 = vpow2.f32 %v3573_v1 }
 0x593   : > { %v4529_v27 = vpop.eup %4528 }
 0x594   : > { %v1593_v47 = vadd.f32 1.0, %v4529_v27  ;;  %v4531_v50 = vpop.eup %4530 }
 0x595   : > { %v1594_v2 = vadd.f32 1.0, %v4531_v50  ;;  %v4533_v42 = vpop.eup %4532 }
 0x596   : > { %4536 = vrcp.f32 %v1593_v47  ;;  %v4535_v5 = vpop.eup %4534 }
 0x597   : > { %4538 = vrcp.f32 %v1594_v2  ;;  %v1595_v19 = vadd.f32 1.0, %v4535_v5 }
 0x599   : > { %4540 = vrcp.f32 %v1595_v19  ;;  %v2148_v19 = vld [vmem:[#allocation9 + $0xa8] sm:$0xff] }
 0x5a0   : > { %v4537_v7 = vpop.eup %4536 }
 0x5a1   : > { %v1607_v22 = vmul.f32 %v4537_v7, %v4533_v42  ;;  %v4539_v16 = vpop.eup %4538 }
 0x5a2   : > { %v1606_v44 = vmul.f32 %v4539_v16, %v1604_v14 }
 0x5a3   : > { %v4541_v12 = vpop.eup %4540 }
 0x5a4   : > { %v5526_v57 = vadd.f32 %v1607_v22, %v1606_v44 }
 0x5a6   : > { %4542 = vtanh.f32 %v5526_v57  ;;  %v1862_v27 = vrot.slane %v5526_v57, 4  ;;  %v2143_v57 = vld [vmem:[#allocation9 + $0x80] sm:$0xff] }
 0x5b0   : > { %v4543_v26 = vpop.eup %4542 }
 0x5b1   : > { %v1610_v41 = vmul.f32 %v4543_v26, %v4541_v12  ;;  %v2147_v12 = vld [vmem:[#allocation9 + $0xa0] sm:$0xff] }
 0x5b2   : > { %v5605_v26 = vpack.c.bf16 %v2147_v12, %v2143_v57  ;;  %v1873_v57 = vld [vmem:[%s5103_s23 + $0x78] sm:$0xf] }
 0x5b3   : > { %1611 = vst [vmem:[%s5114_s15 + $0x10] sm:$0xf] %v1610_v41  ;;  %1749 = vmatmul.mubr.f32.vlgmr.msra.gmra.mrb[10].mxu0 %v1610_v41  ;;  %1820 = vmatmul.mubr.f32.vlgmr.msra.gmra.mrb[10].mxu1 %v1610_v41  ;;  %v2152_v41 = vld [vmem:[#allocation9 + $0xc8] sm:$0xff]  ;;  %v1877_v12 = vadd.f32 %v1873_v57, %v5270_v25 }
 0x5b4   : > { %3994 = vmatpush1.bf16.msra.mxu0 %v5341_v54  ;;  %4026 = vmatpush1.bf16.msra.mxu1 %v5427_v52  ;;  %v1612_v54 = vld [vmem:[%s5103_s23 + $0x40] sm:$0xf0] }
 0x5b5   : > { %3996 = vmatprep.subr.bf16.mxu0 %v5345_v17  ;;  %4028 = vmatprep.subr.bf16.mxu1 %v5431_v63  ;;  %v1613_v17 = vld [vmem:[%s5103_s23 + $0x48] sm:$0xf0] }
 0x5b6   : > { %2009 = vmatprep.mubr.f32.mxu0 %v4875_v9  ;;  %2080 = vmatprep.mubr.f32.mxu1 %v4875_v9 }
 0x5b8   : > { %3998 = vmatpush1.bf16.msra.mxu0 %v5347_v34  ;;  %4030 = vmatpush1.bf16.msra.mxu1 %v5433_v35  ;;  %v1616_v34 = vadd.f32 %v1612_v54, %v5258_v59  ;;  %v2156_v54 = vld [vmem:[#allocation9 + $0xe8] sm:$0xff] }
 0x5b9   : > { %4000 = vmatprep.subr.bf16.mxu0 %v5351_v3  ;;  %4032 = vmatprep.subr.bf16.mxu1 %v5437_v0 }
 0x5bc   : > { %4002 = vmatpush1.bf16.msra.mxu0 %v5353_v13  ;;  %4034 = vmatpush1.bf16.msra.mxu1 %v5439_v33 }
 0x5bd   : > { %4004 = vmatprep.subr.bf16.mxu0 %v5357_v11  ;;  %4036 = vmatprep.subr.bf16.mxu1 %v5443_v6  ;;  %v1617_v11 = vadd.f32 %v1613_v17, %v5261_v62  ;;  %v5609_v17 = vpack.c.bf16 %v2156_v54, %v2152_v41 }
 0x5c0   : > { %4006 = vmatpush1.bf16.msra.mxu0 %v5359_v28  ;;  %4038 = vmatpush1.bf16.msra.mxu1 %v5445_v10 }
 0x5c1   : > { %4008 = vmatprep.subr.bf16.mxu0 %v5363_v48  ;;  %4040 = vmatprep.subr.bf16.mxu1 %v5449_v32 }
 0x5c4   : > { %4010 = vmatpush1.bf16.msra.mxu0 %v5365_v8  ;;  %4042 = vmatpush1.bf16.msra.mxu1 %v5451_v60 }
 0x5c5   : > { %4012 = vmatprep.subr.bf16.mxu0 %v5369_v29  ;;  %4044 = vmatprep.subr.bf16.mxu1 %v5455_v24 }
 0x5c8   : > { %4014 = vmatpush1.bf16.msra.mxu0 %v5371_v43  ;;  %4046 = vmatpush1.bf16.msra.mxu1 %v5457_v23 }
 0x5c9   : > { %4016 = vmatprep.subr.bf16.mxu0 %v5374_v21  ;;  %4048 = vmatprep.subr.bf16.mxu1 %v5459_v30  ;;  %v1614_v21 = vld [vmem:[%s5103_s23 + $0x50] sm:$0xf0] }
 0x5cc   : > { %4018 = vmatpush1.bf16.msra.mxu0 %v5377_v31  ;;  %4050 = vmatpush1.bf16.msra.mxu1 %v5463_v37 }
 0x5cd   : > { %4020 = vmatprep.subr.bf16.mxu0 %v5380_v40  ;;  %4052 = vmatprep.subr.bf16.mxu1 %v5382_v45 }
 0x5d0   : > { %4022 = vmatpush1.bf16.msra.mxu0 %v5388_v55  ;;  %4054 = vmatpush1.bf16.msra.mxu1 %v5384_v53  ;;  %v1618_v53 = vadd.f32 %v1614_v21, %v5266_v4  ;;  %v2168_v21 = vld [vmem:[#allocation9 + $0x148] sm:$0xff] }
 0x5d1   : > { %4088 = vmatprep.subr.bf16.mxu1 %v5425_v38  ;;  %v1615_v38 = vld [vmem:[%s5103_s23 + $0x58] sm:$0xf0] }
 0x5d2   : > { %v1619_v20 = vadd.f32 %v1615_v38, %v5270_v25  ;;  %v2176_v38 = vld [vmem:[#allocation9 + $0x188] sm:$0xff] }
 0x686   : > { %v1750_v3 = vpop.f32.mrb[10].mxu0  ;;  %v1821_v13 = vpop.f32.mrb[10].mxu1 }
 0x687   : > { %v1830_v28 = vrot.slane %v1750_v3, 4  ;;  %v1752_v48 = vpop.f32.mrb[11].mxu0  ;;  %v1823_v8 = vpop.f32.mrb[11].mxu1  ;;  %v1832_v55 = vrot.slane %v1821_v13, 4  ;;  %v2155_v3 = vld [vmem:[#allocation9 + $0xe0] sm:$0xff] }
 0x688   : > { %v1831_v29 = vrot.slane %v1752_v48, 4  ;;  %v1833_v51 = vrot.slane %v1823_v8, 4  ;;  %v2159_v8 = vld [vmem:[#allocation9 + $0x100] sm:$0xff] }
 0x689   : > { %v1838_v43 = vadd.f32 %v1830_v28, %v1616_v34  ;;  %v1840_v15 = vadd.f32 %v1832_v55, %v1618_v53  ;;  %v2151_v34 = vld [vmem:[#allocation9 + $0xc0] sm:$0xff]  ;;  %v2164_v28 = vld [vmem:[#allocation9 + $0x128] sm:$0xff] }
 0x68a   : > { %v1839_v31 = vadd.f32 %v1831_v29, %v1617_v11  ;;  %v1841_v18 = vadd.f32 %v1833_v51, %v1619_v20  ;;  %v5611_v13 = vpack.c.bf16 %v2155_v3, %v2151_v34  ;;  %v2160_v11 = vld [vmem:[#allocation9 + $0x108] sm:$0xff]  ;;  %v2163_v29 = vld [vmem:[#allocation9 + $0x120] sm:$0xff] }
 0x68b   : > { %v3574_v40 = vmul.f32 -1.442695, %v1838_v43  ;;  %v3576_v36 = vmul.f32 -1.442695, %v1840_v15  ;;  %v5615_v48 = vpack.c.bf16 %v2164_v28, %v2160_v11  ;;  %v5617_v43 = vpack.c.bf16 %v2163_v29, %v2159_v8  ;;  %v2171_v53 = vld [vmem:[#allocation9 + $0x160] sm:$0xff]  ;;  %v2180_v20 = vld [vmem:[#allocation9 + $0x1a8] sm:$0xff] }
 0x68c   : > { %v3575_v45 = vmul.f32 -1.442695, %v1839_v31  ;;  %v2172_v31 = vld [vmem:[#allocation9 + $0x168] sm:$0xff]  ;;  %v2175_v51 = vld [vmem:[#allocation9 + $0x180] sm:$0xff]  ;;  %v5626_v15 = vpack.c.bf16 %v2180_v20, %v2176_v38 }
 0x68d   : > { %4544 = vpow2.f32 %v3574_v40  ;;  %v5621_v40 = vpack.c.bf16 %v2172_v31, %v2168_v21 }
 0x68e   : > { %4546 = vpow2.f32 %v3575_v45  ;;  %v2167_v45 = vld [vmem:[#allocation9 + $0x140] sm:$0xff] }
 0x68f   : > { %4548 = vtanh.f32 %v1841_v18  ;;  %v5623_v55 = vpack.c.bf16 %v2171_v53, %v2167_v45  ;;  %v2179_v18 = vld [vmem:[#allocation9 + $0x1a0] sm:$0xff] }
 0x690   : > { %4550 = vpow2.f32 %v3576_v36  ;;  %v2184_v36 = vld [vmem:[#allocation9 + $0x1c8] sm:$0xff] }
 0x697   : > { %v4545_v56 = vpop.eup %4544 }
 0x698   : > { %v1851_v39 = vadd.f32 1.0, %v4545_v56  ;;  %v4547_v46 = vpop.eup %4546  ;;  %v2188_v56 = vld [vmem:[#allocation9 + $0x1e8] sm:$0xff] }
 0x699   : > { %v1852_v49 = vadd.f32 1.0, %v4547_v46  ;;  %v4549_v58 = vpop.eup %4548  ;;  %v2186_v46 = vld [vmem:[#allocation9 + $0x1d8] sm:$0xff] }
 0x69a   : > { %4552 = vrcp.f32 %v1851_v39  ;;  %v4551_v61 = vpop.eup %4550  ;;  %v5629_v39 = vpack.c.bf16 %v2179_v18, %v2175_v51 }
 0x69b   : > { %4554 = vrcp.f32 %v1852_v49  ;;  %v1853_v2 = vadd.f32 1.0, %v4551_v61  ;;  %v2190_v49 = vld [vmem:[#allocation9 + $0x1f8] sm:$0xff]  ;;  %v5632_v61 = vpack.c.bf16 %v2188_v56, %v2184_v36 }
 0x69d   : > { %4556 = vrcp.f32 %v1853_v2 }
 0x6a4   : > { %v4553_v1 = vpop.eup %4552 }
 0x6a5   : > { %v1865_v47 = vmul.f32 %v4553_v1, %v4549_v58  ;;  %v4555_v50 = vpop.eup %4554  ;;  %v2183_v58 = vld [vmem:[#allocation9 + $0x1c0] sm:$0xff]  ;;  %v5634_v1 = vpack.c.bf16 %v2190_v49, %v2186_v46  ;;  %v2392_v49 = vld [vmem:[#allocation9 + $0x38] sm:$0xff] }
 0x6a6   : > { %v1864_v42 = vmul.f32 %v4555_v50, %v1862_v27  ;;  %v2187_v27 = vld [vmem:[#allocation9 + $0x1e0] sm:$0xff]  ;;  %v2189_v50 = vld [vmem:[#allocation9 + $0x1f0] sm:$0xff] }
 0x6a7   : > { %v4557_v7 = vpop.eup %4556 }
 0x6a8   : > { %v5572_v5 = vadd.f32 %v1865_v47, %v1864_v42  ;;  %v2185_v47 = vld [vmem:[#allocation9 + $0x1d0] sm:$0xff]  ;;  %v5640_v42 = vpack.c.bf16 %v2187_v27, %v2183_v58 }
 0x6a9   : > { %v5636_v2 = vpack.c.bf16 %v2189_v50, %v2185_v47  ;;  %v2387_v27 = vld [vmem:[#allocation9 + $0x10] sm:$0xff] }
 0x6aa   : > { %4558 = vtanh.f32 %v5572_v5  ;;  %v2111_v45 = vrot.slane %v5572_v5, 4  ;;  %v2388_v5 = vld [vmem:[#allocation9 + $0x18] sm:$0xff]  ;;  %v2391_v47 = vld [vmem:[#allocation9 + $0x30] sm:$0xff] }
 0x6ab   : > { %v5677_v58 = vpack.c.bf16 %v2392_v49, %v2388_v5  ;;  %v5679_v50 = vpack.c.bf16 %v2391_v47, %v2387_v27  ;;  %v2439_v5 = vld [vmem:[#allocation9 + $0x1b0] sm:$0xff]  ;;  %v2119_v27 = vld [vmem:[%s5103_s23 + $0x60] sm:$0xf0]  ;;  %v2120_v47 = vld [vmem:[%s5103_s23 + $0x68] sm:$0xf0] }
 0x6b4   : > { %v4559_v14 = vpop.eup %4558 }
 0x6b5   : > { %v1868_v22 = vmul.f32 %v4559_v14, %v4557_v7  ;;  %v1870_v7 = vld [vmem:[%s5103_s23 + $0x60] sm:$0xf]  ;;  %v1871_v14 = vld [vmem:[%s5103_s23 + $0x68] sm:$0xf] }
 0x6b7   : > { %1869 = vst [vmem:[%s5114_s15 + $0x10] sm:$0xf0] %v1868_v22  ;;  %v1943_v16 = vrot.slane %v1868_v22, 4  ;;  %v1874_v22 = vadd.f32 %v1870_v7, %v5258_v59  ;;  %v2396_v7 = vld [vmem:[#allocation9 + $0x58] sm:$0xff] }
 0x6b9   : > { %2010 = vmatmul.mubr.f32.vlgmr.msra.gmra.mrb[12].mxu0 %v1943_v16  ;;  %2081 = vmatmul.mubr.f32.vlgmr.msra.gmra.mrb[12].mxu1 %v1943_v16  ;;  %v1875_v16 = vadd.f32 %v1871_v14, %v5261_v62  ;;  %v2400_v14 = vld [vmem:[#allocation9 + $0x78] sm:$0xff] }
 0x6ba   : > { %4090 = vmatpush1.bf16.msra.mxu1 %v5427_v52  ;;  %2255 = vmatprep.mubr.f32.mxu0 %v4875_v9  ;;  %v2128_v52 = vld [vmem:[#allocation9 + $0x8] sm:$0xff] }
 0x6bb   : > { %4092 = vmatprep.subr.bf16.mxu1 %v5431_v63  ;;  %2326 = vmatprep.mubr.f32.mxu1 %v4875_v9  ;;  %v2132_v63 = vld [vmem:[#allocation9 + $0x28] sm:$0xff] }
 0x6be   : > { %4094 = vmatpush1.bf16.msra.mxu1 %v5433_v35  ;;  %v5591_v35 = vpack.c.bf16 %v2132_v63, %v2128_v52 }
 0x6bf   : > { %4096 = vmatprep.subr.bf16.mxu1 %v5437_v0  ;;  %v2127_v0 = vld [vmem:[#allocation9] sm:$0xff] }
 0x6c0   : > { %4056 = vmatprep.subr.bf16.mxu0 %v5591_v35 }
 0x6c2   : > { %4098 = vmatpush1.bf16.msra.mxu1 %v5439_v33  ;;  %v2131_v33 = vld [vmem:[#allocation9 + $0x20] sm:$0xff] }
 0x6c3   : > { %4100 = vmatprep.subr.bf16.mxu1 %v5443_v6  ;;  %v5593_v6 = vpack.c.bf16 %v2131_v33, %v2127_v0 }
 0x6c5   : > { %4058 = vmatpush1.bf16.msra.mxu0 %v5593_v6 }
 0x6c6   : > { %4102 = vmatpush1.bf16.msra.mxu1 %v5445_v10  ;;  %v2136_v10 = vld [vmem:[#allocation9 + $0x48] sm:$0xff] }
 0x6c7   : > { %4104 = vmatprep.subr.bf16.mxu1 %v5449_v32  ;;  %v2140_v32 = vld [vmem:[#allocation9 + $0x68] sm:$0xff] }
 0x6ca   : > { %4106 = vmatpush1.bf16.msra.mxu1 %v5451_v60  ;;  %v5597_v60 = vpack.c.bf16 %v2140_v32, %v2136_v10  ;;  %v1872_v32 = vld [vmem:[%s5103_s23 + $0x70] sm:$0xf] }
 0x6cb   : > { %4108 = vmatprep.subr.bf16.mxu1 %v5455_v24  ;;  %v2135_v24 = vld [vmem:[#allocation9 + $0x40] sm:$0xff] }
 0x6cc   : > { %4060 = vmatprep.subr.bf16.mxu0 %v5597_v60 }
 0x6ce   : > { %4110 = vmatpush1.bf16.msra.mxu1 %v5457_v23  ;;  %v2139_v23 = vld [vmem:[#allocation9 + $0x60] sm:$0xff] }
 0x6cf   : > { %4112 = vmatprep.subr.bf16.mxu1 %v5459_v30  ;;  %v5599_v30 = vpack.c.bf16 %v2139_v23, %v2135_v24 }
 0x6d1   : > { %4062 = vmatpush1.bf16.msra.mxu0 %v5599_v30 }
 0x6d2   : > { %4114 = vmatpush1.bf16.msra.mxu1 %v5463_v37  ;;  %v2144_v37 = vld [vmem:[#allocation9 + $0x88] sm:$0xff] }
 0x6d3   : > { %v5603_v44 = vpack.c.bf16 %v2148_v19, %v2144_v37  ;;  %4116 = vmatprep.subr.bf16.mxu1 %v5634_v1  ;;  %v1876_v19 = vadd.f32 %v1872_v32, %v5266_v4  ;;  %v2403_v32 = vld [vmem:[#allocation9 + $0x90] sm:$0xff] }
 0x6d5   : > { %4064 = vmatprep.subr.bf16.mxu0 %v5603_v44 }
 0x6d6   : > { %4066 = vmatpush1.bf16.msra.mxu0 %v5605_v26  ;;  %4118 = vmatpush1.bf16.msra.mxu1 %v5636_v2 }
 0x6d7   : > { %4068 = vmatprep.subr.bf16.mxu0 %v5609_v17  ;;  %4152 = vmatprep.subr.bf16.mxu1 %v5677_v58 }
 0x6da   : > { %4070 = vmatpush1.bf16.msra.mxu0 %v5611_v13 }
 0x6db   : > { %4072 = vmatprep.subr.bf16.mxu0 %v5615_v48 }
 0x6de   : > { %4074 = vmatpush1.bf16.msra.mxu0 %v5617_v43 }
 0x6df   : > { %4076 = vmatprep.subr.bf16.mxu0 %v5621_v40 }
 0x6e2   : > { %4078 = vmatpush1.bf16.msra.mxu0 %v5623_v55 }
 0x6e3   : > { %4080 = vmatprep.subr.bf16.mxu0 %v5626_v15 }
 0x6e6   : > { %4082 = vmatpush1.bf16.msra.mxu0 %v5629_v39 }
 0x6e7   : > { %4084 = vmatprep.subr.bf16.mxu0 %v5632_v61 }
 0x6ea   : > { %4086 = vmatpush1.bf16.msra.mxu0 %v5640_v42 }
 0x6eb   : > { %4120 = vmatprep.subr.bf16.mxu0 %v5591_v35 }
 0x78c   : > { %v2011_v52 = vpop.f32.mrb[12].mxu0  ;;  %v2082_v63 = vpop.f32.mrb[12].mxu1 }
 0x78d   : > { %v2087_v0 = vadd.f32 %v2011_v52, %v1874_v22  ;;  %v2013_v33 = vpop.f32.mrb[13].mxu0  ;;  %v2084_v10 = vpop.f32.mrb[13].mxu1  ;;  %v2089_v41 = vadd.f32 %v2082_v63, %v1876_v19  ;;  %v5683_v22 = vpack.c.bf16 %v2400_v14, %v2396_v7  ;;  %v2399_v52 = vld [vmem:[#allocation9 + $0x70] sm:$0xff]  ;;  %v2416_v19 = vld [vmem:[#allocation9 + $0xf8] sm:$0xff]  ;;  %v2123_v7 = vadd.f32 %v2119_v27, %v5258_v59 }
 0x78e   : > { %v2088_v24 = vadd.f32 %v2013_v33, %v1875_v16  ;;  %v2090_v54 = vadd.f32 %v2084_v10, %v1877_v12  ;;  %v2395_v16 = vld [vmem:[#allocation9 + $0x50] sm:$0xff]  ;;  %v2408_v33 = vld [vmem:[#allocation9 + $0xb8] sm:$0xff] }
 0x78f   : > { %v3577_v23 = vmul.f32 -1.442695, %v2087_v0  ;;  %v3579_v34 = vmul.f32 -1.442695, %v2089_v41  ;;  %v5685_v63 = vpack.c.bf16 %v2399_v52, %v2395_v16  ;;  %v2404_v0 = vld [vmem:[#allocation9 + $0x98] sm:$0xff]  ;;  %v2411_v12 = vld [vmem:[#allocation9 + $0xd0] sm:$0xff]  ;;  %v2124_v52 = vadd.f32 %v2120_v47, %v5261_v62 }
 0x790   : > { %v3578_v37 = vmul.f32 -1.442695, %v2088_v24  ;;  %v5689_v10 = vpack.c.bf16 %v2408_v33, %v2404_v0  ;;  %v2407_v24 = vld [vmem:[#allocation9 + $0xb0] sm:$0xff] }
 0x791   : > { %4560 = vpow2.f32 %v3577_v23  ;;  %v5691_v23 = vpack.c.bf16 %v2407_v24, %v2403_v32  ;;  %v2415_v41 = vld [vmem:[#allocation9 + $0xf0] sm:$0xff] }
 0x792   : > { %4562 = vpow2.f32 %v3578_v37  ;;  %v2412_v37 = vld [vmem:[#allocation9 + $0xd8] sm:$0xff] }
 0x793   : > { %4564 = vtanh.f32 %v2090_v54  ;;  %v5695_v57 = vpack.c.bf16 %v2416_v19, %v2412_v37  ;;  %v5697_v54 = vpack.c.bf16 %v2415_v41, %v2411_v12  ;;  %v2121_v19 = vld [vmem:[%s5103_s23 + $0x70] sm:$0xf0] }
 0x794   : > { %4566 = vpow2.f32 %v3579_v34  ;;  %v2420_v34 = vld [vmem:[#allocation9 + $0x118] sm:$0xff] }
 0x79b   : > { %v4561_v3 = vpop.eup %4560 }
 0x79c   : > { %v2100_v11 = vadd.f32 1.0, %v4561_v3  ;;  %v4563_v28 = vpop.eup %4562  ;;  %v2424_v3 = vld [vmem:[#allocation9 + $0x138] sm:$0xff] }
 0x79d   : > { %v2101_v8 = vadd.f32 1.0, %v4563_v28  ;;  %v4565_v29 = vpop.eup %4564  ;;  %v2419_v28 = vld [vmem:[#allocation9 + $0x110] sm:$0xff] }
 0x79e   : > { %4568 = vrcp.f32 %v2100_v11  ;;  %v4567_v21 = vpop.eup %4566  ;;  %v5701_v11 = vpack.c.bf16 %v2424_v3, %v2420_v34  ;;  %v2125_v3 = vadd.f32 %v2121_v19, %v5266_v4 }
 0x79f   : > { %4570 = vrcp.f32 %v2101_v8  ;;  %v2102_v20 = vadd.f32 1.0, %v4567_v21  ;;  %v2423_v8 = vld [vmem:[#allocation9 + $0x130] sm:$0xff]  ;;  %v2428_v21 = vld [vmem:[#allocation9 + $0x158] sm:$0xff] }
 0x7a1   : > { %4572 = vrcp.f32 %v2102_v20  ;;  %v2436_v20 = vld [vmem:[#allocation9 + $0x198] sm:$0xff] }
 0x7a8   : > { %v4569_v31 = vpop.eup %4568 }
 0x7a9   : > { %v2114_v53 = vmul.f32 %v4569_v31, %v4565_v29  ;;  %v4571_v38 = vpop.eup %4570  ;;  %v5703_v29 = vpack.c.bf16 %v2423_v8, %v2419_v28  ;;  %v2432_v31 = vld [vmem:[#allocation9 + $0x178] sm:$0xff] }
 0x7aa   : > { %v2113_v51 = vmul.f32 %v4571_v38, %v2111_v45  ;;  %v2427_v45 = vld [vmem:[#allocation9 + $0x150] sm:$0xff]  ;;  %v2122_v8 = vld [vmem:[%s5103_s23 + $0x78] sm:$0xf0] }
 0x7ab   : > { %v4573_v36 = vpop.eup %4572  ;;  %v2431_v38 = vld [vmem:[#allocation9 + $0x170] sm:$0xff] }
 0x7ac   : > { %v5655_v18 = vadd.f32 %v2114_v53, %v2113_v51  ;;  %v5707_v53 = vpack.c.bf16 %v2432_v31, %v2428_v21  ;;  %v2440_v51 = vld [vmem:[#allocation9 + $0x1b8] sm:$0xff]  ;;  %v2126_v21 = vadd.f32 %v2122_v8, %v5270_v25 }
 0x7ae   : > { %4574 = vtanh.f32 %v5655_v18 }
 0x7b8   : > { %v4575_v56 = vpop.eup %4574 }
 0x7b9   : > { %v2117_v46 = vmul.f32 %v4575_v56, %v4573_v36  ;;  %v5709_v36 = vpack.c.bf16 %v2431_v38, %v2427_v45  ;;  %v5711_v56 = vpack.c.bf16 %v2440_v51, %v2436_v20 }
 0x7bb   : > { %2118 = vst [vmem:[%s5114_s15 + $0x18] sm:$0xf] %v2117_v46  ;;  %2256 = vmatmul.mubr.f32.vlgmr.msra.gmra.mrb[14].mxu0 %v2117_v46  ;;  %2327 = vmatmul.mubr.f32.vlgmr.msra.gmra.mrb[14].mxu1 %v2117_v46  ;;  %v2435_v46 = vld [vmem:[#allocation9 + $0x190] sm:$0xff] }
 0x7bc   : > { %4122 = vmatpush1.bf16.msra.mxu0 %v5593_v6  ;;  %2516 = vmatprep.mubr.f32.mxu0 %v4875_v9  ;;  %v5715_v49 = vpack.c.bf16 %v2439_v5, %v2435_v46 }
 0x7bd   : > { %4124 = vmatprep.subr.bf16.mxu0 %v5597_v60  ;;  %2587 = vmatprep.mubr.f32.mxu1 %v4875_v9 }
 0x7be   : > { %4154 = vmatpush1.bf16.msra.mxu1 %v5679_v50 }
 0x7bf   : > { %4156 = vmatprep.subr.bf16.mxu1 %v5683_v22 }
 0x7c0   : > { %4126 = vmatpush1.bf16.msra.mxu0 %v5599_v30 }
 0x7c1   : > { %4128 = vmatprep.subr.bf16.mxu0 %v5603_v44 }
 0x7c2   : > { %4158 = vmatpush1.bf16.msra.mxu1 %v5685_v63 }
 0x7c3   : > { %4160 = vmatprep.subr.bf16.mxu1 %v5689_v10 }
 0x7c4   : > { %4130 = vmatpush1.bf16.msra.mxu0 %v5605_v26 }
 0x7c5   : > { %4132 = vmatprep.subr.bf16.mxu0 %v5609_v17 }
 0x7c6   : > { %4162 = vmatpush1.bf16.msra.mxu1 %v5691_v23 }
 0x7c7   : > { %4164 = vmatprep.subr.bf16.mxu1 %v5695_v57 }
 0x7c8   : > { %4134 = vmatpush1.bf16.msra.mxu0 %v5611_v13 }
 0x7c9   : > { %4136 = vmatprep.subr.bf16.mxu0 %v5615_v48 }
 0x7ca   : > { %4166 = vmatpush1.bf16.msra.mxu1 %v5697_v54 }
 0x7cb   : > { %4168 = vmatprep.subr.bf16.mxu1 %v5701_v11 }
 0x7cc   : > { %4138 = vmatpush1.bf16.msra.mxu0 %v5617_v43 }
 0x7cd   : > { %4140 = vmatprep.subr.bf16.mxu0 %v5621_v40 }
 0x7ce   : > { %4170 = vmatpush1.bf16.msra.mxu1 %v5703_v29 }
 0x7cf   : > { %4172 = vmatprep.subr.bf16.mxu1 %v5707_v53 }
 0x7d0   : > { %4142 = vmatpush1.bf16.msra.mxu0 %v5623_v55 }
 0x7d1   : > { %4144 = vmatprep.subr.bf16.mxu0 %v5626_v15 }
 0x7d2   : > { %4174 = vmatpush1.bf16.msra.mxu1 %v5709_v36 }
 0x7d3   : > { %4176 = vmatprep.subr.bf16.mxu1 %v5711_v56 }
 0x7d4   : > { %4146 = vmatpush1.bf16.msra.mxu0 %v5629_v39 }
 0x7d5   : > { %4148 = vmatprep.subr.bf16.mxu0 %v5632_v61 }
 0x7d6   : > { %4178 = vmatpush1.bf16.msra.mxu1 %v5715_v49 }
 0x7d7   : > { %4180 = vmatprep.subr.bf16.mxu1 %v5634_v1 }
 0x7d8   : > { %4150 = vmatpush1.bf16.msra.mxu0 %v5640_v42 }
 0x7d9   : > { %4184 = vmatprep.subr.bf16.mxu0 %v5591_v35 }
 0x7da   : > { %4182 = vmatpush1.bf16.msra.mxu1 %v5636_v2 }
 0x7db   : > { %4216 = vmatprep.subr.bf16.mxu1 %v5677_v58 }
 0x88e   : > { %v2257_v14 = vpop.f32.mrb[14].mxu0  ;;  %v2328_v16 = vpop.f32.mrb[14].mxu1 }
 0x88f   : > { %v2337_v0 = vrot.slane %v2257_v14, 4  ;;  %v2259_v33 = vpop.f32.mrb[15].mxu0  ;;  %v2330_v32 = vpop.f32.mrb[15].mxu1  ;;  %v2339_v28 = vrot.slane %v2328_v16, 4  ;;  %v2369_v16 = vrot.slane %v5655_v18, 4 }
 0x890   : > { %v2338_v24 = vrot.slane %v2259_v33, 4  ;;  %v2340_v31 = vrot.slane %v2330_v32, 4  ;;  %v2377_v18 = vld [vmem:[%s5103_s23 + $0x80] sm:$0xf] }
 0x891   : > { %v2345_v37 = vadd.f32 %v2337_v0, %v2123_v7  ;;  %v2347_v45 = vadd.f32 %v2339_v28, %v2125_v3  ;;  %v2381_v3 = vadd.f32 %v2377_v18, %v5258_v59 }
 0x892   : > { %v2346_v12 = vadd.f32 %v2338_v24, %v2124_v52  ;;  %v2348_v38 = vadd.f32 %v2340_v31, %v2126_v21 }
 0x893   : > { %v3580_v41 = vmul.f32 -1.442695, %v2345_v37  ;;  %v3582_v20 = vmul.f32 -1.442695, %v2347_v45 }
 0x894   : > { %v3581_v34 = vmul.f32 -1.442695, %v2346_v12 }
 0x895   : > { %4576 = vpow2.f32 %v3580_v41 }
 0x896   : > { %4578 = vpow2.f32 %v3581_v34  ;;  %v2378_v34 = vld [vmem:[%s5103_s23 + $0x88] sm:$0xf] }
 0x897   : > { %4580 = vtanh.f32 %v2348_v38  ;;  %v2382_v28 = vadd.f32 %v2378_v34, %v5261_v62 }
 0x898   : > { %4582 = vpow2.f32 %v3582_v20  ;;  %v2379_v20 = vld [vmem:[%s5103_s23 + $0x90] sm:$0xf] }
 0x89f   : > { %v4577_v51 = vpop.eup %4576 }
 0x8a0   : > { %v2358_v46 = vadd.f32 1.0, %v4577_v51  ;;  %v4579_v5 = vpop.eup %4578 }
 0x8a1   : > { %v2359_v27 = vadd.f32 1.0, %v4579_v5  ;;  %v4581_v47 = vpop.eup %4580 }
 0x8a2   : > { %4584 = vrcp.f32 %v2358_v46  ;;  %v4583_v7 = vpop.eup %4582 }
 0x8a3   : > { %4586 = vrcp.f32 %v2359_v27  ;;  %v2360_v33 = vadd.f32 1.0, %v4583_v7  ;;  %v2380_v27 = vld [vmem:[%s5103_s23 + $0x98] sm:$0xf] }
 0x8a5   : > { %4588 = vrcp.f32 %v2360_v33 }
 0x8ac   : > { %v4585_v14 = vpop.eup %4584 }
 0x8ad   : > { %v2372_v52 = vmul.f32 %v4585_v14, %v4581_v47  ;;  %v4587_v0 = vpop.eup %4586  ;;  %v2384_v47 = vadd.f32 %v2380_v27, %v5270_v25 }
 0x8ae   : > { %v2371_v32 = vmul.f32 %v4587_v0, %v2369_v16 }
 0x8af   : > { %v4589_v37 = vpop.eup %4588 }
 0x8b0   : > { %v5731_v24 = vadd.f32 %v2372_v52, %v2371_v32 }
 0x8b2   : > { %4590 = vtanh.f32 %v5731_v24 }
 0x8bc   : > { %v4591_v19 = vpop.eup %4590 }
 0x8bd   : > { %v2375_v12 = vmul.f32 %v4591_v19, %v4589_v37 }
 0x8bf   : > { %2376 = vst [vmem:[%s5114_s15 + $0x18] sm:$0xf0] %v2375_v12  ;;  %v2450_v41 = vrot.slane %v2375_v12, 4 }
 0x8c1   : > { %2517 = vmatmul.mubr.f32.vlgmr.msra.gmra.mrb[16].mxu0 %v2450_v41  ;;  %2588 = vmatmul.mubr.f32.vlgmr.msra.gmra.mrb[16].mxu1 %v2450_v41  ;;  %v2618_v41 = vrot.slane %v5731_v24, 4 }
 0x8c2   : > { %4186 = vmatpush1.bf16.msra.mxu0 %v5593_v6  ;;  %4218 = vmatpush1.bf16.msra.mxu1 %v5679_v50 }
 0x8c3   : > { %4188 = vmatprep.subr.bf16.mxu0 %v5597_v60  ;;  %4220 = vmatprep.subr.bf16.mxu1 %v5683_v22 }
 0x8c4   : > { %2762 = vmatprep.mubr.f32.mxu0 %v4875_v9  ;;  %2833 = vmatprep.mubr.f32.mxu1 %v4875_v9 }
 0x8c6   : > { %4190 = vmatpush1.bf16.msra.mxu0 %v5599_v30  ;;  %4222 = vmatpush1.bf16.msra.mxu1 %v5685_v63 }
 0x8c7   : > { %4192 = vmatprep.subr.bf16.mxu0 %v5603_v44  ;;  %4224 = vmatprep.subr.bf16.mxu1 %v5689_v10 }
 0x8ca   : > { %4194 = vmatpush1.bf16.msra.mxu0 %v5605_v26  ;;  %4226 = vmatpush1.bf16.msra.mxu1 %v5691_v23 }
 0x8cb   : > { %4196 = vmatprep.subr.bf16.mxu0 %v5609_v17  ;;  %4228 = vmatprep.subr.bf16.mxu1 %v5695_v57 }
 0x8ce   : > { %4198 = vmatpush1.bf16.msra.mxu0 %v5611_v13  ;;  %4230 = vmatpush1.bf16.msra.mxu1 %v5697_v54 }
 0x8cf   : > { %4200 = vmatprep.subr.bf16.mxu0 %v5615_v48  ;;  %4232 = vmatprep.subr.bf16.mxu1 %v5701_v11 }
 0x8d2   : > { %4202 = vmatpush1.bf16.msra.mxu0 %v5617_v43  ;;  %4234 = vmatpush1.bf16.msra.mxu1 %v5703_v29 }
 0x8d3   : > { %4204 = vmatprep.subr.bf16.mxu0 %v5621_v40  ;;  %4236 = vmatprep.subr.bf16.mxu1 %v5707_v53 }
 0x8d6   : > { %4206 = vmatpush1.bf16.msra.mxu0 %v5623_v55  ;;  %4238 = vmatpush1.bf16.msra.mxu1 %v5709_v36 }
 0x8d7   : > { %4208 = vmatprep.subr.bf16.mxu0 %v5626_v15  ;;  %4240 = vmatprep.subr.bf16.mxu1 %v5711_v56 }
 0x8da   : > { %4210 = vmatpush1.bf16.msra.mxu0 %v5629_v39  ;;  %4242 = vmatpush1.bf16.msra.mxu1 %v5715_v49 }
 0x8db   : > { %4212 = vmatprep.subr.bf16.mxu0 %v5632_v61  ;;  %4244 = vmatprep.subr.bf16.mxu1 %v5634_v1 }
 0x8de   : > { %4214 = vmatpush1.bf16.msra.mxu0 %v5640_v42  ;;  %4246 = vmatpush1.bf16.msra.mxu1 %v5636_v2 }
 0x8df   : > { %4248 = vmatprep.subr.bf16.mxu0 %v5591_v35  ;;  %4280 = vmatprep.subr.bf16.mxu1 %v5677_v58  ;;  %v2383_v35 = vadd.f32 %v2379_v20, %v5266_v4 }
 0x994   : > { %v2518_v8 = vpop.f32.mrb[16].mxu0  ;;  %v2589_v21 = vpop.f32.mrb[16].mxu1 }
 0x995   : > { %v2594_v31 = vadd.f32 %v2518_v8, %v2381_v3  ;;  %v2520_v45 = vpop.f32.mrb[17].mxu0  ;;  %v2591_v38 = vpop.f32.mrb[17].mxu1  ;;  %v2596_v7 = vadd.f32 %v2589_v21, %v2383_v35 }
 0x996   : > { %v2595_v51 = vadd.f32 %v2520_v45, %v2382_v28  ;;  %v2597_v14 = vadd.f32 %v2591_v38, %v2384_v47 }
 0x997   : > { %v3583_v46 = vmul.f32 -1.442695, %v2594_v31  ;;  %v3585_v16 = vmul.f32 -1.442695, %v2596_v7 }
 0x998   : > { %v3584_v5 = vmul.f32 -1.442695, %v2595_v51 }
 0x999   : > { %4592 = vpow2.f32 %v3583_v46 }
 0x99a   : > { %4594 = vpow2.f32 %v3584_v5 }
 0x99b   : > { %4596 = vtanh.f32 %v2597_v14 }
 0x99c   : > { %4598 = vpow2.f32 %v3585_v16 }
 0x9a3   : > { %v4593_v52 = vpop.eup %4592 }
 0x9a4   : > { %v2607_v0 = vadd.f32 1.0, %v4593_v52  ;;  %v4595_v33 = vpop.eup %4594 }
 0x9a5   : > { %v2608_v32 = vadd.f32 1.0, %v4595_v33  ;;  %v4597_v37 = vpop.eup %4596 }
 0x9a6   : > { %4600 = vrcp.f32 %v2607_v0  ;;  %v4599_v19 = vpop.eup %4598 }
 0x9a7   : > { %4602 = vrcp.f32 %v2608_v32  ;;  %v2609_v3 = vadd.f32 1.0, %v4599_v19 }
 0x9a9   : > { %4604 = vrcp.f32 %v2609_v3  ;;  %v3153_v3 = vld [vmem:[#allocation9 + $0x60] sm:$0xff] }
 0x9b0   : > { %v4601_v12 = vpop.eup %4600 }
 0x9b1   : > { %v2621_v18 = vmul.f32 %v4601_v12, %v4597_v37  ;;  %v4603_v34 = vpop.eup %4602 }
 0x9b2   : > { %v2620_v28 = vmul.f32 %v4603_v34, %v2618_v41 }
 0x9b3   : > { %v4605_v21 = vpop.eup %4604 }
 0x9b4   : > { %v5778_v8 = vadd.f32 %v2621_v18, %v2620_v28 }
 0x9b6   : > { %4606 = vtanh.f32 %v5778_v8  ;;  %v2876_v52 = vrot.slane %v5778_v8, 4  ;;  %v3161_v8 = vld [vmem:[#allocation9 + $0xa0] sm:$0xff] }
 0x9c0   : > { %v4607_v31 = vpop.eup %4606 }
 0x9c1   : > { %v2624_v45 = vmul.f32 %v4607_v31, %v4605_v21  ;;  %v3166_v31 = vld [vmem:[#allocation9 + $0xc8] sm:$0xff] }
 0x9c3   : > { %2625 = vst [vmem:[%s5114_s15 + $0x20] sm:$0xf] %v2624_v45  ;;  %2763 = vmatmul.mubr.f32.vlgmr.msra.gmra.mrb[18].mxu0 %v2624_v45  ;;  %2834 = vmatmul.mubr.f32.vlgmr.msra.gmra.mrb[18].mxu1 %v2624_v45  ;;  %v3170_v45 = vld [vmem:[#allocation9 + $0xe8] sm:$0xff] }
 0x9c4   : > { %4250 = vmatpush1.bf16.msra.mxu0 %v5593_v6  ;;  %4282 = vmatpush1.bf16.msra.mxu1 %v5679_v50  ;;  %v2626_v6 = vld [vmem:[%s5103_s23 + $0x80] sm:$0xf0] }
 0x9c5   : > { %4252 = vmatprep.subr.bf16.mxu0 %v5597_v60  ;;  %4284 = vmatprep.subr.bf16.mxu1 %v5683_v22  ;;  %v2627_v60 = vld [vmem:[%s5103_s23 + $0x88] sm:$0xf0] }
 0x9c6   : > { %3023 = vmatprep.mubr.f32.mxu0 %v4875_v9  ;;  %3094 = vmatprep.mubr.f32.mxu1 %v4875_v9 }
 0x9c8   : > { %4254 = vmatpush1.bf16.msra.mxu0 %v5599_v30  ;;  %4286 = vmatpush1.bf16.msra.mxu1 %v5685_v63  ;;  %v2630_v30 = vadd.f32 %v2626_v6, %v5258_v59  ;;  %v4323_v6 = vpack.c.bf16 %v3170_v45, %v3166_v31 }
 0x9c9   : > { %4256 = vmatprep.subr.bf16.mxu0 %v5603_v44  ;;  %4288 = vmatprep.subr.bf16.mxu1 %v5689_v10 }
 0x9cc   : > { %4258 = vmatpush1.bf16.msra.mxu0 %v5605_v26  ;;  %4290 = vmatpush1.bf16.msra.mxu1 %v5691_v23 }
 0x9cd   : > { %4260 = vmatprep.subr.bf16.mxu0 %v5609_v17  ;;  %4292 = vmatprep.subr.bf16.mxu1 %v5695_v57  ;;  %v2631_v17 = vadd.f32 %v2627_v60, %v5261_v62  ;;  %v3165_v60 = vld [vmem:[#allocation9 + $0xc0] sm:$0xff] }
 0x9d0   : > { %4262 = vmatpush1.bf16.msra.mxu0 %v5611_v13  ;;  %4294 = vmatpush1.bf16.msra.mxu1 %v5697_v54 }
 0x9d1   : > { %4264 = vmatprep.subr.bf16.mxu0 %v5615_v48  ;;  %4296 = vmatprep.subr.bf16.mxu1 %v5701_v11 }
 0x9d4   : > { %4266 = vmatpush1.bf16.msra.mxu0 %v5617_v43  ;;  %4298 = vmatpush1.bf16.msra.mxu1 %v5703_v29 }
 0x9d5   : > { %4268 = vmatprep.subr.bf16.mxu0 %v5621_v40  ;;  %4300 = vmatprep.subr.bf16.mxu1 %v5707_v53 }
 0x9d8   : > { %4270 = vmatpush1.bf16.msra.mxu0 %v5623_v55  ;;  %4302 = vmatpush1.bf16.msra.mxu1 %v5709_v36 }
 0x9d9   : > { %4272 = vmatprep.subr.bf16.mxu0 %v5626_v15  ;;  %4304 = vmatprep.subr.bf16.mxu1 %v5711_v56  ;;  %v2628_v15 = vld [vmem:[%s5103_s23 + $0x90] sm:$0xf0] }
 0x9dc   : > { %4274 = vmatpush1.bf16.msra.mxu0 %v5629_v39  ;;  %4306 = vmatpush1.bf16.msra.mxu1 %v5715_v49 }
 0x9dd   : > { %4276 = vmatprep.subr.bf16.mxu0 %v5632_v61  ;;  %4308 = vmatprep.subr.bf16.mxu1 %v5634_v1 }
 0x9e0   : > { %4278 = vmatpush1.bf16.msra.mxu0 %v5640_v42  ;;  %4310 = vmatpush1.bf16.msra.mxu1 %v5636_v2  ;;  %v2632_v2 = vadd.f32 %v2628_v15, %v5266_v4  ;;  %v3186_v15 = vld [vmem:[#allocation9 + $0x168] sm:$0xff] }
 0x9e1   : > { %4344 = vmatprep.subr.bf16.mxu1 %v5677_v58  ;;  %v2629_v58 = vld [vmem:[%s5103_s23 + $0x98] sm:$0xf0] }
 0x9e2   : > { %v2633_v24 = vadd.f32 %v2629_v58, %v5270_v25  ;;  %v3194_v58 = vld [vmem:[#allocation9 + $0x1a8] sm:$0xff] }
 0xa96   : > { %v2764_v44 = vpop.f32.mrb[18].mxu0  ;;  %v2835_v26 = vpop.f32.mrb[18].mxu1 }
 0xa97   : > { %v2844_v13 = vrot.slane %v2764_v44, 4  ;;  %v2766_v48 = vpop.f32.mrb[19].mxu0  ;;  %v2837_v43 = vpop.f32.mrb[19].mxu1  ;;  %v2846_v42 = vrot.slane %v2835_v26, 4  ;;  %v3174_v26 = vld [vmem:[#allocation9 + $0x108] sm:$0xff] }
 0xa98   : > { %v2845_v40 = vrot.slane %v2766_v48, 4  ;;  %v2847_v38 = vrot.slane %v2837_v43, 4  ;;  %v3173_v48 = vld [vmem:[#allocation9 + $0x100] sm:$0xff] }
 0xa99   : > { %v2852_v55 = vadd.f32 %v2844_v13, %v2630_v30  ;;  %v2854_v20 = vadd.f32 %v2846_v42, %v2632_v2  ;;  %v3169_v30 = vld [vmem:[#allocation9 + $0xe0] sm:$0xff]  ;;  %v3190_v42 = vld [vmem:[#allocation9 + $0x188] sm:$0xff] }
 0xa9a   : > { %v2853_v39 = vadd.f32 %v2845_v40, %v2631_v17  ;;  %v2855_v51 = vadd.f32 %v2847_v38, %v2633_v24  ;;  %v4325_v44 = vpack.c.bf16 %v3169_v30, %v3165_v60  ;;  %v3178_v17 = vld [vmem:[#allocation9 + $0x128] sm:$0xff]  ;;  %v3177_v43 = vld [vmem:[#allocation9 + $0x120] sm:$0xff]  ;;  %v4335_v38 = vpack.c.bf16 %v3194_v58, %v3190_v42 }
 0xa9b   : > { %v3586_v61 = vmul.f32 -1.442695, %v2852_v55  ;;  %v3588_v46 = vmul.f32 -1.442695, %v2854_v20  ;;  %v4327_v13 = vpack.c.bf16 %v3178_v17, %v3174_v26  ;;  %v4329_v40 = vpack.c.bf16 %v3177_v43, %v3173_v48  ;;  %v3182_v55 = vld [vmem:[#allocation9 + $0x148] sm:$0xff]  ;;  %v3189_v24 = vld [vmem:[#allocation9 + $0x180] sm:$0xff] }
 0xa9c   : > { %v3587_v1 = vmul.f32 -1.442695, %v2853_v39  ;;  %v4331_v39 = vpack.c.bf16 %v3186_v15, %v3182_v55  ;;  %v3193_v20 = vld [vmem:[#allocation9 + $0x1a0] sm:$0xff]  ;;  %v3134_v15 = vld [vmem:[%s5103_s23 + $0xa8] sm:$0xf0] }
 0xa9d   : > { %4608 = vpow2.f32 %v3586_v61  ;;  %v3181_v61 = vld [vmem:[#allocation9 + $0x140] sm:$0xff] }
 0xa9e   : > { %4610 = vpow2.f32 %v3587_v1  ;;  %v3185_v1 = vld [vmem:[#allocation9 + $0x160] sm:$0xff] }
 0xa9f   : > { %4612 = vtanh.f32 %v2855_v51  ;;  %v4333_v2 = vpack.c.bf16 %v3185_v1, %v3181_v61  ;;  %v3198_v51 = vld [vmem:[#allocation9 + $0x1c8] sm:$0xff]  ;;  %v3133_v55 = vld [vmem:[%s5103_s23 + $0xa0] sm:$0xf0]  ;;  %v3138_v1 = vadd.f32 %v3134_v15, %v5261_v62 }
 0xaa0   : > { %4614 = vpow2.f32 %v3588_v46  ;;  %v3202_v46 = vld [vmem:[#allocation9 + $0x1e8] sm:$0xff] }
 0xaa7   : > { %v4609_v5 = vpop.eup %4608 }
 0xaa8   : > { %v2865_v35 = vadd.f32 1.0, %v4609_v5  ;;  %v4611_v27 = vpop.eup %4610  ;;  %v4337_v5 = vpack.c.bf16 %v3193_v20, %v3189_v24  ;;  %v3135_v20 = vld [vmem:[%s5103_s23 + $0xb0] sm:$0xf0] }
 0xaa9   : > { %v2866_v47 = vadd.f32 1.0, %v4611_v27  ;;  %v4613_v7 = vpop.eup %4612  ;;  %v3204_v27 = vld [vmem:[#allocation9 + $0x1f8] sm:$0xff] }
 0xaaa   : > { %4616 = vrcp.f32 %v2865_v35  ;;  %v4615_v14 = vpop.eup %4614  ;;  %v3200_v35 = vld [vmem:[#allocation9 + $0x1d8] sm:$0xff] }
 0xaab   : > { %4618 = vrcp.f32 %v2866_v47  ;;  %v2867_v32 = vadd.f32 1.0, %v4615_v14  ;;  %v3197_v47 = vld [vmem:[#allocation9 + $0x1c0] sm:$0xff]  ;;  %v4371_v14 = vpack.c.bf16 %v3204_v27, %v3200_v35  ;;  %v3139_v35 = vadd.f32 %v3135_v20, %v5266_v4 }
 0xaad   : > { %4620 = vrcp.f32 %v2867_v32 }
 0xab4   : > { %v4617_v16 = vpop.eup %4616 }
 0xab5   : > { %v2879_v0 = vmul.f32 %v4617_v16, %v4613_v7  ;;  %v4619_v33 = vpop.eup %4618  ;;  %v4339_v7 = vpack.c.bf16 %v3202_v46, %v3198_v51  ;;  %v3201_v16 = vld [vmem:[#allocation9 + $0x1e0] sm:$0xff] }
 0xab6   : > { %v2878_v37 = vmul.f32 %v4619_v33, %v2876_v52  ;;  %v3199_v52 = vld [vmem:[#allocation9 + $0x1d0] sm:$0xff]  ;;  %v4341_v32 = vpack.c.bf16 %v3201_v16, %v3197_v47  ;;  %v3136_v47 = vld [vmem:[%s5103_s23 + $0xb8] sm:$0xf0] }
 0xab7   : > { %v4621_v12 = vpop.eup %4620 }
 0xab8   : > { %v5824_v19 = vadd.f32 %v2879_v0, %v2878_v37  ;;  %v3203_v0 = vld [vmem:[#allocation9 + $0x1f0] sm:$0xff]  ;;  %v2884_v37 = vld [vmem:[%s5103_s23 + $0xa0] sm:$0xf] }
 0xab9   : > { %v4373_v33 = vpack.c.bf16 %v3203_v0, %v3199_v52 }
 0xaba   : > { %4622 = vtanh.f32 %v5824_v19  ;;  %v3125_v60 = vrot.slane %v5824_v19, 4 }
 0xac4   : > { %v4623_v41 = vpop.eup %4622 }
 0xac5   : > { %v2882_v18 = vmul.f32 %v4623_v41, %v4621_v12  ;;  %v2885_v12 = vld [vmem:[%s5103_s23 + $0xa8] sm:$0xf]  ;;  %v2888_v41 = vadd.f32 %v2884_v37, %v5258_v59 }
 0xac7   : > { %2883 = vst [vmem:[%s5114_s15 + $0x20] sm:$0xf0] %v2882_v18  ;;  %v2957_v34 = vrot.slane %v2882_v18, 4  ;;  %v2889_v18 = vadd.f32 %v2885_v12, %v5261_v62 }
 0xac9   : > { %3024 = vmatmul.mubr.f32.vlgmr.msra.gmra.mrb[20].mxu0 %v2957_v34  ;;  %3095 = vmatmul.mubr.f32.vlgmr.msra.gmra.mrb[20].mxu1 %v2957_v34 }
 0xaca   : > { %4346 = vmatpush1.bf16.msra.mxu1 %v5679_v50  ;;  %3269 = vmatprep.mubr.f32.mxu0 %v4875_v9  ;;  %v3146_v50 = vld [vmem:[#allocation9 + $0x28] sm:$0xff] }
 0xacb   : > { %4348 = vmatprep.subr.bf16.mxu1 %v5683_v22  ;;  %3340 = vmatprep.mubr.f32.mxu1 %v4875_v9  ;;  %v3142_v9 = vld [vmem:[#allocation9 + $0x8] sm:$0xff] }
 0xacc   : > { %v4311_v22 = vpack.c.bf16 %v3146_v50, %v3142_v9 }
 0xace   : > { %4350 = vmatpush1.bf16.msra.mxu1 %v5685_v63  ;;  %v3141_v63 = vld [vmem:[#allocation9] sm:$0xff]  ;;  %4312 = vmatprep.subr.bf16.mxu0 %v4311_v22 }
 0xacf   : > { %4352 = vmatprep.subr.bf16.mxu1 %v5689_v10  ;;  %v3145_v10 = vld [vmem:[#allocation9 + $0x20] sm:$0xff] }
 0xad2   : > { %4354 = vmatpush1.bf16.msra.mxu1 %v5691_v23  ;;  %v4313_v23 = vpack.c.bf16 %v3145_v10, %v3141_v63  ;;  %v2886_v10 = vld [vmem:[%s5103_s23 + $0xb0] sm:$0xf] }
 0xad3   : > { %4356 = vmatprep.subr.bf16.mxu1 %v5695_v57  ;;  %v3150_v57 = vld [vmem:[#allocation9 + $0x48] sm:$0xff] }
 0xad4   : > { %4314 = vmatpush1.bf16.msra.mxu0 %v4313_v23 }
 0xad6   : > { %4358 = vmatpush1.bf16.msra.mxu1 %v5697_v54  ;;  %v3154_v54 = vld [vmem:[#allocation9 + $0x68] sm:$0xff] }
 0xad7   : > { %4360 = vmatprep.subr.bf16.mxu1 %v5701_v11  ;;  %v4315_v11 = vpack.c.bf16 %v3154_v54, %v3150_v57 }
 0xad9   : > { %4316 = vmatprep.subr.bf16.mxu0 %v4315_v11  ;;  %v2890_v11 = vadd.f32 %v2886_v10, %v5266_v4 }
 0xada   : > { %4362 = vmatpush1.bf16.msra.mxu1 %v5703_v29  ;;  %v3149_v29 = vld [vmem:[#allocation9 + $0x40] sm:$0xff] }
 0xadb   : > { %4364 = vmatprep.subr.bf16.mxu1 %v5707_v53  ;;  %v4317_v53 = vpack.c.bf16 %v3153_v3, %v3149_v29  ;;  %v2887_v29 = vld [vmem:[%s5103_s23 + $0xb8] sm:$0xf] }
 0xadc   : > { %v2891_v3 = vadd.f32 %v2887_v29, %v5270_v25 }
 0xadd   : > { %4318 = vmatpush1.bf16.msra.mxu0 %v4317_v53 }
 0xade   : > { %4366 = vmatpush1.bf16.msra.mxu1 %v5709_v36  ;;  %v3158_v36 = vld [vmem:[#allocation9 + $0x88] sm:$0xff] }
 0xadf   : > { %4368 = vmatprep.subr.bf16.mxu1 %v5711_v56  ;;  %v3162_v56 = vld [vmem:[#allocation9 + $0xa8] sm:$0xff] }
 0xae0   : > { %v4319_v28 = vpack.c.bf16 %v3162_v56, %v3158_v36 }
 0xae2   : > { %4370 = vmatpush1.bf16.msra.mxu1 %v5715_v49  ;;  %v3157_v49 = vld [vmem:[#allocation9 + $0x80] sm:$0xff]  ;;  %4320 = vmatprep.subr.bf16.mxu0 %v4319_v28 }
 0xae3   : > { %v4321_v21 = vpack.c.bf16 %v3161_v8, %v3157_v49  ;;  %4372 = vmatprep.subr.bf16.mxu1 %v4371_v14 }
 0xae5   : > { %4322 = vmatpush1.bf16.msra.mxu0 %v4321_v21 }
 0xae6   : > { %4324 = vmatprep.subr.bf16.mxu0 %v4323_v6  ;;  %4374 = vmatpush1.bf16.msra.mxu1 %v4373_v33 }
 0xae9   : > { %4326 = vmatpush1.bf16.msra.mxu0 %v4325_v44 }
 0xaea   : > { %4328 = vmatprep.subr.bf16.mxu0 %v4327_v13 }
 0xaed   : > { %4330 = vmatpush1.bf16.msra.mxu0 %v4329_v40 }
 0xaee   : > { %4332 = vmatprep.subr.bf16.mxu0 %v4331_v39  ;;  %v3137_v39 = vadd.f32 %v3133_v55, %v5258_v59  ;;  %v3140_v59 = vadd.f32 %v3136_v47, %v5270_v25 }
 0xaf1   : > { %4334 = vmatpush1.bf16.msra.mxu0 %v4333_v2 }
 0xaf2   : > { %4336 = vmatprep.subr.bf16.mxu0 %v4335_v38 }
 0xaf5   : > { %4338 = vmatpush1.bf16.msra.mxu0 %v4337_v5 }
 0xaf6   : > { %4340 = vmatprep.subr.bf16.mxu0 %v4339_v7 }
 0xaf9   : > { %4342 = vmatpush1.bf16.msra.mxu0 %v4341_v32 }
 0xb9c   : > { %v3025_v34 = vpop.f32.mrb[20].mxu0  ;;  %v3096_v9 = vpop.f32.mrb[20].mxu1 }
 0xb9d   : > { %v3101_v50 = vadd.f32 %v3025_v34, %v2888_v41  ;;  %v3027_v22 = vpop.f32.mrb[21].mxu0  ;;  %v3098_v63 = vpop.f32.mrb[21].mxu1  ;;  %v3103_v53 = vadd.f32 %v3096_v9, %v2890_v11 }
 0xb9e   : > { %v3102_v23 = vadd.f32 %v3027_v22, %v2889_v18  ;;  %v3104_v36 = vadd.f32 %v3098_v63, %v2891_v3 }
 0xb9f   : > { %v3589_v57 = vmul.f32 -1.442695, %v3101_v50  ;;  %v3591_v56 = vmul.f32 -1.442695, %v3103_v53 }
 0xba0   : > { %v3590_v54 = vmul.f32 -1.442695, %v3102_v23 }
 0xba1   : > { %4624 = vpow2.f32 %v3589_v57 }
 0xba2   : > { %4626 = vpow2.f32 %v3590_v54 }
 0xba3   : > { %4628 = vtanh.f32 %v3104_v36 }
 0xba4   : > { %4630 = vpow2.f32 %v3591_v56 }
 0xbab   : > { %v4625_v28 = vpop.eup %4624 }
 0xbac   : > { %v3114_v49 = vadd.f32 1.0, %v4625_v28  ;;  %v4627_v8 = vpop.eup %4626 }
 0xbad   : > { %v3115_v21 = vadd.f32 1.0, %v4627_v8  ;;  %v4629_v31 = vpop.eup %4628 }
 0xbae   : > { %4632 = vrcp.f32 %v3114_v49  ;;  %v4631_v45 = vpop.eup %4630 }
 0xbaf   : > { %4634 = vrcp.f32 %v3115_v21  ;;  %v3116_v26 = vadd.f32 1.0, %v4631_v45 }
 0xbb1   : > { %4636 = vrcp.f32 %v3116_v26 }
 0xbb8   : > { %v4633_v6 = vpop.eup %4632 }
 0xbb9   : > { %v3128_v30 = vmul.f32 %v4633_v6, %v4629_v31  ;;  %v4635_v44 = vpop.eup %4634 }
 0xbba   : > { %v3127_v17 = vmul.f32 %v4635_v44, %v3125_v60 }
 0xbbb   : > { %v4637_v48 = vpop.eup %4636 }
 0xbbc   : > { %v3129_v13 = vadd.f32 %v3128_v30, %v3127_v17 }
 0xbbe   : > { %4638 = vtanh.f32 %v3129_v13  ;;  %v3383_v41 = vrot.slane %v3129_v13, 4 }
 0xbc8   : > { %v4639_v43 = vpop.eup %4638 }
 0xbc9   : > { %v3131_v40 = vmul.f32 %v4639_v43, %v4637_v48 }
 0xbcb   : > { %3132 = vst [vmem:[%s5114_s15 + $0x28] sm:$0xf] %v3131_v40  ;;  %3270 = vmatmul.mubr.f32.vlgmr.msra.gmra.mrb[22].mxu0 %v3131_v40  ;;  %3341 = vmatmul.mubr.f32.vlgmr.msra.gmra.mrb[22].mxu1 %v3131_v40 }
 0xc9e   : > { %v3271_v19 = vpop.f32.mrb[22].mxu0  ;;  %v3342_v61 = vpop.f32.mrb[22].mxu1 }
 0xc9f   : > { %v3351_v2 = vrot.slane %v3271_v19, 4  ;;  %v3273_v42 = vpop.f32.mrb[23].mxu0  ;;  %v3344_v58 = vpop.f32.mrb[23].mxu1  ;;  %v3353_v27 = vrot.slane %v3342_v61, 4 }
 0xca0   : > { %v3352_v24 = vrot.slane %v3273_v42, 4  ;;  %v3354_v7 = vrot.slane %v3344_v58, 4 }
 0xca1   : > { %v3359_v38 = vadd.f32 %v3351_v2, %v3137_v39  ;;  %v3361_v14 = vadd.f32 %v3353_v27, %v3139_v35 }
 0xca2   : > { %v3360_v51 = vadd.f32 %v3352_v24, %v3138_v1  ;;  %v3362_v62 = vadd.f32 %v3354_v7, %v3140_v59 }
 0xca3   : > { %v3592_v46 = vmul.f32 -1.442695, %v3359_v38  ;;  %v3594_v16 = vmul.f32 -1.442695, %v3361_v14 }
 0xca4   : > { %v3593_v5 = vmul.f32 -1.442695, %v3360_v51 }
 0xca5   : > { %4640 = vpow2.f32 %v3592_v46 }
 0xca6   : > { %4642 = vpow2.f32 %v3593_v5 }
 0xca7   : > { %4644 = vtanh.f32 %v3362_v62 }
 0xca8   : > { %4646 = vpow2.f32 %v3594_v16 }
 0xcaf   : > { %v4641_v52 = vpop.eup %4640 }
 0xcb0   : > { %v3372_v0 = vadd.f32 1.0, %v4641_v52  ;;  %v4643_v33 = vpop.eup %4642 }
 0xcb1   : > { %v3373_v32 = vadd.f32 1.0, %v4643_v33  ;;  %v4645_v37 = vpop.eup %4644 }
 0xcb2   : > { %4648 = vrcp.f32 %v3372_v0  ;;  %v4647_v4 = vpop.eup %4646 }
 0xcb3   : > { %4650 = vrcp.f32 %v3373_v32  ;;  %v3374_v25 = vadd.f32 1.0, %v4647_v4 }
 0xcb5   : > { %4652 = vrcp.f32 %v3374_v25 }
 0xcbc   : > { %v4649_v12 = vpop.eup %4648 }
 0xcbd   : > { %v3386_v18 = vmul.f32 %v4649_v12, %v4645_v37  ;;  %v4651_v34 = vpop.eup %4650 }
 0xcbe   : > { %v3385_v9 = vmul.f32 %v4651_v34, %v3383_v41 }
 0xcbf   : > { %v4653_v22 = vpop.eup %4652 }
 0xcc0   : > { %v3387_v50 = vadd.f32 %v3386_v18, %v3385_v9 }
 0xcc2   : > { %4654 = vtanh.f32 %v3387_v50  ;;  %3392 = vst [vmem:[#allocation3 - $0x4] sm:$0xf0] %v3387_v50  ;;  %3398 = vst [vmem:[#allocation13 - $0x4] sm:$0xf0] (!%p3595_p5), %v3387_v50 }
 0xcc9   : > { %3396 = sbr.rel (%p3595_p5) target bundleno = 3281 (0xcd1), region = 60 }
 0xccc   : > { %v4655_v63 = vpop.eup %4654 }
 0xccd   : > { %v3389_v10 = vmul.f32 %v4655_v63, %v4653_v22 }
 0xccf   : > { %3390 = vst [vmem:[%s5114_s15 + $0x28] sm:$0xf0] %v3389_v10  ;;  %3391 = vst [vmem:[#allocation2 - $0x4] sm:$0xf0] %v3389_v10 }
 0xcd0   : > { %3397 = vst [vmem:[#allocation11 - $0x4] sm:$0xf0] %v3389_v10 }
 0xcd1 PF: > { %s4876_s20 = smov [#allocation11]   ;;  %s3605_s9 = smul.u32 768, %s4942_s28 }
 0xcd2   : > { %s3427_s18 = sshll.u32 %s4876_s20, 4  ;;  %s3413_s11 = sshll.u32 %s5114_s15, 4  ;;  %s3428_s18 = int_to_ptr.vmem [resolvable:$true] %s3427_s18  ;;  %s5888_s11 = int_to_ptr.vmem [resolvable:$true] %s3413_s11 }
 0xcd3   : > { %s4742_s29 = scalar_lea.vmem %s3428_s18, 64  ;;  %p5990_p9 = scmp.eq.s32.totalorder %s4942_s28, 1 }
 0xcd4   : > { %p4743_p8 = scmp.ne.s32.totalorder %s3428_s18, %s4742_s29  ;;  %p4749_p7 = scmp.lt.s32.totalorder %s3428_s18, %s3428_s18 }
 0xcd5   : > { %p4750_p11 = scmp.lt.s32.totalorder %s4742_s29, %s4742_s29 }
 0xcd6   : > { %p4744_p10 = pnand %p4743_p8, %p5990_p9 }
 0xcd7   : > { %p4751_p13 = por %p4750_p11, %p4749_p7 }
 0xcd8   : > { %p4745_p0 = pneg %p4744_p10 }
 0xcda   : > { %p4752_p1 = pnand %p4751_p13, %p4745_p0 }
 0xcdc   : > { %4755 = shalt.err (!%p4752_p1)
}
 0xcdd   : > { %s4756_s17 = scalar_lea.hbm %s5960_s6, 64  ;;  %p5991_p12 = pmov %p5990_p9 }
 0xcde   : > { %p4757_p2 = scmp.ne.s32.totalorder %s5960_s6, %s4756_s17  ;;  %p4762_p4 = scmp.lt.u32.totalorder %s4756_s17, %s5960_s6 }
 0xce0   : > { %p4758_p6 = pnand %p4757_p2, %p5991_p12 }
 0xce2   : > { %p4759_p3 = pneg %p4758_p6 }
 0xce4   : > { %p4764_p5 = pnand %p4762_p4, %p4759_p3 }
 0xce6   : > { %4767 = shalt.err (!%p4764_p5)
}
 0xce7   : > { %p5992_p8 = pmov %p5990_p9  ;;  %s5886_s12 = scalar_lea.hbm %s5959_s5, %s3605_s9 }
 0xce8   : > { %s3400_s20 = scalar_lea.sflag [#allocation6], %s5099_s26  ;;  %s4768_s29 = scalar_lea.vmem %s5888_s11, 768 }
 0xce9   : > { %4390 = dma.vmem_to_hbm [thread:$0]  (%p5992_p8), %s3428_s18, 64, %s5960_s6, [#allocation12]  }
 0xcea   : > { %p4769_p9 = scmp.ne.s32.totalorder %s5888_s11, %s4768_s29  ;;  %p5993_p10 = scmp.ne.s32.totalorder %s5977_s13, 0 }
 0xceb   : > { %s4877_s8 = smov [#allocation10]  }
 0xcec   : > { %p4770_p0 = pnand %p4769_p9, %p5993_p10  ;;  %s4772_s16 = sshll.u32 %s4877_s8, 4  ;;  %s4773_s16 = int_to_ptr.vmem [resolvable:$false] %s4772_s16 }
 0xced   : > { %s4774_s18 = scalar_lea.vmem %s4773_s16, 1536  ;;  %p4775_p11 = scmp.lt.s32.totalorder %s5888_s11, %s4773_s16 }
 0xcee   : > { %p4771_p7 = pneg %p4770_p0  ;;  %p4776_p13 = scmp.lt.s32.totalorder %s4774_s18, %s4768_s29 }
 0xcf0   : > { %p4777_p1 = por %p4776_p13, %p4775_p11 }
 0xcf2   : > { %p4778_p2 = pnand %p4777_p1, %p4771_p7 }
 0xcf4   : > { %4781 = shalt.err (!%p4778_p2)
}
 0xcf5   : > { %s4782_s9 = scalar_lea.hbm %s5886_s12, 768  ;;  %s4786_s22 = scalar_lea.hbm %s5959_s5, 1536 }
 0xcf6   : > { %p4783_p12 = scmp.ne.s32.totalorder %s5886_s12, %s4782_s9  ;;  %p4787_p4 = scmp.lt.u32.totalorder %s5886_s12, %s5959_s5 }
 0xcf7   : > { %p4788_p5 = scmp.lt.u32.totalorder %s4786_s22, %s4782_s9  ;;  %p4790_p9 = scmp.lt.u32.totalorder %s4782_s9, %s5886_s12 }
 0xcf8   : > { %p4784_p6 = pnand %p4783_p12, %p5993_p10 }
 0xcf9   : > { %p4789_p8 = por %p4788_p5, %p4787_p4 }
 0xcfa   : > { %p4785_p3 = pneg %p4784_p6 }
 0xcfb   : > { %p4791_p0 = por %p4790_p9, %p4789_p8 }
 0xcfd   : > { %p4792_p7 = pnand %p4791_p0, %p4785_p3 }
 0xcff   : > { %4795 = shalt.err (!%p4792_p7)
}
 0xd00   : > { %s4878_s15 = smov 128   ;;  %s4879_s19 = smov 8  }
 0xd01   : > { %4388 = dma.vmem_to_hbm [thread:$0]  (%p5993_p10), %s5888_s11, 768, %s5886_s12, %s3400_s20, %s4878_s15, %s4878_s15, %s4879_s19  }
 0xd02   : > { %s4880_s30 = smov [#allocation13]   ;;  %p5994_p13 = scmp.eq.s32.totalorder %s4942_s28, 1 }
 0xd03   : > { %s3438_s10 = sshll.u32 %s4880_s30, 4  ;;  %s3439_s10 = int_to_ptr.vmem [resolvable:$true] %s3438_s10 }
 0xd04   : > { %s4796_s29 = scalar_lea.vmem %s3439_s10, 64  ;;  %p4803_p12 = scmp.lt.s32.totalorder %s3439_s10, %s3439_s10 }
 0xd05   : > { %p4797_p11 = scmp.ne.s32.totalorder %s3439_s10, %s4796_s29  ;;  %p4804_p6 = scmp.lt.s32.totalorder %s4796_s29, %s4796_s29 }
 0xd07   : > { %p4798_p1 = pnand %p4797_p11, %p5994_p13  ;;  %p4805_p3 = por %p4804_p6, %p4803_p12 }
 0xd09   : > { %p4799_p2 = pneg %p4798_p1 }
 0xd0b   : > { %p4806_p4 = pnand %p4805_p3, %p4799_p2 }
 0xd0d   : > { %4809 = shalt.err (!%p4806_p4)
}
 0xd0e   : > { %s4810_s13 = scalar_lea.hbm %s5961_s7, 64  ;;  %p5995_p5 = pmov %p5994_p13 }
 0xd0f   : > { %p4811_p10 = scmp.ne.s32.totalorder %s5961_s7, %s4810_s13  ;;  %p4816_p0 = scmp.lt.u32.totalorder %s4810_s13, %s5961_s7 }
 0xd11   : > { %p4812_p8 = pnand %p4811_p10, %p5995_p5 }
 0xd13   : > { %p4813_p9 = pneg %p4812_p8 }
 0xd15   : > { %p4818_p7 = pnand %p4816_p0, %p4813_p9 }
 0xd17   : > { %4821 = shalt.err (!%p4818_p7)
}
 0xd18   : > { %p5996_p11 = pmov %p5995_p5  ;;  %p5997_p13 = pmov %p5995_p5 }
 0xd1a   : > { %4392 = dma.vmem_to_hbm [thread:$0]  (%p5996_p11), %s3439_s10, 64, %s5961_s7, [#allocation12]  }
 0xd1b   : > { %4847 = dma.done.wait (%p5997_p13), [#allocation12], 128   ;;  %p5998_p1 = pmov %p5995_p5 }
 0xd1d   : > { %4849 = vsyncadd (%p5998_p1), [#allocation12], 4294967168 }
 0xd1e PF: > { %s3458_s17 = sand.u32 1, %s4856_s24   ;;  %p5999_p2 = scmp.ne.s32.totalorder %s5978_s14, 0 }
 0xd1f   : > { %p6000_p12 = scmp.ge.s32.totalorder %s4868_s27, 2  ;;  %s3459_s21 = scalar_lea.sflag [#allocation6], %s3458_s17 }
 0xd21   : > { %p4410_p6 = pnand %p6000_p12, %p5999_p2 }
 0xd23   : > { %4851 = dma.done.wait (!%p4410_p6), %s3459_s21, 768  }
 0xd24   : > { %4853 = vsyncadd (!%p4410_p6), %s3459_s21, 4294966528  ;;  %s6001_s27 = sld [smem:[#allocation19_spill]]  ;;  %s6002_s22 = sld [smem:[#allocation18_spill]] }
 0xd25   : > { %s6003_s26 = sld [smem:[#allocation20_spill]]  ;;  %s6004_s24 = smov %s4860_s25 }
 0xd2a   : > { %p23_p3 = scmp.ge.s32.totalorder %s6001_s27, 4   ;;  %s6005_s25 = smov %s6002_s22 }
 0xd2c   :  { %25 = sbr.rel (!%p23_p3) target bundleno = 9 (0x9), region = 117 }
 0xd33   :  { %3464 = vsyncpa [#allocation5], 1 }
 0xd34   :  { %3466 = vsyncpa [#allocation5 + $0x1], 1 }
 0xd35   :  { %3467 = vsyncpa [#allocation8], 1 }
 0xd36   :  { %3468 = vsyncpa [#allocation6], 1 }
 0xd37   :  { %3470 = vsyncpa [#allocation6 + $0x1], 1 }
 0xd38   :  { %3471 = vsyncpa [#allocation12], 1 }

</bundles_post_ra>
